<compile_context>
chip_gen: v7x
topology: tpu7x:2x2x1
jax: 0.10.0
libtpu: 0.0.40
codegen_flags: <defaults>
</compile_context>

<pallas_src>
import functools
import math

import jax
import jax.numpy as jnp
from jax.experimental import pallas as pl
from jax.experimental.pallas import tpu as pltpu

BN_EPS = 1e-5
VMEM_SPEC = pl.BlockSpec(memory_space=pltpu.MemorySpace.VMEM)


def _elu(v):
    return jnp.where(v > 0, v, jnp.exp(jnp.minimum(v, 0.0)) - 1.0)


def _log_softmax(y):
    m = jnp.max(y, axis=1, keepdims=True)
    z = y - m
    return z - jnp.log(jnp.sum(jnp.exp(z), axis=1, keepdims=True))


# --------------------- fused GAT layer (one pallas_call) ---------------------

def _gat_layer_kernel(x_ref, ex_ref, w_ref, we_ref, a_ref,
                      adj_ref, eadj_ref, ne_ref, en_ref,
                      xo_ref, eo_ref, *, alpha, concat, final):
    # projections (MXU), kept resident in VMEM for all four attentions
    h = jnp.dot(x_ref[...], w_ref[...], preferred_element_type=jnp.float32)    # (N,F')
    he = jnp.dot(ex_ref[...], we_ref[...], preferred_element_type=jnp.float32)  # (E,F')
    a = a_ref[...]   # (8, F'): [nn_s, nn_d, ne_s, ne_d, ee_s, ee_d, en_s, en_d]

    def attn(h_src, h_dst, a_src, a_dst, mask):
        # decomposed logits e_ij = a_src.h_src_i + a_dst.h_dst_j -- pure VPU/XLU
        # reduction work, no M=1 MXU pass.
        f_src = jnp.sum(h_src * a_src, axis=-1, keepdims=True)        # (Ns, 1)
        f_dst = jnp.sum(h_dst * a_dst, axis=-1)                       # (Nd,)
        logits = f_src + f_dst[None, :]                               # (Ns, Nd)
        # LeakyReLU + neighbourhood mask fused into a single select.
        logits = jnp.where(mask > 0.0,
                           jnp.where(logits > 0.0, logits, alpha * logits),
                           -9e15)
        m = jnp.max(logits, axis=1, keepdims=True)
        p = jnp.exp(logits - m)
        inv = pl.reciprocal(jnp.sum(p, axis=1, keepdims=True), approx=True)
        out = jnp.dot(p * inv, h_dst, preferred_element_type=jnp.float32)
        return _elu(out) if concat else out

    h_nn = attn(h, h, a[0:1], a[1:2], adj_ref[...])     # node <- node
    h_ne = attn(h, he, a[2:3], a[3:4], ne_ref[...])     # node <- edge
    h_ee = attn(he, he, a[4:5], a[5:6], eadj_ref[...])  # edge <- edge
    h_en = attn(he, h, a[6:7], a[7:8], en_ref[...])     # edge <- node

    fout = w_ref.shape[1]
    if concat:
        xo_ref[:, :fout] = h_nn
        xo_ref[:, fout:] = h_ne
        eo_ref[:, :fout] = h_ee
        eo_ref[:, fout:] = h_en
    else:
        out_n = 0.5 * (h_nn + h_ne)
        out_e = 0.5 * (h_ee + h_en)
        if final:   # reference applies F.elu + log_softmax(dim=1) afterwards
            out_n = _log_softmax(_elu(out_n))
            out_e = _log_softmax(_elu(out_e))
        xo_ref[...] = out_n
        eo_ref[...] = out_e


def gat_layer(p, x, e_x, adj, e_adj, n_e_adj, n_e_adj_t, *, alpha, concat,
              final=False):
    n, e = x.shape[0], e_x.shape[0]
    fout = p['W'].shape[1]
    out_dim = 2 * fout if concat else fout
    kern = functools.partial(_gat_layer_kernel, alpha=alpha, concat=concat,
                             final=final)
    return pl.pallas_call(
        kern,
        out_shape=(jax.ShapeDtypeStruct((n, out_dim), jnp.float32),
                   jax.ShapeDtypeStruct((e, out_dim), jnp.float32)),
        in_specs=[VMEM_SPEC] * 9,
        out_specs=(VMEM_SPEC, VMEM_SPEC),
    )(x, e_x, p['W'], p['W_e'], p['A'], adj, e_adj, n_e_adj, n_e_adj_t)


# -------- fused readout: both next_layer iterations, node + edge streams --------

def _readout_kernel(hn_ref, he_ref, adj_ref, eadj_ref,
                    w1a_ref, s1a_ref, t1a_ref, w2a_ref, s2a_ref, t2a_ref,
                    w1b_ref, s1b_ref, t1b_ref, w2b_ref, s2b_ref, t2b_ref,
                    on_ref, oe_ref):
    def next_layer(h, adjm, w1, s1, t1, w2, s2, t2):
        pooled = jnp.dot(adjm, h, preferred_element_type=jnp.float32)   # torch.spmm
        h1 = jnp.dot(pooled, w1, preferred_element_type=jnp.float32) * s1 + t1
        h1 = jnp.maximum(h1, 0.0)     # MLP hidden Linear + internal BN + ReLU
        h2 = jnp.dot(h1, w2, preferred_element_type=jnp.float32) * s2 + t2
        return jnp.maximum(h2, 0.0)   # MLP out Linear + outer BatchNorm1d + ReLU

    la = (w1a_ref[...], s1a_ref[...], t1a_ref[...],
          w2a_ref[...], s2a_ref[...], t2a_ref[...])
    lb = (w1b_ref[...], s1b_ref[...], t1b_ref[...],
          w2b_ref[...], s2b_ref[...], t2b_ref[...])
    adjm, eadjm = adj_ref[...], eadj_ref[...]

    hn = next_layer(hn_ref[...], adjm, *la)
    hn = next_layer(hn, adjm, *lb)
    he = next_layer(he_ref[...], eadjm, *la)
    he = next_layer(he, eadjm, *lb)
    on_ref[...] = hn
    oe_ref[...] = he


def readout(mlps, bns, h_n, h_e, adj, e_adj):
    def fold(mlp, bn):
        # eval-mode BatchNorm (running_mean=0, running_var=1) folded into affine
        g, b = bn
        s1 = mlp['bn1_gamma'] / jnp.sqrt(1.0 + BN_EPS)
        t1 = mlp['b1'] * s1 + mlp['bn1_beta']
        s2 = g / jnp.sqrt(1.0 + BN_EPS)
        t2 = mlp['b2'] * s2 + b
        return (mlp['W1'], s1[None, :], t1[None, :],
                mlp['W2'], s2[None, :], t2[None, :])

    pa, pb = fold(mlps[0], bns[0]), fold(mlps[1], bns[1])
    n, e = h_n.shape[0], h_e.shape[0]
    d = mlps[1]['W2'].shape[1]
    return pl.pallas_call(
        _readout_kernel,
        out_shape=(jax.ShapeDtypeStruct((n, d), jnp.float32),
                   jax.ShapeDtypeStruct((e, d), jnp.float32)),
        in_specs=[VMEM_SPEC] * 16,
        out_specs=(VMEM_SPEC, VMEM_SPEC),
    )(h_n, h_e, adj, e_adj, *pa, *pb)


# --------------------------- parameter builders ----------------------------

def _xavier(key, shape, gain=1.414):
    fan_in, fan_out = shape
    lim = gain * math.sqrt(6.0 / (fan_in + fan_out))
    return jax.random.uniform(key, shape, jnp.float32, -lim, lim)


def init_gat_layer(key, in_f, e_in_f, out_f):
    ks = jax.random.split(key, 6)
    halves = []
    for k in ks[2:6]:                         # a_nn, a_ne, a_ee, a_en
        v = _xavier(k, (2 * out_f, 1))[:, 0]
        halves += [v[:out_f], v[out_f:]]      # (src, dst) halves
    return dict(W=_xavier(ks[0], (in_f, out_f)),
                W_e=_xavier(ks[1], (e_in_f, out_f)),
                A=jnp.stack(halves, axis=0))  # (8, out_f), stacked at init


def init_mlp(key, in_dim, hid, out_dim):
    k1, k2, k3, k4 = jax.random.split(key, 4)
    def _kaiming(k, shape, fan_in):
        lim = math.sqrt(1.0 / fan_in)
        return jax.random.uniform(k, shape, jnp.float32, -lim, lim)
    return dict(
        W1=_kaiming(k1, (in_dim, hid), in_dim), b1=_kaiming(k2, (hid,), in_dim),
        bn1_gamma=jnp.ones((hid,), jnp.float32),
        bn1_beta=jnp.zeros((hid,), jnp.float32),
        W2=_kaiming(k3, (hid, out_dim), hid), b2=_kaiming(k4, (out_dim,), hid),
    )


# ------------------------------ model forward ------------------------------

def gat_forward(params, x, e_x, adj, e_adj, n_e_adj, *, alpha):
    # TODO(synk): training-mode F.dropout is stochastic; eval-mode (identity) used.
    n_e_adj_t = n_e_adj.T          # built once; reused by every layer (edge<-node mask)
    h, h_e = gat_layer(params['in_att'], x, e_x, adj, e_adj, n_e_adj, n_e_adj_t,
                       alpha=alpha, concat=True)
    for p in params['attentions']:
        h, h_e = gat_layer(p, h, h_e, adj, e_adj, n_e_adj, n_e_adj_t,
                           alpha=alpha, concat=True)
    # both next_layer iterations (node + edge streams) in a single kernel
    h_n, h_eo = readout(params['mlps'], params['bn'], h, h_e, adj, e_adj)
    # out_att is called twice with identical args in the reference; compute once,
    # with F.elu + log_softmax fused into the same kernel.
    return gat_layer(params['out_att'], h_n, h_eo, adj, e_adj, n_e_adj, n_e_adj_t,
                     alpha=alpha, concat=False, final=True)


# ----------------------------------- main -----------------------------------

if __name__ == "__main__":
    N, E = 16, 32
    NFEAT, EFEAT, NHID, NCLASS, NHEADS = 8, 8, 32, 4, 2   # nhid*2^(nheads+1)=256
    ALPHA = 0.2

    key = jax.random.PRNGKey(0)
    k_x, k_ex, k_adj, k_eadj, k_ne, k_params = jax.random.split(key, 6)

    x = jax.random.normal(k_x, (N, NFEAT), jnp.float32)
    e_x = jax.random.normal(k_ex, (E, EFEAT), jnp.float32)

    adj = (jax.random.uniform(k_adj, (N, N)) < 0.3).astype(jnp.float32)
    adj = jnp.maximum(jnp.maximum(adj, adj.T), jnp.eye(N, dtype=jnp.float32))
    e_adj = (jax.random.uniform(k_eadj, (E, E)) < 0.2).astype(jnp.float32)
    e_adj = jnp.maximum(jnp.maximum(e_adj, e_adj.T), jnp.eye(E, dtype=jnp.float32))
    n_e_adj = (jax.random.uniform(k_ne, (N, E)) < 0.25).astype(jnp.float32)

    kk = jax.random.split(k_params, 8)
    params = dict(
        in_att=init_gat_layer(kk[0], NFEAT, EFEAT, NHID),
        attentions=[init_gat_layer(kk[1 + i],
                                   NHID * 2 ** (i + 1),
                                   NHID * 2 ** (i + 1),
                                   NHID * 2 ** (i + 1)) for i in range(NHEADS)],
        # reference hard-codes GraphAttentionLayer(64, 64, nclass) for out_att
        out_att=init_gat_layer(kk[3], 64, 64, NCLASS),
        mlps=[init_mlp(kk[4], 256, 64, 64), init_mlp(kk[5], 64, 64, 64)],
        bn=[(jnp.ones((64,), jnp.float32), jnp.zeros((64,), jnp.float32))
            for _ in range(2)],
    )

    fwd = jax.jit(functools.partial(gat_forward, alpha=ALPHA))
    log_px, log_pe = fwd(params, x, e_x, adj, e_adj, n_e_adj)
    jax.block_until_ready((log_px, log_pe))

    assert log_px.shape == (N, NCLASS) and log_pe.shape == (E, NCLASS)
    assert bool(jnp.all(jnp.isfinite(log_px))) and bool(jnp.all(jnp.isfinite(log_pe)))
    print("KERNEL_OK")
</pallas_src>

<mosaic_0001>
module attributes {stable_mosaic.version = 11 : i64} {
  func.func @_gat_layer_kernel(%arg0: memref<16x8xf32, #tpu.memory_space<vmem>>, %arg1: memref<32x8xf32, #tpu.memory_space<vmem>>, %arg2: memref<8x32xf32, #tpu.memory_space<vmem>>, %arg3: memref<8x32xf32, #tpu.memory_space<vmem>>, %arg4: memref<8x32xf32, #tpu.memory_space<vmem>>, %arg5: memref<16x16xf32, #tpu.memory_space<vmem>>, %arg6: memref<32x32xf32, #tpu.memory_space<vmem>>, %arg7: memref<16x32xf32, #tpu.memory_space<vmem>>, %arg8: memref<32x16xf32, #tpu.memory_space<vmem>>, %arg9: memref<16x64xf32, #tpu.memory_space<vmem>>, %arg10: memref<32x64xf32, #tpu.memory_space<vmem>>) attributes {dimension_semantics = [], scalar_prefetch = 0 : i64, scratch_operands = 0 : i64, tpu.core_type = #tpu.core_type<tc>} {
    %c0 = arith.constant 0 : index
    %c0_0 = arith.constant 0 : index
    %0 = vector.load %arg0[%c0, %c0_0] : memref<16x8xf32, #tpu.memory_space<vmem>>, vector<16x8xf32>
    %c0_1 = arith.constant 0 : index
    %c0_2 = arith.constant 0 : index
    %1 = vector.load %arg2[%c0_1, %c0_2] : memref<8x32xf32, #tpu.memory_space<vmem>>, vector<8x32xf32>
    %cst = arith.constant dense<0.000000e+00> : vector<16x32xf32>
    %2 = tpu.matmul %0, %1, %cst {dimension_numbers = #tpu.dot_dimension_numbers<[1], [0], [0], [1], [0, 0, 1, 1], [], []>} : vector<16x8xf32>, vector<8x32xf32>, vector<16x32xf32> -> vector<16x32xf32>
    %c0_3 = arith.constant 0 : index
    %c0_4 = arith.constant 0 : index
    %3 = vector.load %arg1[%c0_3, %c0_4] : memref<32x8xf32, #tpu.memory_space<vmem>>, vector<32x8xf32>
    %c0_5 = arith.constant 0 : index
    %c0_6 = arith.constant 0 : index
    %4 = vector.load %arg3[%c0_5, %c0_6] : memref<8x32xf32, #tpu.memory_space<vmem>>, vector<8x32xf32>
    %cst_7 = arith.constant dense<0.000000e+00> : vector<32x32xf32>
    %5 = tpu.matmul %3, %4, %cst_7 {dimension_numbers = #tpu.dot_dimension_numbers<[1], [0], [0], [1], [0, 0, 1, 1], [], []>} : vector<32x8xf32>, vector<8x32xf32>, vector<32x32xf32> -> vector<32x32xf32>
    %c0_8 = arith.constant 0 : index
    %c0_9 = arith.constant 0 : index
    %6 = vector.load %arg4[%c0_8, %c0_9] : memref<8x32xf32, #tpu.memory_space<vmem>>, vector<8x32xf32>
    %7 = vector.extract_strided_slice %6 {offsets = [0, 0], sizes = [1, 32], strides = [1, 1]} : vector<8x32xf32> to vector<1x32xf32>
    %8 = vector.extract_strided_slice %6 {offsets = [1, 0], sizes = [1, 32], strides = [1, 1]} : vector<8x32xf32> to vector<1x32xf32>
    %c0_10 = arith.constant 0 : index
    %c0_11 = arith.constant 0 : index
    %9 = vector.load %arg5[%c0_10, %c0_11] : memref<16x16xf32, #tpu.memory_space<vmem>>, vector<16x16xf32>
    %10 = vector.broadcast %7 : vector<1x32xf32> to vector<16x32xf32>
    %11 = arith.mulf %2, %10 : vector<16x32xf32>
    %cst_12 = arith.constant dense<0.000000e+00> : vector<16xf32>
    %12 = vector.multi_reduction <add>, %11, %cst_12 [1] : vector<16x32xf32> to vector<16xf32>
    %13 = vector.shape_cast %12 : vector<16xf32> to vector<16x1xf32>
    %14 = vector.broadcast %8 : vector<1x32xf32> to vector<16x32xf32>
    %15 = arith.mulf %2, %14 : vector<16x32xf32>
    %cst_13 = arith.constant dense<0.000000e+00> : vector<16xf32>
    %16 = vector.multi_reduction <add>, %15, %cst_13 [1] : vector<16x32xf32> to vector<16xf32>
    %17 = vector.shape_cast %16 : vector<16xf32> to vector<1x16xf32>
    %18 = vector.broadcast %13 : vector<16x1xf32> to vector<16x16xf32>
    %19 = vector.broadcast %17 : vector<1x16xf32> to vector<16x16xf32>
    %20 = arith.addf %18, %19 : vector<16x16xf32>
    %cst_14 = arith.constant 0.000000e+00 : f32
    %21 = vector.broadcast %cst_14 : f32 to vector<16x16xf32>
    %22 = arith.cmpf ogt, %9, %21 : vector<16x16xf32>
    %cst_15 = arith.constant 0.000000e+00 : f32
    %23 = vector.broadcast %cst_15 : f32 to vector<16x16xf32>
    %24 = arith.cmpf ogt, %20, %23 : vector<16x16xf32>
    %cst_16 = arith.constant 2.000000e-01 : f32
    %25 = vector.broadcast %cst_16 : f32 to vector<16x16xf32>
    %26 = arith.mulf %25, %20 : vector<16x16xf32>
    %27 = arith.select %24, %20, %26 : vector<16x16xi1>, vector<16x16xf32>
    %cst_17 = arith.constant -9.000000e+15 : f32
    %28 = vector.broadcast %cst_17 : f32 to vector<16x16xf32>
    %29 = arith.select %22, %27, %28 : vector<16x16xi1>, vector<16x16xf32>
    %cst_18 = arith.constant dense<0xFF800000> : vector<16xf32>
    %30 = vector.multi_reduction <maximumf>, %29, %cst_18 [1] : vector<16x16xf32> to vector<16xf32>
    %31 = vector.shape_cast %30 : vector<16xf32> to vector<16x1xf32>
    %32 = vector.broadcast %31 : vector<16x1xf32> to vector<16x16xf32>
    %33 = arith.subf %29, %32 : vector<16x16xf32>
    %34 = math.exp %33 : vector<16x16xf32>
    %cst_19 = arith.constant dense<0.000000e+00> : vector<16xf32>
    %35 = vector.multi_reduction <add>, %34, %cst_19 [1] : vector<16x16xf32> to vector<16xf32>
    %36 = vector.shape_cast %35 : vector<16xf32> to vector<16x1xf32>
    %37 = tpu.reciprocal %36 {approx = true} : vector<16x1xf32> -> vector<16x1xf32>
    %38 = vector.broadcast %37 : vector<16x1xf32> to vector<16x16xf32>
    %39 = arith.mulf %34, %38 : vector<16x16xf32>
    %cst_20 = arith.constant dense<0.000000e+00> : vector<16x32xf32>
    %40 = tpu.matmul %39, %2, %cst_20 {dimension_numbers = #tpu.dot_dimension_numbers<[1], [0], [0], [1], [0, 0, 1, 1], [], []>} : vector<16x16xf32>, vector<16x32xf32>, vector<16x32xf32> -> vector<16x32xf32>
    %cst_21 = arith.constant 0.000000e+00 : f32
    %41 = vector.broadcast %cst_21 : f32 to vector<16x32xf32>
    %42 = arith.cmpf ogt, %40, %41 : vector<16x32xf32>
    %cst_22 = arith.constant 0.000000e+00 : f32
    %43 = vector.broadcast %cst_22 : f32 to vector<16x32xf32>
    %44 = arith.minimumf %40, %43 : vector<16x32xf32>
    %45 = math.exp %44 : vector<16x32xf32>
    %cst_23 = arith.constant 1.000000e+00 : f32
    %46 = vector.broadcast %cst_23 : f32 to vector<16x32xf32>
    %47 = arith.subf %45, %46 : vector<16x32xf32>
    %48 = arith.select %42, %40, %47 : vector<16x32xi1>, vector<16x32xf32>
    %49 = vector.extract_strided_slice %6 {offsets = [2, 0], sizes = [1, 32], strides = [1, 1]} : vector<8x32xf32> to vector<1x32xf32>
    %50 = vector.extract_strided_slice %6 {offsets = [3, 0], sizes = [1, 32], strides = [1, 1]} : vector<8x32xf32> to vector<1x32xf32>
    %c0_24 = arith.constant 0 : index
    %c0_25 = arith.constant 0 : index
    %51 = vector.load %arg7[%c0_24, %c0_25] : memref<16x32xf32, #tpu.memory_space<vmem>>, vector<16x32xf32>
    %52 = vector.broadcast %49 : vector<1x32xf32> to vector<16x32xf32>
    %53 = arith.mulf %2, %52 : vector<16x32xf32>
    %cst_26 = arith.constant dense<0.000000e+00> : vector<16xf32>
    %54 = vector.multi_reduction <add>, %53, %cst_26 [1] : vector<16x32xf32> to vector<16xf32>
    %55 = vector.shape_cast %54 : vector<16xf32> to vector<16x1xf32>
    %56 = vector.broadcast %50 : vector<1x32xf32> to vector<32x32xf32>
    %57 = arith.mulf %5, %56 : vector<32x32xf32>
    %cst_27 = arith.constant dense<0.000000e+00> : vector<32xf32>
    %58 = vector.multi_reduction <add>, %57, %cst_27 [1] : vector<32x32xf32> to vector<32xf32>
    %59 = vector.shape_cast %58 : vector<32xf32> to vector<1x32xf32>
    %60 = vector.broadcast %55 : vector<16x1xf32> to vector<16x32xf32>
    %61 = vector.broadcast %59 : vector<1x32xf32> to vector<16x32xf32>
    %62 = arith.addf %60, %61 : vector<16x32xf32>
    %cst_28 = arith.constant 0.000000e+00 : f32
    %63 = vector.broadcast %cst_28 : f32 to vector<16x32xf32>
    %64 = arith.cmpf ogt, %51, %63 : vector<16x32xf32>
    %cst_29 = arith.constant 0.000000e+00 : f32
    %65 = vector.broadcast %cst_29 : f32 to vector<16x32xf32>
    %66 = arith.cmpf ogt, %62, %65 : vector<16x32xf32>
    %cst_30 = arith.constant 2.000000e-01 : f32
    %67 = vector.broadcast %cst_30 : f32 to vector<16x32xf32>
    %68 = arith.mulf %67, %62 : vector<16x32xf32>
    %69 = arith.select %66, %62, %68 : vector<16x32xi1>, vector<16x32xf32>
    %cst_31 = arith.constant -9.000000e+15 : f32
    %70 = vector.broadcast %cst_31 : f32 to vector<16x32xf32>
    %71 = arith.select %64, %69, %70 : vector<16x32xi1>, vector<16x32xf32>
    %cst_32 = arith.constant dense<0xFF800000> : vector<16xf32>
    %72 = vector.multi_reduction <maximumf>, %71, %cst_32 [1] : vector<16x32xf32> to vector<16xf32>
    %73 = vector.shape_cast %72 : vector<16xf32> to vector<16x1xf32>
    %74 = vector.broadcast %73 : vector<16x1xf32> to vector<16x32xf32>
    %75 = arith.subf %71, %74 : vector<16x32xf32>
    %76 = math.exp %75 : vector<16x32xf32>
    %cst_33 = arith.constant dense<0.000000e+00> : vector<16xf32>
    %77 = vector.multi_reduction <add>, %76, %cst_33 [1] : vector<16x32xf32> to vector<16xf32>
    %78 = vector.shape_cast %77 : vector<16xf32> to vector<16x1xf32>
    %79 = tpu.reciprocal %78 {approx = true} : vector<16x1xf32> -> vector<16x1xf32>
    %80 = vector.broadcast %79 : vector<16x1xf32> to vector<16x32xf32>
    %81 = arith.mulf %76, %80 : vector<16x32xf32>
    %cst_34 = arith.constant dense<0.000000e+00> : vector<16x32xf32>
    %82 = tpu.matmul %81, %5, %cst_34 {dimension_numbers = #tpu.dot_dimension_numbers<[1], [0], [0], [1], [0, 0, 1, 1], [], []>} : vector<16x32xf32>, vector<32x32xf32>, vector<16x32xf32> -> vector<16x32xf32>
    %cst_35 = arith.constant 0.000000e+00 : f32
    %83 = vector.broadcast %cst_35 : f32 to vector<16x32xf32>
    %84 = arith.cmpf ogt, %82, %83 : vector<16x32xf32>
    %cst_36 = arith.constant 0.000000e+00 : f32
    %85 = vector.broadcast %cst_36 : f32 to vector<16x32xf32>
    %86 = arith.minimumf %82, %85 : vector<16x32xf32>
    %87 = math.exp %86 : vector<16x32xf32>
    %cst_37 = arith.constant 1.000000e+00 : f32
    %88 = vector.broadcast %cst_37 : f32 to vector<16x32xf32>
    %89 = arith.subf %87, %88 : vector<16x32xf32>
    %90 = arith.select %84, %82, %89 : vector<16x32xi1>, vector<16x32xf32>
    %91 = vector.extract_strided_slice %6 {offsets = [4, 0], sizes = [1, 32], strides = [1, 1]} : vector<8x32xf32> to vector<1x32xf32>
    %92 = vector.extract_strided_slice %6 {offsets = [5, 0], sizes = [1, 32], strides = [1, 1]} : vector<8x32xf32> to vector<1x32xf32>
    %c0_38 = arith.constant 0 : index
    %c0_39 = arith.constant 0 : index
    %93 = vector.load %arg6[%c0_38, %c0_39] : memref<32x32xf32, #tpu.memory_space<vmem>>, vector<32x32xf32>
    %94 = vector.broadcast %91 : vector<1x32xf32> to vector<32x32xf32>
    %95 = arith.mulf %5, %94 : vector<32x32xf32>
    %cst_40 = arith.constant dense<0.000000e+00> : vector<32xf32>
    %96 = vector.multi_reduction <add>, %95, %cst_40 [1] : vector<32x32xf32> to vector<32xf32>
    %97 = vector.shape_cast %96 : vector<32xf32> to vector<32x1xf32>
    %98 = vector.broadcast %92 : vector<1x32xf32> to vector<32x32xf32>
    %99 = arith.mulf %5, %98 : vector<32x32xf32>
    %cst_41 = arith.constant dense<0.000000e+00> : vector<32xf32>
    %100 = vector.multi_reduction <add>, %99, %cst_41 [1] : vector<32x32xf32> to vector<32xf32>
    %101 = vector.shape_cast %100 : vector<32xf32> to vector<1x32xf32>
    %102 = vector.broadcast %97 : vector<32x1xf32> to vector<32x32xf32>
    %103 = vector.broadcast %101 : vector<1x32xf32> to vector<32x32xf32>
    %104 = arith.addf %102, %103 : vector<32x32xf32>
    %cst_42 = arith.constant 0.000000e+00 : f32
    %105 = vector.broadcast %cst_42 : f32 to vector<32x32xf32>
    %106 = arith.cmpf ogt, %93, %105 : vector<32x32xf32>
    %cst_43 = arith.constant 0.000000e+00 : f32
    %107 = vector.broadcast %cst_43 : f32 to vector<32x32xf32>
    %108 = arith.cmpf ogt, %104, %107 : vector<32x32xf32>
    %cst_44 = arith.constant 2.000000e-01 : f32
    %109 = vector.broadcast %cst_44 : f32 to vector<32x32xf32>
    %110 = arith.mulf %109, %104 : vector<32x32xf32>
    %111 = arith.select %108, %104, %110 : vector<32x32xi1>, vector<32x32xf32>
    %cst_45 = arith.constant -9.000000e+15 : f32
    %112 = vector.broadcast %cst_45 : f32 to vector<32x32xf32>
    %113 = arith.select %106, %111, %112 : vector<32x32xi1>, vector<32x32xf32>
    %cst_46 = arith.constant dense<0xFF800000> : vector<32xf32>
    %114 = vector.multi_reduction <maximumf>, %113, %cst_46 [1] : vector<32x32xf32> to vector<32xf32>
    %115 = vector.shape_cast %114 : vector<32xf32> to vector<32x1xf32>
    %116 = vector.broadcast %115 : vector<32x1xf32> to vector<32x32xf32>
    %117 = arith.subf %113, %116 : vector<32x32xf32>
    %118 = math.exp %117 : vector<32x32xf32>
    %cst_47 = arith.constant dense<0.000000e+00> : vector<32xf32>
    %119 = vector.multi_reduction <add>, %118, %cst_47 [1] : vector<32x32xf32> to vector<32xf32>
    %120 = vector.shape_cast %119 : vector<32xf32> to vector<32x1xf32>
    %121 = tpu.reciprocal %120 {approx = true} : vector<32x1xf32> -> vector<32x1xf32>
    %122 = vector.broadcast %121 : vector<32x1xf32> to vector<32x32xf32>
    %123 = arith.mulf %118, %122 : vector<32x32xf32>
    %cst_48 = arith.constant dense<0.000000e+00> : vector<32x32xf32>
    %124 = tpu.matmul %123, %5, %cst_48 {dimension_numbers = #tpu.dot_dimension_numbers<[1], [0], [0], [1], [0, 0, 1, 1], [], []>} : vector<32x32xf32>, vector<32x32xf32>, vector<32x32xf32> -> vector<32x32xf32>
    %cst_49 = arith.constant 0.000000e+00 : f32
    %125 = vector.broadcast %cst_49 : f32 to vector<32x32xf32>
    %126 = arith.cmpf ogt, %124, %125 : vector<32x32xf32>
    %cst_50 = arith.constant 0.000000e+00 : f32
    %127 = vector.broadcast %cst_50 : f32 to vector<32x32xf32>
    %128 = arith.minimumf %124, %127 : vector<32x32xf32>
    %129 = math.exp %128 : vector<32x32xf32>
    %cst_51 = arith.constant 1.000000e+00 : f32
    %130 = vector.broadcast %cst_51 : f32 to vector<32x32xf32>
    %131 = arith.subf %129, %130 : vector<32x32xf32>
    %132 = arith.select %126, %124, %131 : vector<32x32xi1>, vector<32x32xf32>
    %133 = vector.extract_strided_slice %6 {offsets = [6, 0], sizes = [1, 32], strides = [1, 1]} : vector<8x32xf32> to vector<1x32xf32>
    %134 = vector.extract_strided_slice %6 {offsets = [7, 0], sizes = [1, 32], strides = [1, 1]} : vector<8x32xf32> to vector<1x32xf32>
    %c0_52 = arith.constant 0 : index
    %c0_53 = arith.constant 0 : index
    %135 = vector.load %arg8[%c0_52, %c0_53] : memref<32x16xf32, #tpu.memory_space<vmem>>, vector<32x16xf32>
    %136 = vector.broadcast %133 : vector<1x32xf32> to vector<32x32xf32>
    %137 = arith.mulf %5, %136 : vector<32x32xf32>
    %cst_54 = arith.constant dense<0.000000e+00> : vector<32xf32>
    %138 = vector.multi_reduction <add>, %137, %cst_54 [1] : vector<32x32xf32> to vector<32xf32>
    %139 = vector.shape_cast %138 : vector<32xf32> to vector<32x1xf32>
    %140 = vector.broadcast %134 : vector<1x32xf32> to vector<16x32xf32>
    %141 = arith.mulf %2, %140 : vector<16x32xf32>
    %cst_55 = arith.constant dense<0.000000e+00> : vector<16xf32>
    %142 = vector.multi_reduction <add>, %141, %cst_55 [1] : vector<16x32xf32> to vector<16xf32>
    %143 = vector.shape_cast %142 : vector<16xf32> to vector<1x16xf32>
    %144 = vector.broadcast %139 : vector<32x1xf32> to vector<32x16xf32>
    %145 = vector.broadcast %143 : vector<1x16xf32> to vector<32x16xf32>
    %146 = arith.addf %144, %145 : vector<32x16xf32>
    %cst_56 = arith.constant 0.000000e+00 : f32
    %147 = vector.broadcast %cst_56 : f32 to vector<32x16xf32>
    %148 = arith.cmpf ogt, %135, %147 : vector<32x16xf32>
    %cst_57 = arith.constant 0.000000e+00 : f32
    %149 = vector.broadcast %cst_57 : f32 to vector<32x16xf32>
    %150 = arith.cmpf ogt, %146, %149 : vector<32x16xf32>
    %cst_58 = arith.constant 2.000000e-01 : f32
    %151 = vector.broadcast %cst_58 : f32 to vector<32x16xf32>
    %152 = arith.mulf %151, %146 : vector<32x16xf32>
    %153 = arith.select %150, %146, %152 : vector<32x16xi1>, vector<32x16xf32>
    %cst_59 = arith.constant -9.000000e+15 : f32
    %154 = vector.broadcast %cst_59 : f32 to vector<32x16xf32>
    %155 = arith.select %148, %153, %154 : vector<32x16xi1>, vector<32x16xf32>
    %cst_60 = arith.constant dense<0xFF800000> : vector<32xf32>
    %156 = vector.multi_reduction <maximumf>, %155, %cst_60 [1] : vector<32x16xf32> to vector<32xf32>
    %157 = vector.shape_cast %156 : vector<32xf32> to vector<32x1xf32>
    %158 = vector.broadcast %157 : vector<32x1xf32> to vector<32x16xf32>
    %159 = arith.subf %155, %158 : vector<32x16xf32>
    %160 = math.exp %159 : vector<32x16xf32>
    %cst_61 = arith.constant dense<0.000000e+00> : vector<32xf32>
    %161 = vector.multi_reduction <add>, %160, %cst_61 [1] : vector<32x16xf32> to vector<32xf32>
    %162 = vector.shape_cast %161 : vector<32xf32> to vector<32x1xf32>
    %163 = tpu.reciprocal %162 {approx = true} : vector<32x1xf32> -> vector<32x1xf32>
    %164 = vector.broadcast %163 : vector<32x1xf32> to vector<32x16xf32>
    %165 = arith.mulf %160, %164 : vector<32x16xf32>
    %cst_62 = arith.constant dense<0.000000e+00> : vector<32x32xf32>
    %166 = tpu.matmul %165, %2, %cst_62 {dimension_numbers = #tpu.dot_dimension_numbers<[1], [0], [0], [1], [0, 0, 1, 1], [], []>} : vector<32x16xf32>, vector<16x32xf32>, vector<32x32xf32> -> vector<32x32xf32>
    %cst_63 = arith.constant 0.000000e+00 : f32
    %167 = vector.broadcast %cst_63 : f32 to vector<32x32xf32>
    %168 = arith.cmpf ogt, %166, %167 : vector<32x32xf32>
    %cst_64 = arith.constant 0.000000e+00 : f32
    %169 = vector.broadcast %cst_64 : f32 to vector<32x32xf32>
    %170 = arith.minimumf %166, %169 : vector<32x32xf32>
    %171 = math.exp %170 : vector<32x32xf32>
    %cst_65 = arith.constant 1.000000e+00 : f32
    %172 = vector.broadcast %cst_65 : f32 to vector<32x32xf32>
    %173 = arith.subf %171, %172 : vector<32x32xf32>
    %174 = arith.select %168, %166, %173 : vector<32x32xi1>, vector<32x32xf32>
    %c0_66 = arith.constant 0 : index
    %c0_67 = arith.constant 0 : index
    %175 = vector.load %arg9[%c0_66, %c0_67] : memref<16x64xf32, #tpu.memory_space<vmem>>, vector<16x32xf32>
    tpu.vector_store %arg9[%c0_66, %c0_67], %48 {strides = array<i32>} : memref<16x64xf32, #tpu.memory_space<vmem>>, vector<16x32xf32>,
    %c0_68 = arith.constant 0 : index
    %c32 = arith.constant 32 : index
    %176 = vector.load %arg9[%c0_68, %c32] : memref<16x64xf32, #tpu.memory_space<vmem>>, vector<16x32xf32>
    tpu.vector_store %arg9[%c0_68, %c32], %90 {strides = array<i32>} : memref<16x64xf32, #tpu.memory_space<vmem>>, vector<16x32xf32>,
    %c0_69 = arith.constant 0 : index
    %c0_70 = arith.constant 0 : index
    %177 = vector.load %arg10[%c0_69, %c0_70] : memref<32x64xf32, #tpu.memory_space<vmem>>, vector<32x32xf32>
    tpu.vector_store %arg10[%c0_69, %c0_70], %132 {strides = array<i32>} : memref<32x64xf32, #tpu.memory_space<vmem>>, vector<32x32xf32>,
    %c0_71 = arith.constant 0 : index
    %c32_72 = arith.constant 32 : index
    %178 = vector.load %arg10[%c0_71, %c32_72] : memref<32x64xf32, #tpu.memory_space<vmem>>, vector<32x32xf32>
    tpu.vector_store %arg10[%c0_71, %c32_72], %174 {strides = array<i32>} : memref<32x64xf32, #tpu.memory_space<vmem>>, vector<32x32xf32>,
    return
  }
}

module attributes {stable_mosaic.version = 11 : i64} {
  func.func @_gat_layer_kernel(%arg0: memref<16x128xf32, #tpu.memory_space<vmem>>, %arg1: memref<32x128xf32, #tpu.memory_space<vmem>>, %arg2: memref<128x128xf32, #tpu.memory_space<vmem>>, %arg3: memref<128x128xf32, #tpu.memory_space<vmem>>, %arg4: memref<8x128xf32, #tpu.memory_space<vmem>>, %arg5: memref<16x16xf32, #tpu.memory_space<vmem>>, %arg6: memref<32x32xf32, #tpu.memory_space<vmem>>, %arg7: memref<16x32xf32, #tpu.memory_space<vmem>>, %arg8: memref<32x16xf32, #tpu.memory_space<vmem>>, %arg9: memref<16x256xf32, #tpu.memory_space<vmem>>, %arg10: memref<32x256xf32, #tpu.memory_space<vmem>>) attributes {dimension_semantics = [], scalar_prefetch = 0 : i64, scratch_operands = 0 : i64, tpu.core_type = #tpu.core_type<tc>} {
    %c0 = arith.constant 0 : index
    %c0_0 = arith.constant 0 : index
    %0 = vector.load %arg0[%c0, %c0_0] : memref<16x128xf32, #tpu.memory_space<vmem>>, vector<16x128xf32>
    %c0_1 = arith.constant 0 : index
    %c0_2 = arith.constant 0 : index
    %1 = vector.load %arg2[%c0_1, %c0_2] : memref<128x128xf32, #tpu.memory_space<vmem>>, vector<128x128xf32>
    %cst = arith.constant dense<0.000000e+00> : vector<16x128xf32>
    %2 = tpu.matmul %0, %1, %cst {dimension_numbers = #tpu.dot_dimension_numbers<[1], [0], [0], [1], [0, 0, 1, 1], [], []>} : vector<16x128xf32>, vector<128x128xf32>, vector<16x128xf32> -> vector<16x128xf32>
    %c0_3 = arith.constant 0 : index
    %c0_4 = arith.constant 0 : index
    %3 = vector.load %arg1[%c0_3, %c0_4] : memref<32x128xf32, #tpu.memory_space<vmem>>, vector<32x128xf32>
    %c0_5 = arith.constant 0 : index
    %c0_6 = arith.constant 0 : index
    %4 = vector.load %arg3[%c0_5, %c0_6] : memref<128x128xf32, #tpu.memory_space<vmem>>, vector<128x128xf32>
    %cst_7 = arith.constant dense<0.000000e+00> : vector<32x128xf32>
    %5 = tpu.matmul %3, %4, %cst_7 {dimension_numbers = #tpu.dot_dimension_numbers<[1], [0], [0], [1], [0, 0, 1, 1], [], []>} : vector<32x128xf32>, vector<128x128xf32>, vector<32x128xf32> -> vector<32x128xf32>
    %c0_8 = arith.constant 0 : index
    %c0_9 = arith.constant 0 : index
    %6 = vector.load %arg4[%c0_8, %c0_9] : memref<8x128xf32, #tpu.memory_space<vmem>>, vector<8x128xf32>
    %7 = vector.extract_strided_slice %6 {offsets = [0, 0], sizes = [1, 128], strides = [1, 1]} : vector<8x128xf32> to vector<1x128xf32>
    %8 = vector.extract_strided_slice %6 {offsets = [1, 0], sizes = [1, 128], strides = [1, 1]} : vector<8x128xf32> to vector<1x128xf32>
    %c0_10 = arith.constant 0 : index
    %c0_11 = arith.constant 0 : index
    %9 = vector.load %arg5[%c0_10, %c0_11] : memref<16x16xf32, #tpu.memory_space<vmem>>, vector<16x16xf32>
    %10 = vector.broadcast %7 : vector<1x128xf32> to vector<16x128xf32>
    %11 = arith.mulf %2, %10 : vector<16x128xf32>
    %cst_12 = arith.constant dense<0.000000e+00> : vector<16xf32>
    %12 = vector.multi_reduction <add>, %11, %cst_12 [1] : vector<16x128xf32> to vector<16xf32>
    %13 = vector.shape_cast %12 : vector<16xf32> to vector<16x1xf32>
    %14 = vector.broadcast %8 : vector<1x128xf32> to vector<16x128xf32>
    %15 = arith.mulf %2, %14 : vector<16x128xf32>
    %cst_13 = arith.constant dense<0.000000e+00> : vector<16xf32>
    %16 = vector.multi_reduction <add>, %15, %cst_13 [1] : vector<16x128xf32> to vector<16xf32>
    %17 = vector.shape_cast %16 : vector<16xf32> to vector<1x16xf32>
    %18 = vector.broadcast %13 : vector<16x1xf32> to vector<16x16xf32>
    %19 = vector.broadcast %17 : vector<1x16xf32> to vector<16x16xf32>
    %20 = arith.addf %18, %19 : vector<16x16xf32>
    %cst_14 = arith.constant 0.000000e+00 : f32
    %21 = vector.broadcast %cst_14 : f32 to vector<16x16xf32>
    %22 = arith.cmpf ogt, %9, %21 : vector<16x16xf32>
    %cst_15 = arith.constant 0.000000e+00 : f32
    %23 = vector.broadcast %cst_15 : f32 to vector<16x16xf32>
    %24 = arith.cmpf ogt, %20, %23 : vector<16x16xf32>
    %cst_16 = arith.constant 2.000000e-01 : f32
    %25 = vector.broadcast %cst_16 : f32 to vector<16x16xf32>
    %26 = arith.mulf %25, %20 : vector<16x16xf32>
    %27 = arith.select %24, %20, %26 : vector<16x16xi1>, vector<16x16xf32>
    %cst_17 = arith.constant -9.000000e+15 : f32
    %28 = vector.broadcast %cst_17 : f32 to vector<16x16xf32>
    %29 = arith.select %22, %27, %28 : vector<16x16xi1>, vector<16x16xf32>
    %cst_18 = arith.constant dense<0xFF800000> : vector<16xf32>
    %30 = vector.multi_reduction <maximumf>, %29, %cst_18 [1] : vector<16x16xf32> to vector<16xf32>
    %31 = vector.shape_cast %30 : vector<16xf32> to vector<16x1xf32>
    %32 = vector.broadcast %31 : vector<16x1xf32> to vector<16x16xf32>
    %33 = arith.subf %29, %32 : vector<16x16xf32>
    %34 = math.exp %33 : vector<16x16xf32>
    %cst_19 = arith.constant dense<0.000000e+00> : vector<16xf32>
    %35 = vector.multi_reduction <add>, %34, %cst_19 [1] : vector<16x16xf32> to vector<16xf32>
    %36 = vector.shape_cast %35 : vector<16xf32> to vector<16x1xf32>
    %37 = tpu.reciprocal %36 {approx = true} : vector<16x1xf32> -> vector<16x1xf32>
    %38 = vector.broadcast %37 : vector<16x1xf32> to vector<16x16xf32>
    %39 = arith.mulf %34, %38 : vector<16x16xf32>
    %cst_20 = arith.constant dense<0.000000e+00> : vector<16x128xf32>
    %40 = tpu.matmul %39, %2, %cst_20 {dimension_numbers = #tpu.dot_dimension_numbers<[1], [0], [0], [1], [0, 0, 1, 1], [], []>} : vector<16x16xf32>, vector<16x128xf32>, vector<16x128xf32> -> vector<16x128xf32>
    %cst_21 = arith.constant 0.000000e+00 : f32
    %41 = vector.broadcast %cst_21 : f32 to vector<16x128xf32>
    %42 = arith.cmpf ogt, %40, %41 : vector<16x128xf32>
    %cst_22 = arith.constant 0.000000e+00 : f32
    %43 = vector.broadcast %cst_22 : f32 to vector<16x128xf32>
    %44 = arith.minimumf %40, %43 : vector<16x128xf32>
    %45 = math.exp %44 : vector<16x128xf32>
    %cst_23 = arith.constant 1.000000e+00 : f32
    %46 = vector.broadcast %cst_23 : f32 to vector<16x128xf32>
    %47 = arith.subf %45, %46 : vector<16x128xf32>
    %48 = arith.select %42, %40, %47 : vector<16x128xi1>, vector<16x128xf32>
    %49 = vector.extract_strided_slice %6 {offsets = [2, 0], sizes = [1, 128], strides = [1, 1]} : vector<8x128xf32> to vector<1x128xf32>
    %50 = vector.extract_strided_slice %6 {offsets = [3, 0], sizes = [1, 128], strides = [1, 1]} : vector<8x128xf32> to vector<1x128xf32>
    %c0_24 = arith.constant 0 : index
    %c0_25 = arith.constant 0 : index
    %51 = vector.load %arg7[%c0_24, %c0_25] : memref<16x32xf32, #tpu.memory_space<vmem>>, vector<16x32xf32>
    %52 = vector.broadcast %49 : vector<1x128xf32> to vector<16x128xf32>
    %53 = arith.mulf %2, %52 : vector<16x128xf32>
    %cst_26 = arith.constant dense<0.000000e+00> : vector<16xf32>
    %54 = vector.multi_reduction <add>, %53, %cst_26 [1] : vector<16x128xf32> to vector<16xf32>
    %55 = vector.shape_cast %54 : vector<16xf32> to vector<16x1xf32>
    %56 = vector.broadcast %50 : vector<1x128xf32> to vector<32x128xf32>
    %57 = arith.mulf %5, %56 : vector<32x128xf32>
    %cst_27 = arith.constant dense<0.000000e+00> : vector<32xf32>
    %58 = vector.multi_reduction <add>, %57, %cst_27 [1] : vector<32x128xf32> to vector<32xf32>
    %59 = vector.shape_cast %58 : vector<32xf32> to vector<1x32xf32>
    %60 = vector.broadcast %55 : vector<16x1xf32> to vector<16x32xf32>
    %61 = vector.broadcast %59 : vector<1x32xf32> to vector<16x32xf32>
    %62 = arith.addf %60, %61 : vector<16x32xf32>
    %cst_28 = arith.constant 0.000000e+00 : f32
    %63 = vector.broadcast %cst_28 : f32 to vector<16x32xf32>
    %64 = arith.cmpf ogt, %51, %63 : vector<16x32xf32>
    %cst_29 = arith.constant 0.000000e+00 : f32
    %65 = vector.broadcast %cst_29 : f32 to vector<16x32xf32>
    %66 = arith.cmpf ogt, %62, %65 : vector<16x32xf32>
    %cst_30 = arith.constant 2.000000e-01 : f32
    %67 = vector.broadcast %cst_30 : f32 to vector<16x32xf32>
    %68 = arith.mulf %67, %62 : vector<16x32xf32>
    %69 = arith.select %66, %62, %68 : vector<16x32xi1>, vector<16x32xf32>
    %cst_31 = arith.constant -9.000000e+15 : f32
    %70 = vector.broadcast %cst_31 : f32 to vector<16x32xf32>
    %71 = arith.select %64, %69, %70 : vector<16x32xi1>, vector<16x32xf32>
    %cst_32 = arith.constant dense<0xFF800000> : vector<16xf32>
    %72 = vector.multi_reduction <maximumf>, %71, %cst_32 [1] : vector<16x32xf32> to vector<16xf32>
    %73 = vector.shape_cast %72 : vector<16xf32> to vector<16x1xf32>
    %74 = vector.broadcast %73 : vector<16x1xf32> to vector<16x32xf32>
    %75 = arith.subf %71, %74 : vector<16x32xf32>
    %76 = math.exp %75 : vector<16x32xf32>
    %cst_33 = arith.constant dense<0.000000e+00> : vector<16xf32>
    %77 = vector.multi_reduction <add>, %76, %cst_33 [1] : vector<16x32xf32> to vector<16xf32>
    %78 = vector.shape_cast %77 : vector<16xf32> to vector<16x1xf32>
    %79 = tpu.reciprocal %78 {approx = true} : vector<16x1xf32> -> vector<16x1xf32>
    %80 = vector.broadcast %79 : vector<16x1xf32> to vector<16x32xf32>
    %81 = arith.mulf %76, %80 : vector<16x32xf32>
    %cst_34 = arith.constant dense<0.000000e+00> : vector<16x128xf32>
    %82 = tpu.matmul %81, %5, %cst_34 {dimension_numbers = #tpu.dot_dimension_numbers<[1], [0], [0], [1], [0, 0, 1, 1], [], []>} : vector<16x32xf32>, vector<32x128xf32>, vector<16x128xf32> -> vector<16x128xf32>
    %cst_35 = arith.constant 0.000000e+00 : f32
    %83 = vector.broadcast %cst_35 : f32 to vector<16x128xf32>
    %84 = arith.cmpf ogt, %82, %83 : vector<16x128xf32>
    %cst_36 = arith.constant 0.000000e+00 : f32
    %85 = vector.broadcast %cst_36 : f32 to vector<16x128xf32>
    %86 = arith.minimumf %82, %85 : vector<16x128xf32>
    %87 = math.exp %86 : vector<16x128xf32>
    %cst_37 = arith.constant 1.000000e+00 : f32
    %88 = vector.broadcast %cst_37 : f32 to vector<16x128xf32>
    %89 = arith.subf %87, %88 : vector<16x128xf32>
    %90 = arith.select %84, %82, %89 : vector<16x128xi1>, vector<16x128xf32>
    %91 = vector.extract_strided_slice %6 {offsets = [4, 0], sizes = [1, 128], strides = [1, 1]} : vector<8x128xf32> to vector<1x128xf32>
    %92 = vector.extract_strided_slice %6 {offsets = [5, 0], sizes = [1, 128], strides = [1, 1]} : vector<8x128xf32> to vector<1x128xf32>
    %c0_38 = arith.constant 0 : index
    %c0_39 = arith.constant 0 : index
    %93 = vector.load %arg6[%c0_38, %c0_39] : memref<32x32xf32, #tpu.memory_space<vmem>>, vector<32x32xf32>
    %94 = vector.broadcast %91 : vector<1x128xf32> to vector<32x128xf32>
    %95 = arith.mulf %5, %94 : vector<32x128xf32>
    %cst_40 = arith.constant dense<0.000000e+00> : vector<32xf32>
    %96 = vector.multi_reduction <add>, %95, %cst_40 [1] : vector<32x128xf32> to vector<32xf32>
    %97 = vector.shape_cast %96 : vector<32xf32> to vector<32x1xf32>
    %98 = vector.broadcast %92 : vector<1x128xf32> to vector<32x128xf32>
    %99 = arith.mulf %5, %98 : vector<32x128xf32>
    %cst_41 = arith.constant dense<0.000000e+00> : vector<32xf32>
    %100 = vector.multi_reduction <add>, %99, %cst_41 [1] : vector<32x128xf32> to vector<32xf32>
    %101 = vector.shape_cast %100 : vector<32xf32> to vector<1x32xf32>
    %102 = vector.broadcast %97 : vector<32x1xf32> to vector<32x32xf32>
    %103 = vector.broadcast %101 : vector<1x32xf32> to vector<32x32xf32>
    %104 = arith.addf %102, %103 : vector<32x32xf32>
    %cst_42 = arith.constant 0.000000e+00 : f32
    %105 = vector.broadcast %cst_42 : f32 to vector<32x32xf32>
    %106 = arith.cmpf ogt, %93, %105 : vector<32x32xf32>
    %cst_43 = arith.constant 0.000000e+00 : f32
    %107 = vector.broadcast %cst_43 : f32 to vector<32x32xf32>
    %108 = arith.cmpf ogt, %104, %107 : vector<32x32xf32>
    %cst_44 = arith.constant 2.000000e-01 : f32
    %109 = vector.broadcast %cst_44 : f32 to vector<32x32xf32>
    %110 = arith.mulf %109, %104 : vector<32x32xf32>
    %111 = arith.select %108, %104, %110 : vector<32x32xi1>, vector<32x32xf32>
    %cst_45 = arith.constant -9.000000e+15 : f32
    %112 = vector.broadcast %cst_45 : f32 to vector<32x32xf32>
    %113 = arith.select %106, %111, %112 : vector<32x32xi1>, vector<32x32xf32>
    %cst_46 = arith.constant dense<0xFF800000> : vector<32xf32>
    %114 = vector.multi_reduction <maximumf>, %113, %cst_46 [1] : vector<32x32xf32> to vector<32xf32>
    %115 = vector.shape_cast %114 : vector<32xf32> to vector<32x1xf32>
    %116 = vector.broadcast %115 : vector<32x1xf32> to vector<32x32xf32>
    %117 = arith.subf %113, %116 : vector<32x32xf32>
    %118 = math.exp %117 : vector<32x32xf32>
    %cst_47 = arith.constant dense<0.000000e+00> : vector<32xf32>
    %119 = vector.multi_reduction <add>, %118, %cst_47 [1] : vector<32x32xf32> to vector<32xf32>
    %120 = vector.shape_cast %119 : vector<32xf32> to vector<32x1xf32>
    %121 = tpu.reciprocal %120 {approx = true} : vector<32x1xf32> -> vector<32x1xf32>
    %122 = vector.broadcast %121 : vector<32x1xf32> to vector<32x32xf32>
    %123 = arith.mulf %118, %122 : vector<32x32xf32>
    %cst_48 = arith.constant dense<0.000000e+00> : vector<32x128xf32>
    %124 = tpu.matmul %123, %5, %cst_48 {dimension_numbers = #tpu.dot_dimension_numbers<[1], [0], [0], [1], [0, 0, 1, 1], [], []>} : vector<32x32xf32>, vector<32x128xf32>, vector<32x128xf32> -> vector<32x128xf32>
    %cst_49 = arith.constant 0.000000e+00 : f32
    %125 = vector.broadcast %cst_49 : f32 to vector<32x128xf32>
    %126 = arith.cmpf ogt, %124, %125 : vector<32x128xf32>
    %cst_50 = arith.constant 0.000000e+00 : f32
    %127 = vector.broadcast %cst_50 : f32 to vector<32x128xf32>
    %128 = arith.minimumf %124, %127 : vector<32x128xf32>
    %129 = math.exp %128 : vector<32x128xf32>
    %cst_51 = arith.constant 1.000000e+00 : f32
    %130 = vector.broadcast %cst_51 : f32 to vector<32x128xf32>
    %131 = arith.subf %129, %130 : vector<32x128xf32>
    %132 = arith.select %126, %124, %131 : vector<32x128xi1>, vector<32x128xf32>
    %133 = vector.extract_strided_slice %6 {offsets = [6, 0], sizes = [1, 128], strides = [1, 1]} : vector<8x128xf32> to vector<1x128xf32>
    %134 = vector.extract_strided_slice %6 {offsets = [7, 0], sizes = [1, 128], strides = [1, 1]} : vector<8x128xf32> to vector<1x128xf32>
    %c0_52 = arith.constant 0 : index
    %c0_53 = arith.constant 0 : index
    %135 = vector.load %arg8[%c0_52, %c0_53] : memref<32x16xf32, #tpu.memory_space<vmem>>, vector<32x16xf32>
    %136 = vector.broadcast %133 : vector<1x128xf32> to vector<32x128xf32>
    %137 = arith.mulf %5, %136 : vector<32x128xf32>
    %cst_54 = arith.constant dense<0.000000e+00> : vector<32xf32>
    %138 = vector.multi_reduction <add>, %137, %cst_54 [1] : vector<32x128xf32> to vector<32xf32>
    %139 = vector.shape_cast %138 : vector<32xf32> to vector<32x1xf32>
    %140 = vector.broadcast %134 : vector<1x128xf32> to vector<16x128xf32>
    %141 = arith.mulf %2, %140 : vector<16x128xf32>
    %cst_55 = arith.constant dense<0.000000e+00> : vector<16xf32>
    %142 = vector.multi_reduction <add>, %141, %cst_55 [1] : vector<16x128xf32> to vector<16xf32>
    %143 = vector.shape_cast %142 : vector<16xf32> to vector<1x16xf32>
    %144 = vector.broadcast %139 : vector<32x1xf32> to vector<32x16xf32>
    %145 = vector.broadcast %143 : vector<1x16xf32> to vector<32x16xf32>
    %146 = arith.addf %144, %145 : vector<32x16xf32>
    %cst_56 = arith.constant 0.000000e+00 : f32
    %147 = vector.broadcast %cst_56 : f32 to vector<32x16xf32>
    %148 = arith.cmpf ogt, %135, %147 : vector<32x16xf32>
    %cst_57 = arith.constant 0.000000e+00 : f32
    %149 = vector.broadcast %cst_57 : f32 to vector<32x16xf32>
    %150 = arith.cmpf ogt, %146, %149 : vector<32x16xf32>
    %cst_58 = arith.constant 2.000000e-01 : f32
    %151 = vector.broadcast %cst_58 : f32 to vector<32x16xf32>
    %152 = arith.mulf %151, %146 : vector<32x16xf32>
    %153 = arith.select %150, %146, %152 : vector<32x16xi1>, vector<32x16xf32>
    %cst_59 = arith.constant -9.000000e+15 : f32
    %154 = vector.broadcast %cst_59 : f32 to vector<32x16xf32>
    %155 = arith.select %148, %153, %154 : vector<32x16xi1>, vector<32x16xf32>
    %cst_60 = arith.constant dense<0xFF800000> : vector<32xf32>
    %156 = vector.multi_reduction <maximumf>, %155, %cst_60 [1] : vector<32x16xf32> to vector<32xf32>
    %157 = vector.shape_cast %156 : vector<32xf32> to vector<32x1xf32>
    %158 = vector.broadcast %157 : vector<32x1xf32> to vector<32x16xf32>
    %159 = arith.subf %155, %158 : vector<32x16xf32>
    %160 = math.exp %159 : vector<32x16xf32>
    %cst_61 = arith.constant dense<0.000000e+00> : vector<32xf32>
    %161 = vector.multi_reduction <add>, %160, %cst_61 [1] : vector<32x16xf32> to vector<32xf32>
    %162 = vector.shape_cast %161 : vector<32xf32> to vector<32x1xf32>
    %163 = tpu.reciprocal %162 {approx = true} : vector<32x1xf32> -> vector<32x1xf32>
    %164 = vector.broadcast %163 : vector<32x1xf32> to vector<32x16xf32>
    %165 = arith.mulf %160, %164 : vector<32x16xf32>
    %cst_62 = arith.constant dense<0.000000e+00> : vector<32x128xf32>
    %166 = tpu.matmul %165, %2, %cst_62 {dimension_numbers = #tpu.dot_dimension_numbers<[1], [0], [0], [1], [0, 0, 1, 1], [], []>} : vector<32x16xf32>, vector<16x128xf32>, vector<32x128xf32> -> vector<32x128xf32>
    %cst_63 = arith.constant 0.000000e+00 : f32
    %167 = vector.broadcast %cst_63 : f32 to vector<32x128xf32>
    %168 = arith.cmpf ogt, %166, %167 : vector<32x128xf32>
    %cst_64 = arith.constant 0.000000e+00 : f32
    %169 = vector.broadcast %cst_64 : f32 to vector<32x128xf32>
    %170 = arith.minimumf %166, %169 : vector<32x128xf32>
    %171 = math.exp %170 : vector<32x128xf32>
    %cst_65 = arith.constant 1.000000e+00 : f32
    %172 = vector.broadcast %cst_65 : f32 to vector<32x128xf32>
    %173 = arith.subf %171, %172 : vector<32x128xf32>
    %174 = arith.select %168, %166, %173 : vector<32x128xi1>, vector<32x128xf32>
    %c0_66 = arith.constant 0 : index
    %c0_67 = arith.constant 0 : index
    %175 = vector.load %arg9[%c0_66, %c0_67] : memref<16x256xf32, #tpu.memory_space<vmem>>, vector<16x128xf32>
    tpu.vector_store %arg9[%c0_66, %c0_67], %48 {strides = array<i32>} : memref<16x256xf32, #tpu.memory_space<vmem>>, vector<16x128xf32>,
    %c0_68 = arith.constant 0 : index
    %c128 = arith.constant 128 : index
    %176 = vector.load %arg9[%c0_68, %c128] : memref<16x256xf32, #tpu.memory_space<vmem>>, vector<16x128xf32>
    tpu.vector_store %arg9[%c0_68, %c128], %90 {strides = array<i32>} : memref<16x256xf32, #tpu.memory_space<vmem>>, vector<16x128xf32>,
    %c0_69 = arith.constant 0 : index
    %c0_70 = arith.constant 0 : index
    %177 = vector.load %arg10[%c0_69, %c0_70] : memref<32x256xf32, #tpu.memory_space<vmem>>, vector<32x128xf32>
    tpu.vector_store %arg10[%c0_69, %c0_70], %132 {strides = array<i32>} : memref<32x256xf32, #tpu.memory_space<vmem>>, vector<32x128xf32>,
    %c0_71 = arith.constant 0 : index
    %c128_72 = arith.constant 128 : index
    %178 = vector.load %arg10[%c0_71, %c128_72] : memref<32x256xf32, #tpu.memory_space<vmem>>, vector<32x128xf32>
    tpu.vector_store %arg10[%c0_71, %c128_72], %174 {strides = array<i32>} : memref<32x256xf32, #tpu.memory_space<vmem>>, vector<32x128xf32>,
    return
  }
}

module attributes {stable_mosaic.version = 11 : i64} {
  func.func @_gat_layer_kernel(%arg0: memref<16x64xf32, #tpu.memory_space<vmem>>, %arg1: memref<32x64xf32, #tpu.memory_space<vmem>>, %arg2: memref<64x64xf32, #tpu.memory_space<vmem>>, %arg3: memref<64x64xf32, #tpu.memory_space<vmem>>, %arg4: memref<8x64xf32, #tpu.memory_space<vmem>>, %arg5: memref<16x16xf32, #tpu.memory_space<vmem>>, %arg6: memref<32x32xf32, #tpu.memory_space<vmem>>, %arg7: memref<16x32xf32, #tpu.memory_space<vmem>>, %arg8: memref<32x16xf32, #tpu.memory_space<vmem>>, %arg9: memref<16x128xf32, #tpu.memory_space<vmem>>, %arg10: memref<32x128xf32, #tpu.memory_space<vmem>>) attributes {dimension_semantics = [], scalar_prefetch = 0 : i64, scratch_operands = 0 : i64, tpu.core_type = #tpu.core_type<tc>} {
    %c0 = arith.constant 0 : index
    %c0_0 = arith.constant 0 : index
    %0 = vector.load %arg0[%c0, %c0_0] : memref<16x64xf32, #tpu.memory_space<vmem>>, vector<16x64xf32>
    %c0_1 = arith.constant 0 : index
    %c0_2 = arith.constant 0 : index
    %1 = vector.load %arg2[%c0_1, %c0_2] : memref<64x64xf32, #tpu.memory_space<vmem>>, vector<64x64xf32>
    %cst = arith.constant dense<0.000000e+00> : vector<16x64xf32>
    %2 = tpu.matmul %0, %1, %cst {dimension_numbers = #tpu.dot_dimension_numbers<[1], [0], [0], [1], [0, 0, 1, 1], [], []>} : vector<16x64xf32>, vector<64x64xf32>, vector<16x64xf32> -> vector<16x64xf32>
    %c0_3 = arith.constant 0 : index
    %c0_4 = arith.constant 0 : index
    %3 = vector.load %arg1[%c0_3, %c0_4] : memref<32x64xf32, #tpu.memory_space<vmem>>, vector<32x64xf32>
    %c0_5 = arith.constant 0 : index
    %c0_6 = arith.constant 0 : index
    %4 = vector.load %arg3[%c0_5, %c0_6] : memref<64x64xf32, #tpu.memory_space<vmem>>, vector<64x64xf32>
    %cst_7 = arith.constant dense<0.000000e+00> : vector<32x64xf32>
    %5 = tpu.matmul %3, %4, %cst_7 {dimension_numbers = #tpu.dot_dimension_numbers<[1], [0], [0], [1], [0, 0, 1, 1], [], []>} : vector<32x64xf32>, vector<64x64xf32>, vector<32x64xf32> -> vector<32x64xf32>
    %c0_8 = arith.constant 0 : index
    %c0_9 = arith.constant 0 : index
    %6 = vector.load %arg4[%c0_8, %c0_9] : memref<8x64xf32, #tpu.memory_space<vmem>>, vector<8x64xf32>
    %7 = vector.extract_strided_slice %6 {offsets = [0, 0], sizes = [1, 64], strides = [1, 1]} : vector<8x64xf32> to vector<1x64xf32>
    %8 = vector.extract_strided_slice %6 {offsets = [1, 0], sizes = [1, 64], strides = [1, 1]} : vector<8x64xf32> to vector<1x64xf32>
    %c0_10 = arith.constant 0 : index
    %c0_11 = arith.constant 0 : index
    %9 = vector.load %arg5[%c0_10, %c0_11] : memref<16x16xf32, #tpu.memory_space<vmem>>, vector<16x16xf32>
    %10 = vector.broadcast %7 : vector<1x64xf32> to vector<16x64xf32>
    %11 = arith.mulf %2, %10 : vector<16x64xf32>
    %cst_12 = arith.constant dense<0.000000e+00> : vector<16xf32>
    %12 = vector.multi_reduction <add>, %11, %cst_12 [1] : vector<16x64xf32> to vector<16xf32>
    %13 = vector.shape_cast %12 : vector<16xf32> to vector<16x1xf32>
    %14 = vector.broadcast %8 : vector<1x64xf32> to vector<16x64xf32>
    %15 = arith.mulf %2, %14 : vector<16x64xf32>
    %cst_13 = arith.constant dense<0.000000e+00> : vector<16xf32>
    %16 = vector.multi_reduction <add>, %15, %cst_13 [1] : vector<16x64xf32> to vector<16xf32>
    %17 = vector.shape_cast %16 : vector<16xf32> to vector<1x16xf32>
    %18 = vector.broadcast %13 : vector<16x1xf32> to vector<16x16xf32>
    %19 = vector.broadcast %17 : vector<1x16xf32> to vector<16x16xf32>
    %20 = arith.addf %18, %19 : vector<16x16xf32>
    %cst_14 = arith.constant 0.000000e+00 : f32
    %21 = vector.broadcast %cst_14 : f32 to vector<16x16xf32>
    %22 = arith.cmpf ogt, %9, %21 : vector<16x16xf32>
    %cst_15 = arith.constant 0.000000e+00 : f32
    %23 = vector.broadcast %cst_15 : f32 to vector<16x16xf32>
    %24 = arith.cmpf ogt, %20, %23 : vector<16x16xf32>
    %cst_16 = arith.constant 2.000000e-01 : f32
    %25 = vector.broadcast %cst_16 : f32 to vector<16x16xf32>
    %26 = arith.mulf %25, %20 : vector<16x16xf32>
    %27 = arith.select %24, %20, %26 : vector<16x16xi1>, vector<16x16xf32>
    %cst_17 = arith.constant -9.000000e+15 : f32
    %28 = vector.broadcast %cst_17 : f32 to vector<16x16xf32>
    %29 = arith.select %22, %27, %28 : vector<16x16xi1>, vector<16x16xf32>
    %cst_18 = arith.constant dense<0xFF800000> : vector<16xf32>
    %30 = vector.multi_reduction <maximumf>, %29, %cst_18 [1] : vector<16x16xf32> to vector<16xf32>
    %31 = vector.shape_cast %30 : vector<16xf32> to vector<16x1xf32>
    %32 = vector.broadcast %31 : vector<16x1xf32> to vector<16x16xf32>
    %33 = arith.subf %29, %32 : vector<16x16xf32>
    %34 = math.exp %33 : vector<16x16xf32>
    %cst_19 = arith.constant dense<0.000000e+00> : vector<16xf32>
    %35 = vector.multi_reduction <add>, %34, %cst_19 [1] : vector<16x16xf32> to vector<16xf32>
    %36 = vector.shape_cast %35 : vector<16xf32> to vector<16x1xf32>
    %37 = tpu.reciprocal %36 {approx = true} : vector<16x1xf32> -> vector<16x1xf32>
    %38 = vector.broadcast %37 : vector<16x1xf32> to vector<16x16xf32>
    %39 = arith.mulf %34, %38 : vector<16x16xf32>
    %cst_20 = arith.constant dense<0.000000e+00> : vector<16x64xf32>
    %40 = tpu.matmul %39, %2, %cst_20 {dimension_numbers = #tpu.dot_dimension_numbers<[1], [0], [0], [1], [0, 0, 1, 1], [], []>} : vector<16x16xf32>, vector<16x64xf32>, vector<16x64xf32> -> vector<16x64xf32>
    %cst_21 = arith.constant 0.000000e+00 : f32
    %41 = vector.broadcast %cst_21 : f32 to vector<16x64xf32>
    %42 = arith.cmpf ogt, %40, %41 : vector<16x64xf32>
    %cst_22 = arith.constant 0.000000e+00 : f32
    %43 = vector.broadcast %cst_22 : f32 to vector<16x64xf32>
    %44 = arith.minimumf %40, %43 : vector<16x64xf32>
    %45 = math.exp %44 : vector<16x64xf32>
    %cst_23 = arith.constant 1.000000e+00 : f32
    %46 = vector.broadcast %cst_23 : f32 to vector<16x64xf32>
    %47 = arith.subf %45, %46 : vector<16x64xf32>
    %48 = arith.select %42, %40, %47 : vector<16x64xi1>, vector<16x64xf32>
    %49 = vector.extract_strided_slice %6 {offsets = [2, 0], sizes = [1, 64], strides = [1, 1]} : vector<8x64xf32> to vector<1x64xf32>
    %50 = vector.extract_strided_slice %6 {offsets = [3, 0], sizes = [1, 64], strides = [1, 1]} : vector<8x64xf32> to vector<1x64xf32>
    %c0_24 = arith.constant 0 : index
    %c0_25 = arith.constant 0 : index
    %51 = vector.load %arg7[%c0_24, %c0_25] : memref<16x32xf32, #tpu.memory_space<vmem>>, vector<16x32xf32>
    %52 = vector.broadcast %49 : vector<1x64xf32> to vector<16x64xf32>
    %53 = arith.mulf %2, %52 : vector<16x64xf32>
    %cst_26 = arith.constant dense<0.000000e+00> : vector<16xf32>
    %54 = vector.multi_reduction <add>, %53, %cst_26 [1] : vector<16x64xf32> to vector<16xf32>
    %55 = vector.shape_cast %54 : vector<16xf32> to vector<16x1xf32>
    %56 = vector.broadcast %50 : vector<1x64xf32> to vector<32x64xf32>
    %57 = arith.mulf %5, %56 : vector<32x64xf32>
    %cst_27 = arith.constant dense<0.000000e+00> : vector<32xf32>
    %58 = vector.multi_reduction <add>, %57, %cst_27 [1] : vector<32x64xf32> to vector<32xf32>
    %59 = vector.shape_cast %58 : vector<32xf32> to vector<1x32xf32>
    %60 = vector.broadcast %55 : vector<16x1xf32> to vector<16x32xf32>
    %61 = vector.broadcast %59 : vector<1x32xf32> to vector<16x32xf32>
    %62 = arith.addf %60, %61 : vector<16x32xf32>
    %cst_28 = arith.constant 0.000000e+00 : f32
    %63 = vector.broadcast %cst_28 : f32 to vector<16x32xf32>
    %64 = arith.cmpf ogt, %51, %63 : vector<16x32xf32>
    %cst_29 = arith.constant 0.000000e+00 : f32
    %65 = vector.broadcast %cst_29 : f32 to vector<16x32xf32>
    %66 = arith.cmpf ogt, %62, %65 : vector<16x32xf32>
    %cst_30 = arith.constant 2.000000e-01 : f32
    %67 = vector.broadcast %cst_30 : f32 to vector<16x32xf32>
    %68 = arith.mulf %67, %62 : vector<16x32xf32>
    %69 = arith.select %66, %62, %68 : vector<16x32xi1>, vector<16x32xf32>
    %cst_31 = arith.constant -9.000000e+15 : f32
    %70 = vector.broadcast %cst_31 : f32 to vector<16x32xf32>
    %71 = arith.select %64, %69, %70 : vector<16x32xi1>, vector<16x32xf32>
    %cst_32 = arith.constant dense<0xFF800000> : vector<16xf32>
    %72 = vector.multi_reduction <maximumf>, %71, %cst_32 [1] : vector<16x32xf32> to vector<16xf32>
    %73 = vector.shape_cast %72 : vector<16xf32> to vector<16x1xf32>
    %74 = vector.broadcast %73 : vector<16x1xf32> to vector<16x32xf32>
    %75 = arith.subf %71, %74 : vector<16x32xf32>
    %76 = math.exp %75 : vector<16x32xf32>
    %cst_33 = arith.constant dense<0.000000e+00> : vector<16xf32>
    %77 = vector.multi_reduction <add>, %76, %cst_33 [1] : vector<16x32xf32> to vector<16xf32>
    %78 = vector.shape_cast %77 : vector<16xf32> to vector<16x1xf32>
    %79 = tpu.reciprocal %78 {approx = true} : vector<16x1xf32> -> vector<16x1xf32>
    %80 = vector.broadcast %79 : vector<16x1xf32> to vector<16x32xf32>
    %81 = arith.mulf %76, %80 : vector<16x32xf32>
    %cst_34 = arith.constant dense<0.000000e+00> : vector<16x64xf32>
    %82 = tpu.matmul %81, %5, %cst_34 {dimension_numbers = #tpu.dot_dimension_numbers<[1], [0], [0], [1], [0, 0, 1, 1], [], []>} : vector<16x32xf32>, vector<32x64xf32>, vector<16x64xf32> -> vector<16x64xf32>
    %cst_35 = arith.constant 0.000000e+00 : f32
    %83 = vector.broadcast %cst_35 : f32 to vector<16x64xf32>
    %84 = arith.cmpf ogt, %82, %83 : vector<16x64xf32>
    %cst_36 = arith.constant 0.000000e+00 : f32
    %85 = vector.broadcast %cst_36 : f32 to vector<16x64xf32>
    %86 = arith.minimumf %82, %85 : vector<16x64xf32>
    %87 = math.exp %86 : vector<16x64xf32>
    %cst_37 = arith.constant 1.000000e+00 : f32
    %88 = vector.broadcast %cst_37 : f32 to vector<16x64xf32>
    %89 = arith.subf %87, %88 : vector<16x64xf32>
    %90 = arith.select %84, %82, %89 : vector<16x64xi1>, vector<16x64xf32>
    %91 = vector.extract_strided_slice %6 {offsets = [4, 0], sizes = [1, 64], strides = [1, 1]} : vector<8x64xf32> to vector<1x64xf32>
    %92 = vector.extract_strided_slice %6 {offsets = [5, 0], sizes = [1, 64], strides = [1, 1]} : vector<8x64xf32> to vector<1x64xf32>
    %c0_38 = arith.constant 0 : index
    %c0_39 = arith.constant 0 : index
    %93 = vector.load %arg6[%c0_38, %c0_39] : memref<32x32xf32, #tpu.memory_space<vmem>>, vector<32x32xf32>
    %94 = vector.broadcast %91 : vector<1x64xf32> to vector<32x64xf32>
    %95 = arith.mulf %5, %94 : vector<32x64xf32>
    %cst_40 = arith.constant dense<0.000000e+00> : vector<32xf32>
    %96 = vector.multi_reduction <add>, %95, %cst_40 [1] : vector<32x64xf32> to vector<32xf32>
    %97 = vector.shape_cast %96 : vector<32xf32> to vector<32x1xf32>
    %98 = vector.broadcast %92 : vector<1x64xf32> to vector<32x64xf32>
    %99 = arith.mulf %5, %98 : vector<32x64xf32>
    %cst_41 = arith.constant dense<0.000000e+00> : vector<32xf32>
    %100 = vector.multi_reduction <add>, %99, %cst_41 [1] : vector<32x64xf32> to vector<32xf32>
    %101 = vector.shape_cast %100 : vector<32xf32> to vector<1x32xf32>
    %102 = vector.broadcast %97 : vector<32x1xf32> to vector<32x32xf32>
    %103 = vector.broadcast %101 : vector<1x32xf32> to vector<32x32xf32>
    %104 = arith.addf %102, %103 : vector<32x32xf32>
    %cst_42 = arith.constant 0.000000e+00 : f32
    %105 = vector.broadcast %cst_42 : f32 to vector<32x32xf32>
    %106 = arith.cmpf ogt, %93, %105 : vector<32x32xf32>
    %cst_43 = arith.constant 0.000000e+00 : f32
    %107 = vector.broadcast %cst_43 : f32 to vector<32x32xf32>
    %108 = arith.cmpf ogt, %104, %107 : vector<32x32xf32>
    %cst_44 = arith.constant 2.000000e-01 : f32
    %109 = vector.broadcast %cst_44 : f32 to vector<32x32xf32>
    %110 = arith.mulf %109, %104 : vector<32x32xf32>
    %111 = arith.select %108, %104, %110 : vector<32x32xi1>, vector<32x32xf32>
    %cst_45 = arith.constant -9.000000e+15 : f32
    %112 = vector.broadcast %cst_45 : f32 to vector<32x32xf32>
    %113 = arith.select %106, %111, %112 : vector<32x32xi1>, vector<32x32xf32>
    %cst_46 = arith.constant dense<0xFF800000> : vector<32xf32>
    %114 = vector.multi_reduction <maximumf>, %113, %cst_46 [1] : vector<32x32xf32> to vector<32xf32>
    %115 = vector.shape_cast %114 : vector<32xf32> to vector<32x1xf32>
    %116 = vector.broadcast %115 : vector<32x1xf32> to vector<32x32xf32>
    %117 = arith.subf %113, %116 : vector<32x32xf32>
    %118 = math.exp %117 : vector<32x32xf32>
    %cst_47 = arith.constant dense<0.000000e+00> : vector<32xf32>
    %119 = vector.multi_reduction <add>, %118, %cst_47 [1] : vector<32x32xf32> to vector<32xf32>
    %120 = vector.shape_cast %119 : vector<32xf32> to vector<32x1xf32>
    %121 = tpu.reciprocal %120 {approx = true} : vector<32x1xf32> -> vector<32x1xf32>
    %122 = vector.broadcast %121 : vector<32x1xf32> to vector<32x32xf32>
    %123 = arith.mulf %118, %122 : vector<32x32xf32>
    %cst_48 = arith.constant dense<0.000000e+00> : vector<32x64xf32>
    %124 = tpu.matmul %123, %5, %cst_48 {dimension_numbers = #tpu.dot_dimension_numbers<[1], [0], [0], [1], [0, 0, 1, 1], [], []>} : vector<32x32xf32>, vector<32x64xf32>, vector<32x64xf32> -> vector<32x64xf32>
    %cst_49 = arith.constant 0.000000e+00 : f32
    %125 = vector.broadcast %cst_49 : f32 to vector<32x64xf32>
    %126 = arith.cmpf ogt, %124, %125 : vector<32x64xf32>
    %cst_50 = arith.constant 0.000000e+00 : f32
    %127 = vector.broadcast %cst_50 : f32 to vector<32x64xf32>
    %128 = arith.minimumf %124, %127 : vector<32x64xf32>
    %129 = math.exp %128 : vector<32x64xf32>
    %cst_51 = arith.constant 1.000000e+00 : f32
    %130 = vector.broadcast %cst_51 : f32 to vector<32x64xf32>
    %131 = arith.subf %129, %130 : vector<32x64xf32>
    %132 = arith.select %126, %124, %131 : vector<32x64xi1>, vector<32x64xf32>
    %133 = vector.extract_strided_slice %6 {offsets = [6, 0], sizes = [1, 64], strides = [1, 1]} : vector<8x64xf32> to vector<1x64xf32>
    %134 = vector.extract_strided_slice %6 {offsets = [7, 0], sizes = [1, 64], strides = [1, 1]} : vector<8x64xf32> to vector<1x64xf32>
    %c0_52 = arith.constant 0 : index
    %c0_53 = arith.constant 0 : index
    %135 = vector.load %arg8[%c0_52, %c0_53] : memref<32x16xf32, #tpu.memory_space<vmem>>, vector<32x16xf32>
    %136 = vector.broadcast %133 : vector<1x64xf32> to vector<32x64xf32>
    %137 = arith.mulf %5, %136 : vector<32x64xf32>
    %cst_54 = arith.constant dense<0.000000e+00> : vector<32xf32>
    %138 = vector.multi_reduction <add>, %137, %cst_54 [1] : vector<32x64xf32> to vector<32xf32>
    %139 = vector.shape_cast %138 : vector<32xf32> to vector<32x1xf32>
    %140 = vector.broadcast %134 : vector<1x64xf32> to vector<16x64xf32>
    %141 = arith.mulf %2, %140 : vector<16x64xf32>
    %cst_55 = arith.constant dense<0.000000e+00> : vector<16xf32>
    %142 = vector.multi_reduction <add>, %141, %cst_55 [1] : vector<16x64xf32> to vector<16xf32>
    %143 = vector.shape_cast %142 : vector<16xf32> to vector<1x16xf32>
    %144 = vector.broadcast %139 : vector<32x1xf32> to vector<32x16xf32>
    %145 = vector.broadcast %143 : vector<1x16xf32> to vector<32x16xf32>
    %146 = arith.addf %144, %145 : vector<32x16xf32>
    %cst_56 = arith.constant 0.000000e+00 : f32
    %147 = vector.broadcast %cst_56 : f32 to vector<32x16xf32>
    %148 = arith.cmpf ogt, %135, %147 : vector<32x16xf32>
    %cst_57 = arith.constant 0.000000e+00 : f32
    %149 = vector.broadcast %cst_57 : f32 to vector<32x16xf32>
    %150 = arith.cmpf ogt, %146, %149 : vector<32x16xf32>
    %cst_58 = arith.constant 2.000000e-01 : f32
    %151 = vector.broadcast %cst_58 : f32 to vector<32x16xf32>
    %152 = arith.mulf %151, %146 : vector<32x16xf32>
    %153 = arith.select %150, %146, %152 : vector<32x16xi1>, vector<32x16xf32>
    %cst_59 = arith.constant -9.000000e+15 : f32
    %154 = vector.broadcast %cst_59 : f32 to vector<32x16xf32>
    %155 = arith.select %148, %153, %154 : vector<32x16xi1>, vector<32x16xf32>
    %cst_60 = arith.constant dense<0xFF800000> : vector<32xf32>
    %156 = vector.multi_reduction <maximumf>, %155, %cst_60 [1] : vector<32x16xf32> to vector<32xf32>
    %157 = vector.shape_cast %156 : vector<32xf32> to vector<32x1xf32>
    %158 = vector.broadcast %157 : vector<32x1xf32> to vector<32x16xf32>
    %159 = arith.subf %155, %158 : vector<32x16xf32>
    %160 = math.exp %159 : vector<32x16xf32>
    %cst_61 = arith.constant dense<0.000000e+00> : vector<32xf32>
    %161 = vector.multi_reduction <add>, %160, %cst_61 [1] : vector<32x16xf32> to vector<32xf32>
    %162 = vector.shape_cast %161 : vector<32xf32> to vector<32x1xf32>
    %163 = tpu.reciprocal %162 {approx = true} : vector<32x1xf32> -> vector<32x1xf32>
    %164 = vector.broadcast %163 : vector<32x1xf32> to vector<32x16xf32>
    %165 = arith.mulf %160, %164 : vector<32x16xf32>
    %cst_62 = arith.constant dense<0.000000e+00> : vector<32x64xf32>
    %166 = tpu.matmul %165, %2, %cst_62 {dimension_numbers = #tpu.dot_dimension_numbers<[1], [0], [0], [1], [0, 0, 1, 1], [], []>} : vector<32x16xf32>, vector<16x64xf32>, vector<32x64xf32> -> vector<32x64xf32>
    %cst_63 = arith.constant 0.000000e+00 : f32
    %167 = vector.broadcast %cst_63 : f32 to vector<32x64xf32>
    %168 = arith.cmpf ogt, %166, %167 : vector<32x64xf32>
    %cst_64 = arith.constant 0.000000e+00 : f32
    %169 = vector.broadcast %cst_64 : f32 to vector<32x64xf32>
    %170 = arith.minimumf %166, %169 : vector<32x64xf32>
    %171 = math.exp %170 : vector<32x64xf32>
    %cst_65 = arith.constant 1.000000e+00 : f32
    %172 = vector.broadcast %cst_65 : f32 to vector<32x64xf32>
    %173 = arith.subf %171, %172 : vector<32x64xf32>
    %174 = arith.select %168, %166, %173 : vector<32x64xi1>, vector<32x64xf32>
    %c0_66 = arith.constant 0 : index
    %c0_67 = arith.constant 0 : index
    %175 = vector.load %arg9[%c0_66, %c0_67] : memref<16x128xf32, #tpu.memory_space<vmem>>, vector<16x64xf32>
    tpu.vector_store %arg9[%c0_66, %c0_67], %48 {strides = array<i32>} : memref<16x128xf32, #tpu.memory_space<vmem>>, vector<16x64xf32>,
    %c0_68 = arith.constant 0 : index
    %c64 = arith.constant 64 : index
    %176 = vector.load %arg9[%c0_68, %c64] : memref<16x128xf32, #tpu.memory_space<vmem>>, vector<16x64xf32>
    tpu.vector_store %arg9[%c0_68, %c64], %90 {strides = array<i32>} : memref<16x128xf32, #tpu.memory_space<vmem>>, vector<16x64xf32>,
    %c0_69 = arith.constant 0 : index
    %c0_70 = arith.constant 0 : index
    %177 = vector.load %arg10[%c0_69, %c0_70] : memref<32x128xf32, #tpu.memory_space<vmem>>, vector<32x64xf32>
    tpu.vector_store %arg10[%c0_69, %c0_70], %132 {strides = array<i32>} : memref<32x128xf32, #tpu.memory_space<vmem>>, vector<32x64xf32>,
    %c0_71 = arith.constant 0 : index
    %c64_72 = arith.constant 64 : index
    %178 = vector.load %arg10[%c0_71, %c64_72] : memref<32x128xf32, #tpu.memory_space<vmem>>, vector<32x64xf32>
    tpu.vector_store %arg10[%c0_71, %c64_72], %174 {strides = array<i32>} : memref<32x128xf32, #tpu.memory_space<vmem>>, vector<32x64xf32>,
    return
  }
}

module attributes {stable_mosaic.version = 11 : i64} {
  func.func @_readout_kernel(%arg0: memref<16x256xf32, #tpu.memory_space<vmem>>, %arg1: memref<32x256xf32, #tpu.memory_space<vmem>>, %arg2: memref<16x16xf32, #tpu.memory_space<vmem>>, %arg3: memref<32x32xf32, #tpu.memory_space<vmem>>, %arg4: memref<256x64xf32, #tpu.memory_space<vmem>>, %arg5: memref<1x64xf32, #tpu.memory_space<vmem>>, %arg6: memref<1x64xf32, #tpu.memory_space<vmem>>, %arg7: memref<64x64xf32, #tpu.memory_space<vmem>>, %arg8: memref<1x64xf32, #tpu.memory_space<vmem>>, %arg9: memref<1x64xf32, #tpu.memory_space<vmem>>, %arg10: memref<64x64xf32, #tpu.memory_space<vmem>>, %arg11: memref<1x64xf32, #tpu.memory_space<vmem>>, %arg12: memref<1x64xf32, #tpu.memory_space<vmem>>, %arg13: memref<64x64xf32, #tpu.memory_space<vmem>>, %arg14: memref<1x64xf32, #tpu.memory_space<vmem>>, %arg15: memref<1x64xf32, #tpu.memory_space<vmem>>, %arg16: memref<16x64xf32, #tpu.memory_space<vmem>>, %arg17: memref<32x64xf32, #tpu.memory_space<vmem>>) attributes {dimension_semantics = [], scalar_prefetch = 0 : i64, scratch_operands = 0 : i64, tpu.core_type = #tpu.core_type<tc>} {
    %c0 = arith.constant 0 : index
    %c0_0 = arith.constant 0 : index
    %0 = vector.load %arg4[%c0, %c0_0] : memref<256x64xf32, #tpu.memory_space<vmem>>, vector<256x64xf32>
    %c0_1 = arith.constant 0 : index
    %c0_2 = arith.constant 0 : index
    %1 = vector.load %arg5[%c0_1, %c0_2] : memref<1x64xf32, #tpu.memory_space<vmem>>, vector<1x64xf32>
    %c0_3 = arith.constant 0 : index
    %c0_4 = arith.constant 0 : index
    %2 = vector.load %arg6[%c0_3, %c0_4] : memref<1x64xf32, #tpu.memory_space<vmem>>, vector<1x64xf32>
    %c0_5 = arith.constant 0 : index
    %c0_6 = arith.constant 0 : index
    %3 = vector.load %arg7[%c0_5, %c0_6] : memref<64x64xf32, #tpu.memory_space<vmem>>, vector<64x64xf32>
    %c0_7 = arith.constant 0 : index
    %c0_8 = arith.constant 0 : index
    %4 = vector.load %arg8[%c0_7, %c0_8] : memref<1x64xf32, #tpu.memory_space<vmem>>, vector<1x64xf32>
    %c0_9 = arith.constant 0 : index
    %c0_10 = arith.constant 0 : index
    %5 = vector.load %arg9[%c0_9, %c0_10] : memref<1x64xf32, #tpu.memory_space<vmem>>, vector<1x64xf32>
    %c0_11 = arith.constant 0 : index
    %c0_12 = arith.constant 0 : index
    %6 = vector.load %arg10[%c0_11, %c0_12] : memref<64x64xf32, #tpu.memory_space<vmem>>, vector<64x64xf32>
    %c0_13 = arith.constant 0 : index
    %c0_14 = arith.constant 0 : index
    %7 = vector.load %arg11[%c0_13, %c0_14] : memref<1x64xf32, #tpu.memory_space<vmem>>, vector<1x64xf32>
    %c0_15 = arith.constant 0 : index
    %c0_16 = arith.constant 0 : index
    %8 = vector.load %arg12[%c0_15, %c0_16] : memref<1x64xf32, #tpu.memory_space<vmem>>, vector<1x64xf32>
    %c0_17 = arith.constant 0 : index
    %c0_18 = arith.constant 0 : index
    %9 = vector.load %arg13[%c0_17, %c0_18] : memref<64x64xf32, #tpu.memory_space<vmem>>, vector<64x64xf32>
    %c0_19 = arith.constant 0 : index
    %c0_20 = arith.constant 0 : index
    %10 = vector.load %arg14[%c0_19, %c0_20] : memref<1x64xf32, #tpu.memory_space<vmem>>, vector<1x64xf32>
    %c0_21 = arith.constant 0 : index
    %c0_22 = arith.constant 0 : index
    %11 = vector.load %arg15[%c0_21, %c0_22] : memref<1x64xf32, #tpu.memory_space<vmem>>, vector<1x64xf32>
    %c0_23 = arith.constant 0 : index
    %c0_24 = arith.constant 0 : index
    %12 = vector.load %arg2[%c0_23, %c0_24] : memref<16x16xf32, #tpu.memory_space<vmem>>, vector<16x16xf32>
    %c0_25 = arith.constant 0 : index
    %c0_26 = arith.constant 0 : index
    %13 = vector.load %arg3[%c0_25, %c0_26] : memref<32x32xf32, #tpu.memory_space<vmem>>, vector<32x32xf32>
    %c0_27 = arith.constant 0 : index
    %c0_28 = arith.constant 0 : index
    %14 = vector.load %arg0[%c0_27, %c0_28] : memref<16x256xf32, #tpu.memory_space<vmem>>, vector<16x256xf32>
    %cst = arith.constant dense<0.000000e+00> : vector<16x256xf32>
    %15 = tpu.matmul %12, %14, %cst {dimension_numbers = #tpu.dot_dimension_numbers<[1], [0], [0], [1], [0, 0, 1, 1], [], []>} : vector<16x16xf32>, vector<16x256xf32>, vector<16x256xf32> -> vector<16x256xf32>
    %cst_29 = arith.constant dense<0.000000e+00> : vector<16x64xf32>
    %16 = tpu.matmul %15, %0, %cst_29 {dimension_numbers = #tpu.dot_dimension_numbers<[1], [0], [0], [1], [0, 0, 1, 1], [], []>} : vector<16x256xf32>, vector<256x64xf32>, vector<16x64xf32> -> vector<16x64xf32>
    %17 = vector.broadcast %1 : vector<1x64xf32> to vector<16x64xf32>
    %18 = arith.mulf %16, %17 : vector<16x64xf32>
    %19 = vector.broadcast %2 : vector<1x64xf32> to vector<16x64xf32>
    %20 = arith.addf %18, %19 : vector<16x64xf32>
    %cst_30 = arith.constant 0.000000e+00 : f32
    %21 = vector.broadcast %cst_30 : f32 to vector<16x64xf32>
    %22 = arith.maximumf %20, %21 : vector<16x64xf32>
    %cst_31 = arith.constant dense<0.000000e+00> : vector<16x64xf32>
    %23 = tpu.matmul %22, %3, %cst_31 {dimension_numbers = #tpu.dot_dimension_numbers<[1], [0], [0], [1], [0, 0, 1, 1], [], []>} : vector<16x64xf32>, vector<64x64xf32>, vector<16x64xf32> -> vector<16x64xf32>
    %24 = vector.broadcast %4 : vector<1x64xf32> to vector<16x64xf32>
    %25 = arith.mulf %23, %24 : vector<16x64xf32>
    %26 = vector.broadcast %5 : vector<1x64xf32> to vector<16x64xf32>
    %27 = arith.addf %25, %26 : vector<16x64xf32>
    %cst_32 = arith.constant 0.000000e+00 : f32
    %28 = vector.broadcast %cst_32 : f32 to vector<16x64xf32>
    %29 = arith.maximumf %27, %28 : vector<16x64xf32>
    %cst_33 = arith.constant dense<0.000000e+00> : vector<16x64xf32>
    %30 = tpu.matmul %12, %29, %cst_33 {dimension_numbers = #tpu.dot_dimension_numbers<[1], [0], [0], [1], [0, 0, 1, 1], [], []>} : vector<16x16xf32>, vector<16x64xf32>, vector<16x64xf32> -> vector<16x64xf32>
    %cst_34 = arith.constant dense<0.000000e+00> : vector<16x64xf32>
    %31 = tpu.matmul %30, %6, %cst_34 {dimension_numbers = #tpu.dot_dimension_numbers<[1], [0], [0], [1], [0, 0, 1, 1], [], []>} : vector<16x64xf32>, vector<64x64xf32>, vector<16x64xf32> -> vector<16x64xf32>
    %32 = vector.broadcast %7 : vector<1x64xf32> to vector<16x64xf32>
    %33 = arith.mulf %31, %32 : vector<16x64xf32>
    %34 = vector.broadcast %8 : vector<1x64xf32> to vector<16x64xf32>
    %35 = arith.addf %33, %34 : vector<16x64xf32>
    %cst_35 = arith.constant 0.000000e+00 : f32
    %36 = vector.broadcast %cst_35 : f32 to vector<16x64xf32>
    %37 = arith.maximumf %35, %36 : vector<16x64xf32>
    %cst_36 = arith.constant dense<0.000000e+00> : vector<16x64xf32>
    %38 = tpu.matmul %37, %9, %cst_36 {dimension_numbers = #tpu.dot_dimension_numbers<[1], [0], [0], [1], [0, 0, 1, 1], [], []>} : vector<16x64xf32>, vector<64x64xf32>, vector<16x64xf32> -> vector<16x64xf32>
    %39 = vector.broadcast %10 : vector<1x64xf32> to vector<16x64xf32>
    %40 = arith.mulf %38, %39 : vector<16x64xf32>
    %41 = vector.broadcast %11 : vector<1x64xf32> to vector<16x64xf32>
    %42 = arith.addf %40, %41 : vector<16x64xf32>
    %cst_37 = arith.constant 0.000000e+00 : f32
    %43 = vector.broadcast %cst_37 : f32 to vector<16x64xf32>
    %44 = arith.maximumf %42, %43 : vector<16x64xf32>
    %c0_38 = arith.constant 0 : index
    %c0_39 = arith.constant 0 : index
    %45 = vector.load %arg1[%c0_38, %c0_39] : memref<32x256xf32, #tpu.memory_space<vmem>>, vector<32x256xf32>
    %cst_40 = arith.constant dense<0.000000e+00> : vector<32x256xf32>
    %46 = tpu.matmul %13, %45, %cst_40 {dimension_numbers = #tpu.dot_dimension_numbers<[1], [0], [0], [1], [0, 0, 1, 1], [], []>} : vector<32x32xf32>, vector<32x256xf32>, vector<32x256xf32> -> vector<32x256xf32>
    %cst_41 = arith.constant dense<0.000000e+00> : vector<32x64xf32>
    %47 = tpu.matmul %46, %0, %cst_41 {dimension_numbers = #tpu.dot_dimension_numbers<[1], [0], [0], [1], [0, 0, 1, 1], [], []>} : vector<32x256xf32>, vector<256x64xf32>, vector<32x64xf32> -> vector<32x64xf32>
    %48 = vector.broadcast %1 : vector<1x64xf32> to vector<32x64xf32>
    %49 = arith.mulf %47, %48 : vector<32x64xf32>
    %50 = vector.broadcast %2 : vector<1x64xf32> to vector<32x64xf32>
    %51 = arith.addf %49, %50 : vector<32x64xf32>
    %cst_42 = arith.constant 0.000000e+00 : f32
    %52 = vector.broadcast %cst_42 : f32 to vector<32x64xf32>
    %53 = arith.maximumf %51, %52 : vector<32x64xf32>
    %cst_43 = arith.constant dense<0.000000e+00> : vector<32x64xf32>
    %54 = tpu.matmul %53, %3, %cst_43 {dimension_numbers = #tpu.dot_dimension_numbers<[1], [0], [0], [1], [0, 0, 1, 1], [], []>} : vector<32x64xf32>, vector<64x64xf32>, vector<32x64xf32> -> vector<32x64xf32>
    %55 = vector.broadcast %4 : vector<1x64xf32> to vector<32x64xf32>
    %56 = arith.mulf %54, %55 : vector<32x64xf32>
    %57 = vector.broadcast %5 : vector<1x64xf32> to vector<32x64xf32>
    %58 = arith.addf %56, %57 : vector<32x64xf32>
    %cst_44 = arith.constant 0.000000e+00 : f32
    %59 = vector.broadcast %cst_44 : f32 to vector<32x64xf32>
    %60 = arith.maximumf %58, %59 : vector<32x64xf32>
    %cst_45 = arith.constant dense<0.000000e+00> : vector<32x64xf32>
    %61 = tpu.matmul %13, %60, %cst_45 {dimension_numbers = #tpu.dot_dimension_numbers<[1], [0], [0], [1], [0, 0, 1, 1], [], []>} : vector<32x32xf32>, vector<32x64xf32>, vector<32x64xf32> -> vector<32x64xf32>
    %cst_46 = arith.constant dense<0.000000e+00> : vector<32x64xf32>
    %62 = tpu.matmul %61, %6, %cst_46 {dimension_numbers = #tpu.dot_dimension_numbers<[1], [0], [0], [1], [0, 0, 1, 1], [], []>} : vector<32x64xf32>, vector<64x64xf32>, vector<32x64xf32> -> vector<32x64xf32>
    %63 = vector.broadcast %7 : vector<1x64xf32> to vector<32x64xf32>
    %64 = arith.mulf %62, %63 : vector<32x64xf32>
    %65 = vector.broadcast %8 : vector<1x64xf32> to vector<32x64xf32>
    %66 = arith.addf %64, %65 : vector<32x64xf32>
    %cst_47 = arith.constant 0.000000e+00 : f32
    %67 = vector.broadcast %cst_47 : f32 to vector<32x64xf32>
    %68 = arith.maximumf %66, %67 : vector<32x64xf32>
    %cst_48 = arith.constant dense<0.000000e+00> : vector<32x64xf32>
    %69 = tpu.matmul %68, %9, %cst_48 {dimension_numbers = #tpu.dot_dimension_numbers<[1], [0], [0], [1], [0, 0, 1, 1], [], []>} : vector<32x64xf32>, vector<64x64xf32>, vector<32x64xf32> -> vector<32x64xf32>
    %70 = vector.broadcast %10 : vector<1x64xf32> to vector<32x64xf32>
    %71 = arith.mulf %69, %70 : vector<32x64xf32>
    %72 = vector.broadcast %11 : vector<1x64xf32> to vector<32x64xf32>
    %73 = arith.addf %71, %72 : vector<32x64xf32>
    %cst_49 = arith.constant 0.000000e+00 : f32
    %74 = vector.broadcast %cst_49 : f32 to vector<32x64xf32>
    %75 = arith.maximumf %73, %74 : vector<32x64xf32>
    %c0_50 = arith.constant 0 : index
    %c0_51 = arith.constant 0 : index
    %76 = vector.load %arg16[%c0_50, %c0_51] : memref<16x64xf32, #tpu.memory_space<vmem>>, vector<16x64xf32>
    tpu.vector_store %arg16[%c0_50, %c0_51], %44 {strides = array<i32>} : memref<16x64xf32, #tpu.memory_space<vmem>>, vector<16x64xf32>,
    %c0_52 = arith.constant 0 : index
    %c0_53 = arith.constant 0 : index
    %77 = vector.load %arg17[%c0_52, %c0_53] : memref<32x64xf32, #tpu.memory_space<vmem>>, vector<32x64xf32>
    tpu.vector_store %arg17[%c0_52, %c0_53], %75 {strides = array<i32>} : memref<32x64xf32, #tpu.memory_space<vmem>>, vector<32x64xf32>,
    return
  }
}

module attributes {stable_mosaic.version = 11 : i64} {
  func.func @_gat_layer_kernel(%arg0: memref<16x64xf32, #tpu.memory_space<vmem>>, %arg1: memref<32x64xf32, #tpu.memory_space<vmem>>, %arg2: memref<64x4xf32, #tpu.memory_space<vmem>>, %arg3: memref<64x4xf32, #tpu.memory_space<vmem>>, %arg4: memref<8x4xf32, #tpu.memory_space<vmem>>, %arg5: memref<16x16xf32, #tpu.memory_space<vmem>>, %arg6: memref<32x32xf32, #tpu.memory_space<vmem>>, %arg7: memref<16x32xf32, #tpu.memory_space<vmem>>, %arg8: memref<32x16xf32, #tpu.memory_space<vmem>>, %arg9: memref<16x4xf32, #tpu.memory_space<vmem>>, %arg10: memref<32x4xf32, #tpu.memory_space<vmem>>) attributes {dimension_semantics = [], scalar_prefetch = 0 : i64, scratch_operands = 0 : i64, tpu.core_type = #tpu.core_type<tc>} {
    %c0 = arith.constant 0 : index
    %c0_0 = arith.constant 0 : index
    %0 = vector.load %arg0[%c0, %c0_0] : memref<16x64xf32, #tpu.memory_space<vmem>>, vector<16x64xf32>
    %c0_1 = arith.constant 0 : index
    %c0_2 = arith.constant 0 : index
    %1 = vector.load %arg2[%c0_1, %c0_2] : memref<64x4xf32, #tpu.memory_space<vmem>>, vector<64x4xf32>
    %cst = arith.constant dense<0.000000e+00> : vector<16x4xf32>
    %2 = tpu.matmul %0, %1, %cst {dimension_numbers = #tpu.dot_dimension_numbers<[1], [0], [0], [1], [0, 0, 1, 1], [], []>} : vector<16x64xf32>, vector<64x4xf32>, vector<16x4xf32> -> vector<16x4xf32>
    %c0_3 = arith.constant 0 : index
    %c0_4 = arith.constant 0 : index
    %3 = vector.load %arg1[%c0_3, %c0_4] : memref<32x64xf32, #tpu.memory_space<vmem>>, vector<32x64xf32>
    %c0_5 = arith.constant 0 : index
    %c0_6 = arith.constant 0 : index
    %4 = vector.load %arg3[%c0_5, %c0_6] : memref<64x4xf32, #tpu.memory_space<vmem>>, vector<64x4xf32>
    %cst_7 = arith.constant dense<0.000000e+00> : vector<32x4xf32>
    %5 = tpu.matmul %3, %4, %cst_7 {dimension_numbers = #tpu.dot_dimension_numbers<[1], [0], [0], [1], [0, 0, 1, 1], [], []>} : vector<32x64xf32>, vector<64x4xf32>, vector<32x4xf32> -> vector<32x4xf32>
    %c0_8 = arith.constant 0 : index
    %c0_9 = arith.constant 0 : index
    %6 = vector.load %arg4[%c0_8, %c0_9] : memref<8x4xf32, #tpu.memory_space<vmem>>, vector<8x4xf32>
    %7 = vector.extract_strided_slice %6 {offsets = [0, 0], sizes = [1, 4], strides = [1, 1]} : vector<8x4xf32> to vector<1x4xf32>
    %8 = vector.extract_strided_slice %6 {offsets = [1, 0], sizes = [1, 4], strides = [1, 1]} : vector<8x4xf32> to vector<1x4xf32>
    %c0_10 = arith.constant 0 : index
    %c0_11 = arith.constant 0 : index
    %9 = vector.load %arg5[%c0_10, %c0_11] : memref<16x16xf32, #tpu.memory_space<vmem>>, vector<16x16xf32>
    %10 = vector.broadcast %7 : vector<1x4xf32> to vector<16x4xf32>
    %11 = arith.mulf %2, %10 : vector<16x4xf32>
    %cst_12 = arith.constant dense<0.000000e+00> : vector<16xf32>
    %12 = vector.multi_reduction <add>, %11, %cst_12 [1] : vector<16x4xf32> to vector<16xf32>
    %13 = vector.shape_cast %12 : vector<16xf32> to vector<16x1xf32>
    %14 = vector.broadcast %8 : vector<1x4xf32> to vector<16x4xf32>
    %15 = arith.mulf %2, %14 : vector<16x4xf32>
    %cst_13 = arith.constant dense<0.000000e+00> : vector<16xf32>
    %16 = vector.multi_reduction <add>, %15, %cst_13 [1] : vector<16x4xf32> to vector<16xf32>
    %17 = vector.shape_cast %16 : vector<16xf32> to vector<1x16xf32>
    %18 = vector.broadcast %13 : vector<16x1xf32> to vector<16x16xf32>
    %19 = vector.broadcast %17 : vector<1x16xf32> to vector<16x16xf32>
    %20 = arith.addf %18, %19 : vector<16x16xf32>
    %cst_14 = arith.constant 0.000000e+00 : f32
    %21 = vector.broadcast %cst_14 : f32 to vector<16x16xf32>
    %22 = arith.cmpf ogt, %9, %21 : vector<16x16xf32>
    %cst_15 = arith.constant 0.000000e+00 : f32
    %23 = vector.broadcast %cst_15 : f32 to vector<16x16xf32>
    %24 = arith.cmpf ogt, %20, %23 : vector<16x16xf32>
    %cst_16 = arith.constant 2.000000e-01 : f32
    %25 = vector.broadcast %cst_16 : f32 to vector<16x16xf32>
    %26 = arith.mulf %25, %20 : vector<16x16xf32>
    %27 = arith.select %24, %20, %26 : vector<16x16xi1>, vector<16x16xf32>
    %cst_17 = arith.constant -9.000000e+15 : f32
    %28 = vector.broadcast %cst_17 : f32 to vector<16x16xf32>
    %29 = arith.select %22, %27, %28 : vector<16x16xi1>, vector<16x16xf32>
    %cst_18 = arith.constant dense<0xFF800000> : vector<16xf32>
    %30 = vector.multi_reduction <maximumf>, %29, %cst_18 [1] : vector<16x16xf32> to vector<16xf32>
    %31 = vector.shape_cast %30 : vector<16xf32> to vector<16x1xf32>
    %32 = vector.broadcast %31 : vector<16x1xf32> to vector<16x16xf32>
    %33 = arith.subf %29, %32 : vector<16x16xf32>
    %34 = math.exp %33 : vector<16x16xf32>
    %cst_19 = arith.constant dense<0.000000e+00> : vector<16xf32>
    %35 = vector.multi_reduction <add>, %34, %cst_19 [1] : vector<16x16xf32> to vector<16xf32>
    %36 = vector.shape_cast %35 : vector<16xf32> to vector<16x1xf32>
    %37 = tpu.reciprocal %36 {approx = true} : vector<16x1xf32> -> vector<16x1xf32>
    %38 = vector.broadcast %37 : vector<16x1xf32> to vector<16x16xf32>
    %39 = arith.mulf %34, %38 : vector<16x16xf32>
    %cst_20 = arith.constant dense<0.000000e+00> : vector<16x4xf32>
    %40 = tpu.matmul %39, %2, %cst_20 {dimension_numbers = #tpu.dot_dimension_numbers<[1], [0], [0], [1], [0, 0, 1, 1], [], []>} : vector<16x16xf32>, vector<16x4xf32>, vector<16x4xf32> -> vector<16x4xf32>
    %41 = vector.extract_strided_slice %6 {offsets = [2, 0], sizes = [1, 4], strides = [1, 1]} : vector<8x4xf32> to vector<1x4xf32>
    %42 = vector.extract_strided_slice %6 {offsets = [3, 0], sizes = [1, 4], strides = [1, 1]} : vector<8x4xf32> to vector<1x4xf32>
    %c0_21 = arith.constant 0 : index
    %c0_22 = arith.constant 0 : index
    %43 = vector.load %arg7[%c0_21, %c0_22] : memref<16x32xf32, #tpu.memory_space<vmem>>, vector<16x32xf32>
    %44 = vector.broadcast %41 : vector<1x4xf32> to vector<16x4xf32>
    %45 = arith.mulf %2, %44 : vector<16x4xf32>
    %cst_23 = arith.constant dense<0.000000e+00> : vector<16xf32>
    %46 = vector.multi_reduction <add>, %45, %cst_23 [1] : vector<16x4xf32> to vector<16xf32>
    %47 = vector.shape_cast %46 : vector<16xf32> to vector<16x1xf32>
    %48 = vector.broadcast %42 : vector<1x4xf32> to vector<32x4xf32>
    %49 = arith.mulf %5, %48 : vector<32x4xf32>
    %cst_24 = arith.constant dense<0.000000e+00> : vector<32xf32>
    %50 = vector.multi_reduction <add>, %49, %cst_24 [1] : vector<32x4xf32> to vector<32xf32>
    %51 = vector.shape_cast %50 : vector<32xf32> to vector<1x32xf32>
    %52 = vector.broadcast %47 : vector<16x1xf32> to vector<16x32xf32>
    %53 = vector.broadcast %51 : vector<1x32xf32> to vector<16x32xf32>
    %54 = arith.addf %52, %53 : vector<16x32xf32>
    %cst_25 = arith.constant 0.000000e+00 : f32
    %55 = vector.broadcast %cst_25 : f32 to vector<16x32xf32>
    %56 = arith.cmpf ogt, %43, %55 : vector<16x32xf32>
    %cst_26 = arith.constant 0.000000e+00 : f32
    %57 = vector.broadcast %cst_26 : f32 to vector<16x32xf32>
    %58 = arith.cmpf ogt, %54, %57 : vector<16x32xf32>
    %cst_27 = arith.constant 2.000000e-01 : f32
    %59 = vector.broadcast %cst_27 : f32 to vector<16x32xf32>
    %60 = arith.mulf %59, %54 : vector<16x32xf32>
    %61 = arith.select %58, %54, %60 : vector<16x32xi1>, vector<16x32xf32>
    %cst_28 = arith.constant -9.000000e+15 : f32
    %62 = vector.broadcast %cst_28 : f32 to vector<16x32xf32>
    %63 = arith.select %56, %61, %62 : vector<16x32xi1>, vector<16x32xf32>
    %cst_29 = arith.constant dense<0xFF800000> : vector<16xf32>
    %64 = vector.multi_reduction <maximumf>, %63, %cst_29 [1] : vector<16x32xf32> to vector<16xf32>
    %65 = vector.shape_cast %64 : vector<16xf32> to vector<16x1xf32>
    %66 = vector.broadcast %65 : vector<16x1xf32> to vector<16x32xf32>
    %67 = arith.subf %63, %66 : vector<16x32xf32>
    %68 = math.exp %67 : vector<16x32xf32>
    %cst_30 = arith.constant dense<0.000000e+00> : vector<16xf32>
    %69 = vector.multi_reduction <add>, %68, %cst_30 [1] : vector<16x32xf32> to vector<16xf32>
    %70 = vector.shape_cast %69 : vector<16xf32> to vector<16x1xf32>
    %71 = tpu.reciprocal %70 {approx = true} : vector<16x1xf32> -> vector<16x1xf32>
    %72 = vector.broadcast %71 : vector<16x1xf32> to vector<16x32xf32>
    %73 = arith.mulf %68, %72 : vector<16x32xf32>
    %cst_31 = arith.constant dense<0.000000e+00> : vector<16x4xf32>
    %74 = tpu.matmul %73, %5, %cst_31 {dimension_numbers = #tpu.dot_dimension_numbers<[1], [0], [0], [1], [0, 0, 1, 1], [], []>} : vector<16x32xf32>, vector<32x4xf32>, vector<16x4xf32> -> vector<16x4xf32>
    %75 = vector.extract_strided_slice %6 {offsets = [4, 0], sizes = [1, 4], strides = [1, 1]} : vector<8x4xf32> to vector<1x4xf32>
    %76 = vector.extract_strided_slice %6 {offsets = [5, 0], sizes = [1, 4], strides = [1, 1]} : vector<8x4xf32> to vector<1x4xf32>
    %c0_32 = arith.constant 0 : index
    %c0_33 = arith.constant 0 : index
    %77 = vector.load %arg6[%c0_32, %c0_33] : memref<32x32xf32, #tpu.memory_space<vmem>>, vector<32x32xf32>
    %78 = vector.broadcast %75 : vector<1x4xf32> to vector<32x4xf32>
    %79 = arith.mulf %5, %78 : vector<32x4xf32>
    %cst_34 = arith.constant dense<0.000000e+00> : vector<32xf32>
    %80 = vector.multi_reduction <add>, %79, %cst_34 [1] : vector<32x4xf32> to vector<32xf32>
    %81 = vector.shape_cast %80 : vector<32xf32> to vector<32x1xf32>
    %82 = vector.broadcast %76 : vector<1x4xf32> to vector<32x4xf32>
    %83 = arith.mulf %5, %82 : vector<32x4xf32>
    %cst_35 = arith.constant dense<0.000000e+00> : vector<32xf32>
    %84 = vector.multi_reduction <add>, %83, %cst_35 [1] : vector<32x4xf32> to vector<32xf32>
    %85 = vector.shape_cast %84 : vector<32xf32> to vector<1x32xf32>
    %86 = vector.broadcast %81 : vector<32x1xf32> to vector<32x32xf32>
    %87 = vector.broadcast %85 : vector<1x32xf32> to vector<32x32xf32>
    %88 = arith.addf %86, %87 : vector<32x32xf32>
    %cst_36 = arith.constant 0.000000e+00 : f32
    %89 = vector.broadcast %cst_36 : f32 to vector<32x32xf32>
    %90 = arith.cmpf ogt, %77, %89 : vector<32x32xf32>
    %cst_37 = arith.constant 0.000000e+00 : f32
    %91 = vector.broadcast %cst_37 : f32 to vector<32x32xf32>
    %92 = arith.cmpf ogt, %88, %91 : vector<32x32xf32>
    %cst_38 = arith.constant 2.000000e-01 : f32
    %93 = vector.broadcast %cst_38 : f32 to vector<32x32xf32>
    %94 = arith.mulf %93, %88 : vector<32x32xf32>
    %95 = arith.select %92, %88, %94 : vector<32x32xi1>, vector<32x32xf32>
    %cst_39 = arith.constant -9.000000e+15 : f32
    %96 = vector.broadcast %cst_39 : f32 to vector<32x32xf32>
    %97 = arith.select %90, %95, %96 : vector<32x32xi1>, vector<32x32xf32>
    %cst_40 = arith.constant dense<0xFF800000> : vector<32xf32>
    %98 = vector.multi_reduction <maximumf>, %97, %cst_40 [1] : vector<32x32xf32> to vector<32xf32>
    %99 = vector.shape_cast %98 : vector<32xf32> to vector<32x1xf32>
    %100 = vector.broadcast %99 : vector<32x1xf32> to vector<32x32xf32>
    %101 = arith.subf %97, %100 : vector<32x32xf32>
    %102 = math.exp %101 : vector<32x32xf32>
    %cst_41 = arith.constant dense<0.000000e+00> : vector<32xf32>
    %103 = vector.multi_reduction <add>, %102, %cst_41 [1] : vector<32x32xf32> to vector<32xf32>
    %104 = vector.shape_cast %103 : vector<32xf32> to vector<32x1xf32>
    %105 = tpu.reciprocal %104 {approx = true} : vector<32x1xf32> -> vector<32x1xf32>
    %106 = vector.broadcast %105 : vector<32x1xf32> to vector<32x32xf32>
    %107 = arith.mulf %102, %106 : vector<32x32xf32>
    %cst_42 = arith.constant dense<0.000000e+00> : vector<32x4xf32>
    %108 = tpu.matmul %107, %5, %cst_42 {dimension_numbers = #tpu.dot_dimension_numbers<[1], [0], [0], [1], [0, 0, 1, 1], [], []>} : vector<32x32xf32>, vector<32x4xf32>, vector<32x4xf32> -> vector<32x4xf32>
    %109 = vector.extract_strided_slice %6 {offsets = [6, 0], sizes = [1, 4], strides = [1, 1]} : vector<8x4xf32> to vector<1x4xf32>
    %110 = vector.extract_strided_slice %6 {offsets = [7, 0], sizes = [1, 4], strides = [1, 1]} : vector<8x4xf32> to vector<1x4xf32>
    %c0_43 = arith.constant 0 : index
    %c0_44 = arith.constant 0 : index
    %111 = vector.load %arg8[%c0_43, %c0_44] : memref<32x16xf32, #tpu.memory_space<vmem>>, vector<32x16xf32>
    %112 = vector.broadcast %109 : vector<1x4xf32> to vector<32x4xf32>
    %113 = arith.mulf %5, %112 : vector<32x4xf32>
    %cst_45 = arith.constant dense<0.000000e+00> : vector<32xf32>
    %114 = vector.multi_reduction <add>, %113, %cst_45 [1] : vector<32x4xf32> to vector<32xf32>
    %115 = vector.shape_cast %114 : vector<32xf32> to vector<32x1xf32>
    %116 = vector.broadcast %110 : vector<1x4xf32> to vector<16x4xf32>
    %117 = arith.mulf %2, %116 : vector<16x4xf32>
    %cst_46 = arith.constant dense<0.000000e+00> : vector<16xf32>
    %118 = vector.multi_reduction <add>, %117, %cst_46 [1] : vector<16x4xf32> to vector<16xf32>
    %119 = vector.shape_cast %118 : vector<16xf32> to vector<1x16xf32>
    %120 = vector.broadcast %115 : vector<32x1xf32> to vector<32x16xf32>
    %121 = vector.broadcast %119 : vector<1x16xf32> to vector<32x16xf32>
    %122 = arith.addf %120, %121 : vector<32x16xf32>
    %cst_47 = arith.constant 0.000000e+00 : f32
    %123 = vector.broadcast %cst_47 : f32 to vector<32x16xf32>
    %124 = arith.cmpf ogt, %111, %123 : vector<32x16xf32>
    %cst_48 = arith.constant 0.000000e+00 : f32
    %125 = vector.broadcast %cst_48 : f32 to vector<32x16xf32>
    %126 = arith.cmpf ogt, %122, %125 : vector<32x16xf32>
    %cst_49 = arith.constant 2.000000e-01 : f32
    %127 = vector.broadcast %cst_49 : f32 to vector<32x16xf32>
    %128 = arith.mulf %127, %122 : vector<32x16xf32>
    %129 = arith.select %126, %122, %128 : vector<32x16xi1>, vector<32x16xf32>
    %cst_50 = arith.constant -9.000000e+15 : f32
    %130 = vector.broadcast %cst_50 : f32 to vector<32x16xf32>
    %131 = arith.select %124, %129, %130 : vector<32x16xi1>, vector<32x16xf32>
    %cst_51 = arith.constant dense<0xFF800000> : vector<32xf32>
    %132 = vector.multi_reduction <maximumf>, %131, %cst_51 [1] : vector<32x16xf32> to vector<32xf32>
    %133 = vector.shape_cast %132 : vector<32xf32> to vector<32x1xf32>
    %134 = vector.broadcast %133 : vector<32x1xf32> to vector<32x16xf32>
    %135 = arith.subf %131, %134 : vector<32x16xf32>
    %136 = math.exp %135 : vector<32x16xf32>
    %cst_52 = arith.constant dense<0.000000e+00> : vector<32xf32>
    %137 = vector.multi_reduction <add>, %136, %cst_52 [1] : vector<32x16xf32> to vector<32xf32>
    %138 = vector.shape_cast %137 : vector<32xf32> to vector<32x1xf32>
    %139 = tpu.reciprocal %138 {approx = true} : vector<32x1xf32> -> vector<32x1xf32>
    %140 = vector.broadcast %139 : vector<32x1xf32> to vector<32x16xf32>
    %141 = arith.mulf %136, %140 : vector<32x16xf32>
    %cst_53 = arith.constant dense<0.000000e+00> : vector<32x4xf32>
    %142 = tpu.matmul %141, %2, %cst_53 {dimension_numbers = #tpu.dot_dimension_numbers<[1], [0], [0], [1], [0, 0, 1, 1], [], []>} : vector<32x16xf32>, vector<16x4xf32>, vector<32x4xf32> -> vector<32x4xf32>
    %143 = arith.addf %40, %74 : vector<16x4xf32>
    %cst_54 = arith.constant 5.000000e-01 : f32
    %144 = vector.broadcast %cst_54 : f32 to vector<16x4xf32>
    %145 = arith.mulf %144, %143 : vector<16x4xf32>
    %146 = arith.addf %108, %142 : vector<32x4xf32>
    %cst_55 = arith.constant 5.000000e-01 : f32
    %147 = vector.broadcast %cst_55 : f32 to vector<32x4xf32>
    %148 = arith.mulf %147, %146 : vector<32x4xf32>
    %cst_56 = arith.constant 0.000000e+00 : f32
    %149 = vector.broadcast %cst_56 : f32 to vector<16x4xf32>
    %150 = arith.cmpf ogt, %145, %149 : vector<16x4xf32>
    %cst_57 = arith.constant 0.000000e+00 : f32
    %151 = vector.broadcast %cst_57 : f32 to vector<16x4xf32>
    %152 = arith.minimumf %145, %151 : vector<16x4xf32>
    %153 = math.exp %152 : vector<16x4xf32>
    %cst_58 = arith.constant 1.000000e+00 : f32
    %154 = vector.broadcast %cst_58 : f32 to vector<16x4xf32>
    %155 = arith.subf %153, %154 : vector<16x4xf32>
    %156 = arith.select %150, %145, %155 : vector<16x4xi1>, vector<16x4xf32>
    %cst_59 = arith.constant dense<0xFF800000> : vector<16xf32>
    %157 = vector.multi_reduction <maximumf>, %156, %cst_59 [1] : vector<16x4xf32> to vector<16xf32>
    %158 = vector.shape_cast %157 : vector<16xf32> to vector<16x1xf32>
    %159 = vector.broadcast %158 : vector<16x1xf32> to vector<16x4xf32>
    %160 = arith.subf %156, %159 : vector<16x4xf32>
    %161 = math.exp %160 : vector<16x4xf32>
    %cst_60 = arith.constant dense<0.000000e+00> : vector<16xf32>
    %162 = vector.multi_reduction <add>, %161, %cst_60 [1] : vector<16x4xf32> to vector<16xf32>
    %163 = vector.shape_cast %162 : vector<16xf32> to vector<16x1xf32>
    %164 = math.log %163 : vector<16x1xf32>
    %165 = vector.broadcast %164 : vector<16x1xf32> to vector<16x4xf32>
    %166 = arith.subf %160, %165 : vector<16x4xf32>
    %cst_61 = arith.constant 0.000000e+00 : f32
    %167 = vector.broadcast %cst_61 : f32 to vector<32x4xf32>
    %168 = arith.cmpf ogt, %148, %167 : vector<32x4xf32>
    %cst_62 = arith.constant 0.000000e+00 : f32
    %169 = vector.broadcast %cst_62 : f32 to vector<32x4xf32>
    %170 = arith.minimumf %148, %169 : vector<32x4xf32>
    %171 = math.exp %170 : vector<32x4xf32>
    %cst_63 = arith.constant 1.000000e+00 : f32
    %172 = vector.broadcast %cst_63 : f32 to vector<32x4xf32>
    %173 = arith.subf %171, %172 : vector<32x4xf32>
    %174 = arith.select %168, %148, %173 : vector<32x4xi1>, vector<32x4xf32>
    %cst_64 = arith.constant dense<0xFF800000> : vector<32xf32>
    %175 = vector.multi_reduction <maximumf>, %174, %cst_64 [1] : vector<32x4xf32> to vector<32xf32>
    %176 = vector.shape_cast %175 : vector<32xf32> to vector<32x1xf32>
    %177 = vector.broadcast %176 : vector<32x1xf32> to vector<32x4xf32>
    %178 = arith.subf %174, %177 : vector<32x4xf32>
    %179 = math.exp %178 : vector<32x4xf32>
    %cst_65 = arith.constant dense<0.000000e+00> : vector<32xf32>
    %180 = vector.multi_reduction <add>, %179, %cst_65 [1] : vector<32x4xf32> to vector<32xf32>
    %181 = vector.shape_cast %180 : vector<32xf32> to vector<32x1xf32>
    %182 = math.log %181 : vector<32x1xf32>
    %183 = vector.broadcast %182 : vector<32x1xf32> to vector<32x4xf32>
    %184 = arith.subf %178, %183 : vector<32x4xf32>
    %c0_66 = arith.constant 0 : index
    %c0_67 = arith.constant 0 : index
    %185 = vector.load %arg9[%c0_66, %c0_67] : memref<16x4xf32, #tpu.memory_space<vmem>>, vector<16x4xf32>
    tpu.vector_store %arg9[%c0_66, %c0_67], %166 {strides = array<i32>} : memref<16x4xf32, #tpu.memory_space<vmem>>, vector<16x4xf32>,
    %c0_68 = arith.constant 0 : index
    %c0_69 = arith.constant 0 : index
    %186 = vector.load %arg10[%c0_68, %c0_69] : memref<32x4xf32, #tpu.memory_space<vmem>>, vector<32x4xf32>
    tpu.vector_store %arg10[%c0_68, %c0_69], %184 {strides = array<i32>} : memref<32x4xf32, #tpu.memory_space<vmem>>, vector<32x4xf32>,
    return
  }
}

</mosaic_0001>

<bundles_post_ra>
// kernel: gat_forward.5
= control target key start
LH: loop header
LB: loop body
LE: loop exit
PB: predicated region body
PF: predicated region fallthrough
CT: control target
= control target key end

     0   :  { %vm37_vm0 = vcmask 64512   ;;  %v224_v8 = vlaneseq  ;;  %vm230_vm1 = vcmask 261120   ;;  %vm262_vm2 = vcmask 130112   ;;  %s1808_s2 = inlined_call_operand.vmem [shape: f32[8,32], index: 2, kind: input, shape index: {}]   ;;  %s1809_s3 = inlined_call_operand.vmem [shape: f32[8,32], index: 3, kind: input, shape index: {}]   ;;  %s1810_s0 = inlined_call_operand.vmem [shape: f32[16,8], index: 0, kind: input, shape index: {}]   ;;  %s1811_s1 = inlined_call_operand.vmem [shape: f32[32,8], index: 1, kind: input, shape index: {}]   ;;  %s1812_s4 = inlined_call_operand.vmem [shape: f32[8,32], index: 4, kind: input, shape index: {}]   ;;  %s1813_s7 = inlined_call_operand.vmem [shape: f32[16,32], index: 7, kind: input, shape index: {}]   ;;  %s1814_s8 = inlined_call_operand.vmem [shape: f32[32,16], index: 8, kind: input, shape index: {}]   ;;  %s1815_s5 = inlined_call_operand.vmem [shape: f32[16,16], index: 5, kind: input, shape index: {}]   ;;  %s1816_s6 = inlined_call_operand.vmem [shape: f32[32,32], index: 6, kind: input, shape index: {}]   ;;  %s1817_s9 = inlined_call_operand.vmem [shape: f32[16,64], index: 9, kind: output, shape index: {0}]   ;;  %s1818_s10 = inlined_call_operand.vmem [shape: f32[32,64], index: 10, kind: output, shape index: {1}]  }
   0x1   :  { %v36_v0 = vld [vmem:[%s1808_s2] sm:$0xff]  ;;  %v35_v3 = vld [vmem:[%s1810_s0 + $0x8] sm:$0xff]  ;;  %v121_v6 = vld [vmem:[%s1811_s1 + $0x10] sm:$0xff]  ;;  %vm457_vm3 = vcmask 195712   ;;  %vm464_vm4 = vcmask 261312   ;;  %vm289_vm9 = vcmask 130048  }
   0x2   :  { %v123_v1 = vld [vmem:[%s1809_s3] sm:$0xff]  ;;  %1213 = vmatprep.subr.mxu0 %v36_v0  ;;  %v120_v5 = vld [vmem:[%s1811_s1 + $0x8] sm:$0xff]  ;;  %v122_v7 = vld [vmem:[%s1811_s1 + $0x18] sm:$0xff]  ;;  %v1452_v9 = vshrl.u32 %v224_v8, 7 }
   0x3   :  { %v34_v2 = vld [vmem:[%s1810_s0] sm:$0xff]  ;;  %1218 = vmatprep.subr.mxu1 %v123_v1  ;;  %1214 = vmatpush3.msra.mxu0 %v36_v0 }
   0x4   :  { %v119_v4 = vld [vmem:[%s1811_s1] sm:$0xff]  ;;  %1215 = vmatprep.mubr.msk.f32.mxu0 %vm37_vm0, %v34_v2  ;;  %1219 = vmatpush3.msra.mxu1 %v123_v1  ;;  %v421_v10 = vsub.s32 3, %v1452_v9  ;;  %v409_v13 = vsub.s32 2, %v1452_v9  ;;  %v889_v24 = vsub.s32 7, %v1452_v9  ;;  %v869_v30 = vsub.s32 6, %v1452_v9 }
   0x5   :  { %1220 = vmatprep.mubr.msk.f32.mxu1 %vm37_vm0, %v119_v4  ;;  %1216 = vmatmul.mubr.msk.f32.vlgmr.msra.gmra.mrb[0].mxu0 %vm37_vm0, %v35_v3  ;;  %v1458_v11 = vld [vmem:[%s1812_s4] sm:$0xff]  ;;  %v239_v40 = vsub.s32 1, %v1452_v9  ;;  %v226_v46 = vsub.s32 0, %v1452_v9  ;;  %v626_v52 = vsub.s32 5, %v1452_v9  ;;  %v606_v62 = vsub.s32 4, %v1452_v9 }
   0x6   :  { %1221 = vmatmul.mubr.msk.f32.vlgmr.msra.gmra.mrb[0].mxu1 %vm37_vm0, %v120_v5  ;;  %v422_v12 = vrot.slane %v1458_v11, %v421_v10  ;;  %v410_v19 = vrot.slane %v1458_v11, %v409_v13  ;;  %v890_v34 = vrot.slane %v1458_v11, %v889_v24  ;;  %v870_v39 = vrot.slane %v1458_v11, %v869_v30 }
   0x7   :  { %1223 = vmatprep.mubr.msk.f32.mxu1 %vm37_vm0, %v121_v6  ;;  %v240_v45 = vrot.slane %v1458_v11, %v239_v40  ;;  %v227_v51 = vrot.slane %v1458_v11, %v226_v46  ;;  %v627_v57 = vrot.slane %v1458_v11, %v626_v52  ;;  %v607_v3 = vrot.slane %v1458_v11, %v606_v62  ;;  %v863_v62 = vld [vmem:[%s1814_s8] sm:$0xff] }
   0x8   :  { %vm921_vm10 = vcmp.gt.f32.partialorder %v863_v62, 0.0  ;;  %v600_v62 = vld [vmem:[%s1816_s6] sm:$0xff] }
   0xa   :  { %1224 = vmatmul.mubr.msk.f32.gmra.mrb[2].mxu1 %vm37_vm0, %v122_v7 }
  0xd8   :  { %v1462_v14 = vpop.f32.mrb[0].mxu0 }
  0xd9   :  { %v1464_v15 = vpop.f32.mrb[0].mxu1  ;;  %v1466_v16 = vpop.f32.mrb[1].mxu0  ;;  %v412_v37 = vmul.f32 %v1462_v14, %v410_v19  ;;  %v892_v43 = vmul.f32 %v1462_v14, %v890_v34  ;;  %v242_v60 = vmul.f32 %v1462_v14, %v240_v45  ;;  %v229_v1 = vmul.f32 %v1462_v14, %v227_v51 }
  0xda   :  { %v1468_v17 = vpop.f32.mrb[1].mxu1  ;;  %v424_v18 = vmul.f32 %v1464_v15, %v422_v12  ;;  %v1474_v20 = vpack.c.bf16 %v1462_v14, %v1466_v16  ;;  %v411_v28 = vmul.f32 %v410_v19, %v1466_v16  ;;  %v891_v38 = vmul.f32 %v890_v34, %v1466_v16 }
  0xdb   :  { %v1478_v21 = vpack.c.bf16 %v1464_v15, %v1468_v17  ;;  %v423_v23 = vmul.f32 %v422_v12, %v1468_v17  ;;  %v416_v41 = vsel %vm230_vm1, %v412_v37, 0.0  ;;  %v871_v44 = vmul.f32 %v870_v39, %v1468_v17 }
  0xdc   :  { %v430_v22 = vsel %vm230_vm1, %v424_v18, 0.0  ;;  %1269 = vmatprep.subr.bf16.mxu0 %v1474_v20  ;;  %v413_v35 = vsel %vm230_vm1, %v411_v28, 0.0  ;;  %v893_v42 = vsel %vm230_vm1, %v891_v38, 0.0  ;;  %v896_v47 = vsel %vm230_vm1, %v892_v43, 0.0  ;;  %v405_v43 = vld [vmem:[%s1813_s7] sm:$0xff] }
  0xdd   :  { %431 = vadd.xlane.f32.xlu0 %v430_v22  ;;  %v1483_v25 = vpop.f32.mrb[2].mxu1  ;;  %1273 = vmatprep.subr.bf16.mxu1 %v1478_v21  ;;  %v427_v31 = vsel %vm230_vm1, %v423_v23, 0.0  ;;  %v875_v48 = vsel %vm230_vm1, %v871_v44, 0.0  ;;  %v872_v49 = vmul.f32 %v1464_v15, %v870_v39  ;;  %v241_v56 = vmul.f32 %v240_v45, %v1466_v16 }
  0xde   :  { %v1487_v26 = vpop.f32.mrb[3].mxu1  ;;  %1271 = vmatpush3.bf16.msra.mxu0 %v1474_v20  ;;  %v426_v27 = vmul.f32 %v1483_v25, %v422_v12  ;;  %1275 = vmatpush3.bf16.msra.mxu1 %v1478_v21  ;;  %v874_v55 = vmul.f32 %v1483_v25, %v870_v39  ;;  %v228_v61 = vmul.f32 %v227_v51, %v1466_v16  ;;  %v246_v63 = vsel %vm230_vm1, %v242_v60, 0.0 }
  0xdf   :  { %1281 = vmatprep.subr.bf16.mxu0 %v1478_v21  ;;  %v1496_v29 = vpack.c.bf16 %v1483_v25, %v1487_v26  ;;  %v425_v33 = vmul.f32 %v422_v12, %v1487_v26  ;;  %v873_v50 = vmul.f32 %v870_v39, %v1487_v26  ;;  %v878_v53 = vsel %vm230_vm1, %v872_v49, 0.0 }
  0xe0   :  { %v436_v32 = vsel %vm230_vm1, %v426_v27, 0.0  ;;  %v884_v58 = vsel %vm230_vm1, %v874_v55, 0.0  ;;  %v243_v59 = vsel %vm230_vm1, %v241_v56, 0.0  ;;  %v231_v0 = vsel %vm230_vm1, %v228_v61, 0.0 }
  0xe1   :  { %428 = vadd.xlane.f32.xlu0 %v427_v31  ;;  %437 = vadd.xlane.f32.xlu1 %v436_v32  ;;  %v433_v36 = vsel %vm230_vm1, %v425_v33, 0.0  ;;  %v881_v54 = vsel %vm230_vm1, %v873_v50, 0.0  ;;  %v628_v2 = vmul.f32 %v627_v57, %v1468_v17  ;;  %v234_v4 = vsel %vm230_vm1, %v229_v1, 0.0 }
  0xe2   :  { %1277 = vmatprep.subr.bf16.mxu1 %v1496_v29  ;;  %v629_v6 = vmul.f32 %v1464_v15, %v627_v57  ;;  %v630_v7 = vmul.f32 %v627_v57, %v1487_v26  ;;  %v631_v13 = vmul.f32 %v1483_v25, %v627_v57  ;;  %v608_v14 = vmul.f32 %v607_v3, %v1468_v17 }
  0xe3   :  { %1279 = vmatpush3.bf16.msra.mxu1 %v1496_v29  ;;  %v632_v5 = vsel %vm230_vm1, %v628_v2, 0.0  ;;  %v609_v18 = vmul.f32 %v1464_v15, %v607_v3  ;;  %v610_v19 = vmul.f32 %v607_v3, %v1487_v26  ;;  %v611_v24 = vmul.f32 %v1483_v25, %v607_v3 }
  0xe4   :  { %1289 = vmatprep.subr.bf16.mxu1 %v1474_v20  ;;  %v635_v10 = vsel %vm230_vm1, %v629_v6, 0.0  ;;  %v638_v12 = vsel %vm230_vm1, %v630_v7, 0.0  ;;  %v641_v11 = vsel %vm230_vm1, %v631_v13, 0.0  ;;  %v612_v16 = vsel %vm230_vm1, %v608_v14, 0.0  ;;  %v866_v7 = vld [vmem:[%s1814_s8 + $0x18] sm:$0xff] }
  0xe5   :  { %434 = vadd.xlane.f32.xlu1 %v433_v36  ;;  %414 = vadd.xlane.f32.xlu0 %v413_v35  ;;  %v615_v22 = vsel %vm230_vm1, %v609_v18, 0.0  ;;  %v618_v23 = vsel %vm230_vm1, %v610_v19, 0.0  ;;  %v621_v17 = vsel %vm230_vm1, %v611_v24, 0.0  ;;  %v252_v27 = vand.u32 127, %v224_v8 }
  0xe6   :  { %vm475_vm6 = vcmp.gt.f32.partialorder %v405_v43, 0.0  ;;  %vm924_vm0 = vcmp.gt.f32.partialorder %v866_v7, 0.0 }
  0xe7   :  { %v257_v28 = vadd.s32 4294967288, %v252_v27  ;;  %v452_v15 = vadd.s32 4294967280, %v252_v27  ;;  %v1557_v26 = vsub.s32 %v252_v27, %v1452_v9  ;;  %v459_v31 = vadd.s32 4294967272, %v252_v27 }
  0xe9   :  { %417 = vadd.xlane.f32.xlu1 %v416_v41  ;;  %894 = vadd.xlane.f32.xlu0 %v893_v42  ;;  %v1560_v32 = vsub.s32 %v257_v28, %v1452_v9  ;;  %v1563_v25 = vsub.s32 %v452_v15, %v1452_v9  ;;  %v1567_v36 = vsub.s32 %v459_v31, %v1452_v9  ;;  %v406_v9 = vld [vmem:[%s1813_s7 + $0x8] sm:$0xff] }
  0xea   :  { %vm476_vm5 = vcmp.gt.f32.partialorder %v406_v9, 0.0  ;;  %v223_v9 = vld [vmem:[%s1815_s5 + $0x8] sm:$0xff] }
  0xed   :  { %897 = vadd.xlane.f32.xlu1 %v896_v47  ;;  %876 = vadd.xlane.f32.xlu0 %v875_v48 }
  0xf1   :  { %879 = vadd.xlane.f32.xlu1 %v878_v53  ;;  %882 = vadd.xlane.f32.xlu0 %v881_v54 }
  0xf5   :  { %885 = vadd.xlane.f32.xlu1 %v884_v58  ;;  %244 = vadd.xlane.f32.xlu0 %v243_v59 }
  0xf9   :  { %247 = vadd.xlane.f32.xlu1 %v246_v63  ;;  %232 = vadd.xlane.f32.xlu0 %v231_v0  ;;  %v864_v63 = vld [vmem:[%s1814_s8 + $0x8] sm:$0xff] }
  0xfa   :  { %vm922_vm12 = vcmp.gt.f32.partialorder %v864_v63, 0.0  ;;  %v601_v63 = vld [vmem:[%s1816_s6 + $0x8] sm:$0xff] }
  0xfd   :  { %235 = vadd.xlane.f32.xlu1 %v234_v4  ;;  %633 = vadd.xlane.f32.xlu0 %v632_v5  ;;  %v865_v5 = vld [vmem:[%s1814_s8 + $0x10] sm:$0xff] }
  0xfe   :  { %vm923_vm15 = vcmp.gt.f32.partialorder %v865_v5, 0.0 }
 0x101   :  { %636 = vadd.xlane.f32.xlu1 %v635_v10  ;;  %639 = vadd.xlane.f32.xlu0 %v638_v12 }
 0x105   :  { %642 = vadd.xlane.f32.xlu1 %v641_v11  ;;  %613 = vadd.xlane.f32.xlu0 %v612_v16 }
 0x109   :  { %616 = vadd.xlane.f32.xlu1 %v615_v22  ;;  %619 = vadd.xlane.f32.xlu0 %v618_v23 }
 0x10d   :  { %622 = vadd.xlane.f32.xlu1 %v621_v17 }
 0x16a   :  { %v432_v30 = vpop.xlane.xlu0 %431 }
 0x16b   :  { %v450_v8 = vrot.slane %v432_v30, %v1560_v32 }
 0x16e   :  { %v429_v33 = vpop.xlane.xlu0 %428  ;;  %v438_v34 = vpop.xlane.xlu1 %437 }
 0x16f   :  { %v446_v35 = vrot.slane %v429_v33, %v1557_v26  ;;  %v463_v41 = vrot.slane %v438_v34, %v1567_v36 }
 0x171   :  { %v451_v40 = vsel %vm262_vm2, %v450_v8, %v446_v35 }
 0x172   :  { %v435_v37 = vpop.xlane.xlu1 %434  ;;  %v415_v38 = vpop.xlane.xlu0 %414 }
 0x173   :  { %v456_v39 = vrot.slane %v435_v37, %v1563_v25 }
 0x175   :  { %v458_v42 = vsel %vm457_vm3, %v456_v39, %v451_v40  ;;  %v222_v39 = vld [vmem:[%s1815_s5] sm:$0xff] }
 0x176   :  { %v465_v44 = vsel %vm464_vm4, %v463_v41, %v458_v42  ;;  %v418_v45 = vpop.xlane.xlu1 %417  ;;  %v895_v46 = vpop.xlane.xlu0 %894 }
 0x177   :  { %v473_v47 = vadd.f32 %v465_v44, %v415_v38  ;;  %v474_v48 = vadd.f32 %v465_v44, %v418_v45  ;;  %v904_v53 = vrot.slane %v895_v46, %v1557_v26 }
 0x179   :  { %v479_v49 = vmul.f32 0.2, %v473_v47  ;;  %v480_v50 = vmul.f32 0.2, %v474_v48  ;;  %vm478_vm7 = vcmp.gt.f32.partialorder %v474_v48, 0.0  ;;  %vm477_vm8 = vcmp.gt.f32.partialorder %v473_v47, 0.0 }
 0x17a   :  { %v898_v51 = vpop.xlane.xlu1 %897  ;;  %v877_v52 = vpop.xlane.xlu0 %876 }
 0x17b   :  { %v908_v54 = vrot.slane %v898_v51, %v1560_v32  ;;  %v482_v55 = vsel %vm478_vm7, %v474_v48, %v480_v50  ;;  %v481_v56 = vsel %vm477_vm8, %v473_v47, %v479_v49  ;;  %vm280_vm8 = vcmp.gt.f32.partialorder %v223_v9, 0.0 }
 0x17c   :  { %v1583_v57 = vsel %vm476_vm5, %v482_v55, -9e+15  ;;  %v1585_v58 = vsel %vm475_vm6, %v481_v56, -9e+15  ;;  %vm279_vm6 = vcmp.gt.f32.partialorder %v222_v39, 0.0 }
 0x17d   :  { %v909_v59 = vsel %vm262_vm2, %v908_v54, %v904_v53  ;;  %v488_v60 = vsel %vm230_vm1, %v1583_v57, -inf  ;;  %v485_v61 = vsel %vm230_vm1, %v1585_v58, -inf }
 0x17e   :  { %v917_v0 = vadd.f32 %v909_v59, %v877_v52  ;;  %v880_v1 = vpop.xlane.xlu1 %879  ;;  %489 = vmax.xlane.f32.xlu1 %v488_v60  ;;  %v883_v2 = vpop.xlane.xlu0 %882  ;;  %486 = vmax.xlane.f32.xlu0 %v485_v61 }
 0x17f   :  { %v918_v3 = vadd.f32 %v909_v59, %v880_v1  ;;  %v919_v4 = vadd.f32 %v909_v59, %v883_v2 }
 0x180   :  { %v929_v6 = vmul.f32 0.2, %v917_v0  ;;  %vm925_vm11 = vcmp.gt.f32.partialorder %v917_v0, 0.0 }
 0x181   :  { %v930_v10 = vmul.f32 0.2, %v918_v3  ;;  %v931_v12 = vmul.f32 0.2, %v919_v4  ;;  %vm926_vm13 = vcmp.gt.f32.partialorder %v918_v3, 0.0  ;;  %vm927_vm14 = vcmp.gt.f32.partialorder %v919_v4, 0.0 }
 0x182   :  { %v886_v13 = vpop.xlane.xlu1 %885  ;;  %v245_v14 = vpop.xlane.xlu0 %244  ;;  %v933_v11 = vsel %vm925_vm11, %v917_v0, %v929_v6  ;;  %v603_v6 = vld [vmem:[%s1816_s6 + $0x18] sm:$0xff] }
 0x183   :  { %v920_v16 = vadd.f32 %v909_v59, %v886_v13  ;;  %v1604_v18 = vsel %vm921_vm10, %v933_v11, -9e+15  ;;  %v934_v19 = vsel %vm926_vm13, %v918_v3, %v930_v10  ;;  %v935_v24 = vsel %vm927_vm14, %v919_v4, %v931_v12 }
 0x184   :  { %v941_v22 = vsel %vm289_vm9, %v1604_v18, -inf  ;;  %v1608_v23 = vsel %vm922_vm12, %v934_v19, -9e+15  ;;  %v1612_v28 = vsel %vm923_vm15, %v935_v24, -9e+15  ;;  %v256_v31 = vrot.slane %v245_v14, %v1557_v26 }
 0x185   :  { %v932_v17 = vmul.f32 0.2, %v920_v16  ;;  %942 = vmax.xlane.f32.xlu0 %v941_v22  ;;  %v944_v27 = vsel %vm289_vm9, %v1608_v23, -inf  ;;  %vm928_vm5 = vcmp.gt.f32.partialorder %v920_v16, 0.0  ;;  %v947_v35 = vsel %vm289_vm9, %v1612_v28, -inf }
 0x186   :  { %v248_v30 = vpop.xlane.xlu1 %247  ;;  %945 = vmax.xlane.f32.xlu1 %v944_v27  ;;  %v233_v15 = vpop.xlane.xlu0 %232  ;;  %vm681_vm14 = vcmp.gt.f32.partialorder %v603_v6, 0.0 }
 0x187   :  { %v261_v33 = vrot.slane %v248_v30, %v1560_v32  ;;  %v936_v34 = vsel %vm928_vm5, %v920_v16, %v932_v17 }
 0x188   :  { %v1618_v8 = vsel %vm924_vm0, %v936_v34, -9e+15 }
 0x189   :  { %v263_v37 = vsel %vm262_vm2, %v261_v33, %v256_v31  ;;  %948 = vmax.xlane.f32.xlu0 %v947_v35  ;;  %v950_v38 = vsel %vm289_vm9, %v1618_v8, -inf }
 0x18a   :  { %v277_v40 = vadd.f32 %v263_v37, %v233_v15  ;;  %v236_v41 = vpop.xlane.xlu1 %235  ;;  %951 = vmax.xlane.f32.xlu1 %v950_v38  ;;  %v634_v42 = vpop.xlane.xlu0 %633 }
 0x18b   :  { %v278_v43 = vadd.f32 %v263_v37, %v236_v41  ;;  %v651_v49 = vrot.slane %v634_v42, %v1557_v26 }
 0x18c   :  { %v283_v44 = vmul.f32 0.2, %v277_v40  ;;  %vm281_vm7 = vcmp.gt.f32.partialorder %v277_v40, 0.0 }
 0x18d   :  { %v284_v45 = vmul.f32 0.2, %v278_v43  ;;  %vm282_vm10 = vcmp.gt.f32.partialorder %v278_v43, 0.0 }
 0x18e   :  { %v637_v46 = vpop.xlane.xlu1 %636  ;;  %v640_v47 = vpop.xlane.xlu0 %639  ;;  %v285_v48 = vsel %vm281_vm7, %v277_v40, %v283_v44 }
 0x18f   :  { %v655_v50 = vrot.slane %v637_v46, %v1560_v32  ;;  %v1631_v51 = vsel %vm279_vm6, %v285_v48, -9e+15  ;;  %v286_v52 = vsel %vm282_vm10, %v278_v43, %v284_v45  ;;  %v660_v53 = vrot.slane %v640_v47, %v1563_v25 }
 0x190   :  { %v290_v54 = vsel %vm289_vm9, %v1631_v51, -inf  ;;  %v1636_v55 = vsel %vm280_vm8, %v286_v52, -9e+15 }
 0x191   :  { %v656_v56 = vsel %vm262_vm2, %v655_v50, %v651_v49  ;;  %291 = vmax.xlane.f32.xlu0 %v290_v54  ;;  %v293_v59 = vsel %vm289_vm9, %v1636_v55, -inf  ;;  %vm678_vm2 = vcmp.gt.f32.partialorder %v600_v62, 0.0 }
 0x192   :  { %v643_v60 = vpop.xlane.xlu1 %642  ;;  %294 = vmax.xlane.f32.xlu1 %v293_v59  ;;  %v614_v26 = vpop.xlane.xlu0 %613  ;;  %v661_v61 = vsel %vm457_vm3, %v660_v53, %v656_v56 }
 0x193   :  { %v665_v32 = vrot.slane %v643_v60, %v1567_v36  ;;  %v602_v36 = vld [vmem:[%s1816_s6 + $0x10] sm:$0xff]  ;;  %s1365_s6 = smov 32  }
 0x194   :  { %vm680_vm13 = vcmp.gt.f32.partialorder %v602_v36, 0.0 }
 0x195   :  { %v666_v25 = vsel %vm464_vm4, %v665_v32, %v661_v61  ;;  %vm679_vm4 = vcmp.gt.f32.partialorder %v601_v63, 0.0 }
 0x196   :  { %v674_v0 = vadd.f32 %v666_v25, %v614_v26  ;;  %v617_v1 = vpop.xlane.xlu1 %616  ;;  %v620_v2 = vpop.xlane.xlu0 %619 }
 0x197   :  { %v675_v3 = vadd.f32 %v666_v25, %v617_v1  ;;  %v676_v4 = vadd.f32 %v666_v25, %v620_v2 }
 0x198   :  { %v686_v5 = vmul.f32 0.2, %v674_v0  ;;  %vm682_vm3 = vcmp.gt.f32.partialorder %v674_v0, 0.0 }
 0x199   :  { %v687_v7 = vmul.f32 0.2, %v675_v3  ;;  %v688_v10 = vmul.f32 0.2, %v676_v4  ;;  %vm683_vm11 = vcmp.gt.f32.partialorder %v675_v3, 0.0  ;;  %vm684_vm12 = vcmp.gt.f32.partialorder %v676_v4, 0.0 }
 0x19a   :  { %v623_v12 = vpop.xlane.xlu1 %622  ;;  %v690_v13 = vsel %vm682_vm3, %v674_v0, %v686_v5 }
 0x19b   :  { %v677_v14 = vadd.f32 %v666_v25, %v623_v12  ;;  %v1656_v11 = vsel %vm678_vm2, %v690_v13, -9e+15  ;;  %v691_v16 = vsel %vm683_vm11, %v675_v3, %v687_v7  ;;  %v692_v19 = vsel %vm684_vm12, %v676_v4, %v688_v10 }
 0x19c   :  { %v698_v22 = vsel %vm230_vm1, %v1656_v11, -inf  ;;  %v1660_v24 = vsel %vm679_vm4, %v691_v16, -9e+15  ;;  %v1664_v30 = vsel %vm680_vm13, %v692_v19, -9e+15  ;;  %vm1116_vm13 = vcmask 523520  }
 0x19d   :  { %v689_v17 = vmul.f32 0.2, %v677_v14  ;;  %699 = vmax.xlane.f32.xlu0 %v698_v22  ;;  %v701_v27 = vsel %vm230_vm1, %v1660_v24, -inf  ;;  %vm685_vm15 = vcmp.gt.f32.partialorder %v677_v14, 0.0  ;;  %v704_v31 = vsel %vm230_vm1, %v1664_v30, -inf }
 0x19e   :  { %702 = vmax.xlane.f32.xlu1 %v701_v27 }
 0x19f   :  { %v693_v15 = vsel %vm685_vm15, %v677_v14, %v689_v17 }
 0x1a0   :  { %v1668_v33 = vsel %vm681_vm14, %v693_v15, -9e+15 }
 0x1a1   :  { %705 = vmax.xlane.f32.xlu0 %v704_v31  ;;  %v707_v34 = vsel %vm230_vm1, %v1668_v33, -inf }
 0x1a2   :  { %708 = vmax.xlane.f32.xlu1 %v707_v34 }
 0x20b   :  { %v490_v35 = vpop.xlane.xlu1 %489  ;;  %v487_v37 = vpop.xlane.xlu0 %486 }
 0x20c   :  { %v492_v38 = vsub.f32 %v1583_v57, %v490_v35  ;;  %v491_v39 = vsub.f32 %v1585_v58, %v487_v37 }
 0x20e   :  { %v495_v40 = vmul.f32 1.442695, %v492_v38  ;;  %v493_v41 = vmul.f32 1.442695, %v491_v39 }
 0x210   :  { %1293 = vpow2.f32 %v495_v40 }
 0x211   :  { %1295 = vpow2.f32 %v493_v41 }
 0x212   :  { %v943_v42 = vpop.xlane.xlu0 %942 }
 0x213   :  { %v953_v9 = vsub.f32 %v1604_v18, %v943_v42  ;;  %v946_v43 = vpop.xlane.xlu1 %945 }
 0x214   :  { %v954_v44 = vsub.f32 %v1608_v23, %v946_v43 }
 0x215   :  { %v957_v45 = vmul.f32 1.442695, %v953_v9 }
 0x216   :  { %v959_v46 = vmul.f32 1.442695, %v954_v44  ;;  %v949_v47 = vpop.xlane.xlu0 %948 }
 0x217   :  { %1297 = vpow2.f32 %v957_v45  ;;  %v955_v48 = vsub.f32 %v1612_v28, %v949_v47  ;;  %v952_v49 = vpop.xlane.xlu1 %951 }
 0x218   :  { %1299 = vpow2.f32 %v959_v46  ;;  %v956_v57 = vsub.f32 %v1618_v8, %v952_v49 }
 0x219   :  { %v961_v58 = vmul.f32 1.442695, %v955_v48 }
 0x21a   :  { %v1678_v50 = vpop.eup %1293  ;;  %v963_v52 = vmul.f32 1.442695, %v956_v57 }
 0x21b   :  { %v1680_v53 = vpop.eup %1295  ;;  %1301 = vpow2.f32 %v961_v58  ;;  %v500_v18 = vsel %vm230_vm1, %v1678_v50, 0.0 }
 0x21c   :  { %1303 = vpow2.f32 %v963_v52  ;;  %501 = vadd.xlane.f32.xlu1 %v500_v18  ;;  %v497_v23 = vsel %vm230_vm1, %v1680_v53, 0.0 }
 0x21d   :  { %498 = vadd.xlane.f32.xlu0 %v497_v23 }
 0x21e   :  { %v292_v28 = vpop.xlane.xlu0 %291 }
 0x21f   :  { %v296_v54 = vsub.f32 %v1631_v51, %v292_v28  ;;  %v295_v8 = vpop.xlane.xlu1 %294 }
 0x220   :  { %v297_v56 = vsub.f32 %v1636_v55, %v295_v8 }
 0x221   :  { %v1688_v59 = vpop.eup %1297  ;;  %v298_v60 = vmul.f32 1.442695, %v296_v54 }
 0x222   :  { %v1690_v26 = vpop.eup %1299  ;;  %v300_v32 = vmul.f32 1.442695, %v297_v56  ;;  %v965_v61 = vsel %vm289_vm9, %v1688_v59, 0.0 }
 0x223   :  { %1305 = vpow2.f32 %v298_v60  ;;  %966 = vadd.xlane.f32.xlu0 %v965_v61  ;;  %v968_v25 = vsel %vm289_vm9, %v1690_v26, 0.0 }
 0x224   :  { %1307 = vpow2.f32 %v300_v32  ;;  %969 = vadd.xlane.f32.xlu1 %v968_v25 }
 0x225   :  { %v1696_v51 = vpop.eup %1301 }
 0x226   :  { %v1698_v62 = vpop.eup %1303  ;;  %v971_v55 = vsel %vm289_vm9, %v1696_v51, 0.0 }
 0x227   :  { %972 = vadd.xlane.f32.xlu0 %v971_v55  ;;  %v974_v63 = vsel %vm289_vm9, %v1698_v62, 0.0 }
 0x228   :  { %975 = vadd.xlane.f32.xlu1 %v974_v63 }
 0x22a   :  { %v700_v0 = vpop.xlane.xlu0 %699 }
 0x22b   :  { %v710_v1 = vsub.f32 %v1656_v11, %v700_v0  ;;  %v703_v2 = vpop.xlane.xlu1 %702 }
 0x22c   :  { %v711_v3 = vsub.f32 %v1660_v24, %v703_v2 }
 0x22d   :  { %v1706_v4 = vpop.eup %1305  ;;  %v714_v36 = vmul.f32 1.442695, %v710_v1 }
 0x22e   :  { %v1708_v5 = vpop.eup %1307  ;;  %v716_v6 = vmul.f32 1.442695, %v711_v3  ;;  %v706_v7 = vpop.xlane.xlu0 %705  ;;  %v302_v10 = vsel %vm289_vm9, %v1706_v4, 0.0 }
 0x22f   :  { %1309 = vpow2.f32 %v714_v36  ;;  %v712_v12 = vsub.f32 %v1664_v30, %v706_v7  ;;  %v709_v13 = vpop.xlane.xlu1 %708  ;;  %303 = vadd.xlane.f32.xlu0 %v302_v10  ;;  %v305_v14 = vsel %vm289_vm9, %v1708_v5, 0.0 }
 0x230   :  { %1311 = vpow2.f32 %v716_v6  ;;  %v713_v11 = vsub.f32 %v1668_v33, %v709_v13  ;;  %306 = vadd.xlane.f32.xlu1 %v305_v14 }
 0x231   :  { %v718_v16 = vmul.f32 1.442695, %v712_v12 }
 0x232   :  { %v720_v19 = vmul.f32 1.442695, %v713_v11 }
 0x233   :  { %1313 = vpow2.f32 %v718_v16 }
 0x234   :  { %1315 = vpow2.f32 %v720_v19 }
 0x239   :  { %v1716_v22 = vpop.eup %1309 }
 0x23a   :  { %v1718_v24 = vpop.eup %1311  ;;  %v722_v17 = vsel %vm230_vm1, %v1716_v22, 0.0 }
 0x23b   :  { %723 = vadd.xlane.f32.xlu0 %v722_v17  ;;  %v725_v27 = vsel %vm230_vm1, %v1718_v24, 0.0 }
 0x23c   :  { %726 = vadd.xlane.f32.xlu1 %v725_v27 }
 0x23d   :  { %v1724_v30 = vpop.eup %1313 }
 0x23e   :  { %v1726_v15 = vpop.eup %1315  ;;  %v728_v31 = vsel %vm230_vm1, %v1724_v30, 0.0 }
 0x23f   :  { %729 = vadd.xlane.f32.xlu0 %v728_v31  ;;  %v731_v33 = vsel %vm230_vm1, %v1726_v15, 0.0 }
 0x240   :  { %732 = vadd.xlane.f32.xlu1 %v731_v33 }
 0x2a9   :  { %v502_v34 = vpop.xlane.xlu1 %501 }
 0x2aa   :  { %1317 = vrcp.f32 %v502_v34  ;;  %v499_v35 = vpop.xlane.xlu0 %498 }
 0x2ab   :  { %1319 = vrcp.f32 %v499_v35 }
 0x2b0   :  { %v967_v37 = vpop.xlane.xlu0 %966 }
 0x2b1   :  { %1321 = vrcp.f32 %v967_v37  ;;  %v970_v38 = vpop.xlane.xlu1 %969 }
 0x2b2   :  { %1323 = vrcp.f32 %v970_v38 }
 0x2b4   :  { %v1318_v39 = vpop.eup %1317  ;;  %v973_v40 = vpop.xlane.xlu0 %972 }
 0x2b5   :  { %v1320_v41 = vpop.eup %1319  ;;  %v506_v42 = vmul.f32 %v1318_v39, %v1678_v50  ;;  %1325 = vrcp.f32 %v973_v40  ;;  %v976_v9 = vpop.xlane.xlu1 %975 }
 0x2b6   :  { %1327 = vrcp.f32 %v976_v9  ;;  %v505_v43 = vmul.f32 %v1320_v41, %v1680_v53 }
 0x2b8   :  { %1241 = vmatprep.mubr.msk.f32.mxu1 %vm230_vm1, %v505_v43 }
 0x2b9   :  { %1242 = vmatmul.mubr.msk.f32.vlgmr.msra.gmra.mrb[4].mxu1 %vm230_vm1, %v506_v42 }
 0x2ba   :  { %1291 = vmatpush3.bf16.msra.mxu1 %v1474_v20 }
 0x2bb   :  { %v1322_v44 = vpop.eup %1321 }
 0x2bc   :  { %v1324_v45 = vpop.eup %1323  ;;  %v304_v46 = vpop.xlane.xlu0 %303  ;;  %v981_v47 = vmul.f32 %v1322_v44, %v1688_v59 }
 0x2bd   :  { %v982_v48 = vmul.f32 %v1324_v45, %v1690_v26  ;;  %1329 = vrcp.f32 %v304_v46  ;;  %v307_v49 = vpop.xlane.xlu1 %306 }
 0x2be   :  { %1331 = vrcp.f32 %v307_v49  ;;  %1262 = vmatprep.mubr.msk.f32.mxu1 %vm289_vm9, %v981_v47 }
 0x2bf   :  { %v1326_v57 = vpop.eup %1325  ;;  %1263 = vmatmul.mubr.msk.f32.vlgmr.msra.gmra.mrb[6].mxu1 %vm289_vm9, %v982_v48 }
 0x2c0   :  { %v1328_v58 = vpop.eup %1327  ;;  %v983_v50 = vmul.f32 %v1326_v57, %v1696_v51 }
 0x2c1   :  { %v984_v20 = vmul.f32 %v1328_v58, %v1698_v62 }
 0x2c2   :  { %1265 = vmatprep.mubr.msk.f32.mxu1 %vm289_vm9, %v983_v50 }
 0x2c3   :  { %1266 = vmatmul.mubr.msk.f32.gmra.mrb[8].mxu1 %vm289_vm9, %v984_v20 }
 0x2c7   :  { %v1330_v52 = vpop.eup %1329 }
 0x2c8   :  { %v1332_v53 = vpop.eup %1331  ;;  %v724_v18 = vpop.xlane.xlu0 %723  ;;  %v310_v23 = vmul.f32 %v1330_v52, %v1706_v4 }
 0x2c9   :  { %v311_v28 = vmul.f32 %v1332_v53, %v1708_v5  ;;  %1333 = vrcp.f32 %v724_v18  ;;  %v727_v54 = vpop.xlane.xlu1 %726 }
 0x2ca   :  { %1335 = vrcp.f32 %v727_v54  ;;  %1230 = vmatprep.mubr.msk.f32.mxu0 %vm289_vm9, %v310_v23 }
 0x2cb   :  { %1231 = vmatmul.mubr.msk.f32.vlgmr.msra.gmra.mrb[2].mxu0 %vm289_vm9, %v311_v28 }
 0x2cc   :  { %1283 = vmatpush3.bf16.msra.mxu0 %v1478_v21  ;;  %v730_v8 = vpop.xlane.xlu0 %729 }
 0x2cd   :  { %1285 = vmatprep.subr.bf16.mxu0 %v1496_v29  ;;  %1337 = vrcp.f32 %v730_v8  ;;  %v733_v56 = vpop.xlane.xlu1 %732 }
 0x2ce   :  { %1339 = vrcp.f32 %v733_v56 }
 0x2d0   :  { %1287 = vmatpush3.bf16.msra.mxu0 %v1496_v29 }
 0x2d3   :  { %v1334_v59 = vpop.eup %1333 }
 0x2d4   :  { %v1336_v60 = vpop.eup %1335  ;;  %v738_v26 = vmul.f32 %v1334_v59, %v1716_v22 }
 0x2d5   :  { %v739_v32 = vmul.f32 %v1336_v60, %v1718_v24 }
 0x2d6   :  { %1252 = vmatprep.mubr.msk.f32.mxu0 %vm230_vm1, %v738_v26 }
 0x2d7   :  { %v1338_v61 = vpop.eup %1337  ;;  %1253 = vmatmul.mubr.msk.f32.vlgmr.msra.gmra.mrb[4].mxu0 %vm230_vm1, %v739_v32 }
 0x2d8   :  { %v1340_v21 = vpop.eup %1339  ;;  %v740_v25 = vmul.f32 %v1338_v61, %v1724_v30 }
 0x2d9   :  { %v741_v51 = vmul.f32 %v1340_v21, %v1726_v15 }
 0x2da   :  { %1255 = vmatprep.mubr.msk.f32.mxu0 %vm230_vm1, %v740_v25 }
 0x2db   :  { %1256 = vmatmul.mubr.msk.f32.gmra.mrb[6].mxu0 %vm230_vm1, %v741_v51 }
 0x38c   :  { %v1243_v29 = vpop.f32.mrb[4].mxu1 }
 0x38d   :  { %v591_v62 = vmin.f32 %v1243_v29, 0.0  ;;  %v579_v55 = vpop.f32.mrb[5].mxu1  ;;  %vm589_vm9 = vcmp.gt.f32.partialorder %v1243_v29, 0.0 }
 0x38e   :  { %v590_v63 = vmin.f32 %v579_v55, 0.0  ;;  %vm588_vm0 = vcmp.gt.f32.partialorder %v579_v55, 0.0 }
 0x38f   :  { %v594_v0 = vmul.f32 1.442695, %v591_v62 }
 0x390   :  { %v592_v1 = vmul.f32 1.442695, %v590_v63 }
 0x391   :  { %1341 = vpow2.f32 %v594_v0 }
 0x392   :  { %1343 = vpow2.f32 %v592_v1  ;;  %v1264_v2 = vpop.f32.mrb[6].mxu1 }
 0x393   :  { %v1087_v3 = vmin.f32 %v1264_v2, 0.0  ;;  %v1063_v4 = vpop.f32.mrb[7].mxu1  ;;  %vm1083_vm5 = vcmp.gt.f32.partialorder %v1264_v2, 0.0 }
 0x394   :  { %v1086_v36 = vmin.f32 %v1063_v4, 0.0  ;;  %vm1082_vm6 = vcmp.gt.f32.partialorder %v1063_v4, 0.0 }
 0x395   :  { %v1092_v5 = vmul.f32 1.442695, %v1087_v3 }
 0x396   :  { %v1090_v6 = vmul.f32 1.442695, %v1086_v36  ;;  %v1267_v7 = vpop.f32.mrb[8].mxu1 }
 0x397   :  { %1345 = vpow2.f32 %v1092_v5  ;;  %v1089_v10 = vmin.f32 %v1267_v7, 0.0  ;;  %v1073_v12 = vpop.f32.mrb[9].mxu1  ;;  %vm1085_vm8 = vcmp.gt.f32.partialorder %v1267_v7, 0.0 }
 0x398   :  { %1347 = vpow2.f32 %v1090_v6  ;;  %v1088_v13 = vmin.f32 %v1073_v12, 0.0  ;;  %vm1084_vm7 = vcmp.gt.f32.partialorder %v1073_v12, 0.0 }
 0x399   :  { %v1096_v14 = vmul.f32 1.442695, %v1089_v10 }
 0x39a   :  { %v1094_v11 = vmul.f32 1.442695, %v1088_v13 }
 0x39b   :  { %v1342_v16 = vpop.eup %1341  ;;  %1349 = vpow2.f32 %v1096_v14 }
 0x39c   :  { %v1344_v19 = vpop.eup %1343  ;;  %1351 = vpow2.f32 %v1094_v11  ;;  %v1164_v22 = vadd.f32 -1.0, %v1342_v16 }
 0x39d   :  { %v1163_v24 = vadd.f32 -1.0, %v1344_v19 }
 0x39e   :  { %v599_v17 = vsel %vm589_vm9, %v1243_v29, %v1164_v22  ;;  %v1232_v27 = vpop.f32.mrb[2].mxu0 }
 0x39f   :  { %1112 = vrot.lane.b32.xlu1 %v599_v17, %s1365_s6  ;;  %v396_v30 = vmin.f32 %v1232_v27, 0.0  ;;  %v598_v15 = vsel %vm588_vm0, %v579_v55, %v1163_v24  ;;  %v384_v31 = vpop.f32.mrb[3].mxu0  ;;  %vm394_vm10 = vcmp.gt.f32.partialorder %v1232_v27, 0.0 }
 0x3a0   :  { %1110 = vrot.lane.b32.xlu0 %v598_v15, %s1365_s6  ;;  %v395_v33 = vmin.f32 %v384_v31, 0.0  ;;  %vm393_vm2 = vcmp.gt.f32.partialorder %v384_v31, 0.0 }
 0x3a1   :  { %v1346_v34 = vpop.eup %1345  ;;  %v399_v35 = vmul.f32 1.442695, %v396_v30 }
 0x3a2   :  { %v1348_v37 = vpop.eup %1347  ;;  %v397_v38 = vmul.f32 1.442695, %v395_v33  ;;  %v1178_v39 = vadd.f32 -1.0, %v1346_v34 }
 0x3a3   :  { %1353 = vpow2.f32 %v399_v35  ;;  %v1177_v41 = vadd.f32 -1.0, %v1348_v37 }
 0x3a4   :  { %1355 = vpow2.f32 %v397_v38  ;;  %v1103_v40 = vsel %vm1083_vm5, %v1264_v2, %v1178_v39 }
 0x3a5   :  { %v1350_v42 = vpop.eup %1349  ;;  %1129 = vrot.lane.b32.xlu1 %v1103_v40, %s1365_s6  ;;  %v1102_v44 = vsel %vm1082_vm6, %v1063_v4, %v1177_v41 }
 0x3a6   :  { %v1352_v9 = vpop.eup %1351  ;;  %v1180_v45 = vadd.f32 -1.0, %v1350_v42 }
 0x3a7   :  { %v1179_v43 = vadd.f32 -1.0, %v1352_v9 }
 0x3a8   :  { %v1105_v58 = vsel %vm1085_vm8, %v1267_v7, %v1180_v45 }
 0x3a9   :  { %1127 = vrot.lane.b32.xlu1 %v1102_v44, %s1365_s6  ;;  %v1104_v46 = vsel %vm1084_vm7, %v1073_v12, %v1179_v43 }
 0x3aa   :  { %1131 = vrot.lane.b32.xlu0 %v1104_v46, %s1365_s6  ;;  %v1254_v47 = vpop.f32.mrb[4].mxu0 }
 0x3ab   :  { %v844_v48 = vmin.f32 %v1254_v47, 0.0  ;;  %v820_v49 = vpop.f32.mrb[5].mxu0  ;;  %vm840_vm3 = vcmp.gt.f32.partialorder %v1254_v47, 0.0 }
 0x3ac   :  { %v843_v57 = vmin.f32 %v820_v49, 0.0  ;;  %vm839_vm4 = vcmp.gt.f32.partialorder %v820_v49, 0.0 }
 0x3ad   :  { %v1354_v50 = vpop.eup %1353  ;;  %v849_v20 = vmul.f32 1.442695, %v844_v48  ;;  %1133 = vrot.lane.b32.xlu1 %v1105_v58, %s1365_s6 }
 0x3ae   :  { %v1356_v52 = vpop.eup %1355  ;;  %v1160_v53 = vadd.f32 -1.0, %v1354_v50  ;;  %v847_v18 = vmul.f32 1.442695, %v843_v57  ;;  %v1257_v23 = vpop.f32.mrb[6].mxu0 }
 0x3af   :  { %v1159_v28 = vadd.f32 -1.0, %v1356_v52  ;;  %1357 = vpow2.f32 %v849_v20  ;;  %v846_v54 = vmin.f32 %v1257_v23, 0.0  ;;  %v830_v8 = vpop.f32.mrb[7].mxu0  ;;  %vm842_vm11 = vcmp.gt.f32.partialorder %v1257_v23, 0.0 }
 0x3b0   :  { %v404_v56 = vsel %vm394_vm10, %v1232_v27, %v1160_v53  ;;  %1359 = vpow2.f32 %v847_v18  ;;  %v845_v59 = vmin.f32 %v830_v8, 0.0  ;;  %vm841_vm12 = vcmp.gt.f32.partialorder %v830_v8, 0.0 }
 0x3b1   :  { %1107 = vst.msk [vmem:[%s1817_s9 + $0x8] sm:$0xff] %vm230_vm1, %v404_v56  ;;  %v403_v60 = vsel %vm393_vm2, %v384_v31, %v1159_v28  ;;  %v853_v26 = vmul.f32 1.442695, %v846_v54 }
 0x3b2   :  { %1106 = vst.msk [vmem:[%s1817_s9] sm:$0xff] %vm230_vm1, %v403_v60  ;;  %v851_v32 = vmul.f32 1.442695, %v845_v59 }
 0x3b3   :  { %1361 = vpow2.f32 %v853_v26 }
 0x3b4   :  { %1363 = vpow2.f32 %v851_v32 }
 0x3b9   :  { %v1358_v61 = vpop.eup %1357 }
 0x3ba   :  { %v1360_v21 = vpop.eup %1359  ;;  %v1170_v25 = vadd.f32 -1.0, %v1358_v61 }
 0x3bb   :  { %v1169_v51 = vadd.f32 -1.0, %v1360_v21 }
 0x3bc   :  { %v860_v29 = vsel %vm840_vm3, %v1254_v47, %v1170_v25 }
 0x3bd   :  { %v1362_v62 = vpop.eup %1361  ;;  %1120 = vst.msk [vmem:[%s1818_s10 + $0x8] sm:$0xff] %vm230_vm1, %v860_v29  ;;  %v859_v55 = vsel %vm839_vm4, %v820_v49, %v1169_v51 }
 0x3be   :  { %v1364_v63 = vpop.eup %1363  ;;  %1119 = vst.msk [vmem:[%s1818_s10] sm:$0xff] %vm230_vm1, %v859_v55  ;;  %v1172_v0 = vadd.f32 -1.0, %v1362_v62 }
 0x3bf   :  { %v1171_v1 = vadd.f32 -1.0, %v1364_v63 }
 0x3c0   :  { %v862_v2 = vsel %vm842_vm11, %v1257_v23, %v1172_v0 }
 0x3c1   :  { %1122 = vst.msk [vmem:[%s1818_s10 + $0x18] sm:$0xff] %vm230_vm1, %v862_v2  ;;  %v861_v3 = vsel %vm841_vm12, %v830_v8, %v1171_v1 }
 0x3c2   :  { %1121 = vst.msk [vmem:[%s1818_s10 + $0x10] sm:$0xff] %vm230_vm1, %v861_v3 }
 0x411   :  { %v1113_v4 = vpop.permute.xlu1 %1112 }
 0x412   :  { %1118 = vst.msk [vmem:[%s1817_s9 + $0x8] sm:$0xff] %vm1116_vm13, %v1113_v4  ;;  %v1111_v36 = vpop.permute.xlu0 %1110 }
 0x413   :  { %1117 = vst.msk [vmem:[%s1817_s9] sm:$0xff] %vm1116_vm13, %v1111_v36 }
 0x417   :  { %v1130_v5 = vpop.permute.xlu1 %1129 }
 0x418   :  { %1140 = vst.msk [vmem:[%s1818_s10 + $0x8] sm:$0xff] %vm1116_vm13, %v1130_v5 }
 0x41b   :  { %v1128_v6 = vpop.permute.xlu1 %1127 }
 0x41c   :  { %1139 = vst.msk [vmem:[%s1818_s10] sm:$0xff] %vm1116_vm13, %v1128_v6  ;;  %v1132_v7 = vpop.permute.xlu0 %1131 }
 0x41d   :  { %1141 = vst.msk [vmem:[%s1818_s10 + $0x10] sm:$0xff] %vm1116_vm13, %v1132_v7 }
 0x41f   :  { %v1134_v10 = vpop.permute.xlu1 %1133 }
 0x420   :  { %1142 = vst.msk [vmem:[%s1818_s10 + $0x18] sm:$0xff] %vm1116_vm13, %v1134_v10 }

// kernel: gat_forward.6
= control target key start
LH: loop header
LB: loop body
LE: loop exit
PB: predicated region body
PF: predicated region fallthrough
CT: control target
= control target key end

     0   :  { %vm44_vm0 = vcmask 523264   ;;  %v238_v30 = vlaneseq  ;;  %vm275_vm1 = vcmask 130112   ;;  %vm470_vm2 = vcmask 195712   ;;  %s1938_s2 = inlined_call_operand.vmem [shape: f32[64,64], index: 2, kind: input, shape index: {}]   ;;  %s1939_s3 = inlined_call_operand.vmem [shape: f32[64,64], index: 3, kind: input, shape index: {}]   ;;  %s1940_s0 = inlined_call_operand.vmem [shape: f32[16,64], index: 0, kind: input, shape index: {}]   ;;  %s1941_s1 = inlined_call_operand.vmem [shape: f32[32,64], index: 1, kind: input, shape index: {}]   ;;  %s1942_s4 = inlined_call_operand.vmem [shape: f32[8,64], index: 4, kind: input, shape index: {}]   ;;  %s1943_s7 = inlined_call_operand.vmem [shape: f32[16,32], index: 7, kind: input, shape index: {}]   ;;  %s1944_s8 = inlined_call_operand.vmem [shape: f32[32,16], index: 8, kind: input, shape index: {}]   ;;  %s1945_s5 = inlined_call_operand.vmem [shape: f32[16,16], index: 5, kind: input, shape index: {}]   ;;  %s1946_s6 = inlined_call_operand.vmem [shape: f32[32,32], index: 6, kind: input, shape index: {}]   ;;  %s1947_s9 = inlined_call_operand.vmem [shape: f32[16,128], index: 9, kind: output, shape index: {0}]   ;;  %s1948_s10 = inlined_call_operand.vmem [shape: f32[32,128], index: 10, kind: output, shape index: {1}]  }
   0x1   :  { %v36_v0 = vld [vmem:[%s1938_s2] sm:$0xff]  ;;  %v37_v1 = vld [vmem:[%s1938_s2 + $0x8] sm:$0xff]  ;;  %v38_v5 = vld [vmem:[%s1938_s2 + $0x10] sm:$0xff]  ;;  %vm477_vm3 = vcmask 261312   ;;  %vm498_vm8 = vcmask 261120   ;;  %vm302_vm9 = vcmask 130048  }
   0x2   :  { %v130_v2 = vld [vmem:[%s1939_s3] sm:$0xff]  ;;  %v1324_v3 = vpack.c.bf16 %v37_v1, %v36_v0  ;;  %v131_v4 = vld [vmem:[%s1939_s3 + $0x8] sm:$0xff]  ;;  %v39_v6 = vld [vmem:[%s1938_s2 + $0x18] sm:$0xff]  ;;  %v1582_v31 = vshrl.u32 %v238_v30, 7 }
   0x3   :  { %v1340_v7 = vpack.c.bf16 %v131_v4, %v130_v2  ;;  %v1328_v8 = vpack.c.bf16 %v39_v6, %v38_v5  ;;  %v132_v9 = vld [vmem:[%s1939_s3 + $0x10] sm:$0xff]  ;;  %v133_v10 = vld [vmem:[%s1939_s3 + $0x18] sm:$0xff]  ;;  %v40_v11 = vld [vmem:[%s1938_s2 + $0x20] sm:$0xff] }
   0x4   :  { %1325 = vmatprep.subr.bf16.mxu0 %v1324_v3  ;;  %v1344_v12 = vpack.c.bf16 %v133_v10, %v132_v9  ;;  %v41_v13 = vld [vmem:[%s1938_s2 + $0x28] sm:$0xff]  ;;  %v134_v14 = vld [vmem:[%s1939_s3 + $0x20] sm:$0xff]  ;;  %v42_v19 = vld [vmem:[%s1938_s2 + $0x30] sm:$0xff]  ;;  %v434_v32 = vsub.s32 3, %v1582_v31  ;;  %v422_v35 = vsub.s32 2, %v1582_v31  ;;  %v903_v46 = vsub.s32 7, %v1582_v31 }
   0x5   :  { %v135_v15 = vld [vmem:[%s1939_s3 + $0x28] sm:$0xff]  ;;  %1341 = vmatprep.subr.bf16.mxu1 %v1340_v7  ;;  %1327 = vmatpush3.bf16.msra.mxu0 %v1324_v3  ;;  %v1332_v16 = vpack.c.bf16 %v41_v13, %v40_v11  ;;  %v34_v17 = vld [vmem:[%s1940_s0] sm:$0xff]  ;;  %v43_v20 = vld [vmem:[%s1938_s2 + $0x38] sm:$0xff]  ;;  %v883_v52 = vsub.s32 6, %v1582_v31  ;;  %v252_v62 = vsub.s32 1, %v1582_v31  ;;  %v240_v4 = vsub.s32 0, %v1582_v31 }
   0x6   :  { %1343 = vmatpush3.bf16.msra.mxu1 %v1340_v7  ;;  %1329 = vmatprep.subr.bf16.mxu0 %v1328_v8  ;;  %v1348_v18 = vpack.c.bf16 %v135_v15, %v134_v14  ;;  %v126_v21 = vld [vmem:[%s1941_s1] sm:$0xff]  ;;  %v136_v22 = vld [vmem:[%s1939_s3 + $0x30] sm:$0xff]  ;;  %v137_v23 = vld [vmem:[%s1939_s3 + $0x38] sm:$0xff]  ;;  %v1336_v24 = vpack.c.bf16 %v43_v20, %v42_v19  ;;  %v640_v10 = vsub.s32 5, %v1582_v31  ;;  %v620_v20 = vsub.s32 4, %v1582_v31 }
   0x7   :  { %1345 = vmatprep.subr.bf16.mxu1 %v1344_v12  ;;  %1257 = vmatprep.mubr.msk.f32.mxu0 %vm44_vm0, %v34_v17  ;;  %v1352_v25 = vpack.c.bf16 %v137_v23, %v136_v22  ;;  %v35_v26 = vld [vmem:[%s1940_s0 + $0x8] sm:$0xff]  ;;  %v128_v28 = vld [vmem:[%s1941_s1 + $0x10] sm:$0xff]  ;;  %v129_v29 = vld [vmem:[%s1941_s1 + $0x18] sm:$0xff] }
   0x8   :  { %1276 = vmatprep.mubr.msk.f32.mxu1 %vm44_vm0, %v126_v21  ;;  %v127_v27 = vld [vmem:[%s1941_s1 + $0x8] sm:$0xff]  ;;  %v1588_v33 = vld [vmem:[%s1942_s4] sm:$0xff] }
   0x9   :  { %1331 = vmatpush3.bf16.msra.mxu0 %v1328_v8  ;;  %v435_v34 = vrot.slane %v1588_v33, %v434_v32  ;;  %v423_v42 = vrot.slane %v1588_v33, %v422_v35  ;;  %v904_v56 = vrot.slane %v1588_v33, %v903_v46  ;;  %v884_v61 = vrot.slane %v1588_v33, %v883_v52 }
   0xa   :  { %1347 = vmatpush3.bf16.msra.mxu1 %v1344_v12  ;;  %1333 = vmatprep.subr.bf16.mxu0 %v1332_v16  ;;  %v253_v3 = vrot.slane %v1588_v33, %v252_v62  ;;  %v241_v9 = vrot.slane %v1588_v33, %v240_v4  ;;  %v641_v15 = vrot.slane %v1588_v33, %v640_v10 }
   0xb   :  { %1349 = vmatprep.subr.bf16.mxu1 %v1348_v18 }
   0xd   :  { %1335 = vmatpush3.bf16.msra.mxu0 %v1332_v16 }
   0xe   :  { %1351 = vmatpush3.bf16.msra.mxu1 %v1348_v18  ;;  %1337 = vmatprep.subr.bf16.mxu0 %v1336_v24 }
   0xf   :  { %1353 = vmatprep.subr.bf16.mxu1 %v1352_v25 }
  0x11   :  { %1339 = vmatpush3.bf16.msra.mxu0 %v1336_v24 }
  0x12   :  { %1355 = vmatpush3.bf16.msra.mxu1 %v1352_v25  ;;  %v621_v25 = vrot.slane %v1588_v33, %v620_v20  ;;  %v877_v20 = vld [vmem:[%s1944_s8] sm:$0xff] }
  0x13   :  { %vm935_vm10 = vcmp.gt.f32.partialorder %v877_v20, 0.0  ;;  %v614_v20 = vld [vmem:[%s1946_s6] sm:$0xff] }
  0x14   :  { %1258 = vmatmul.mubr.msk.f32.vlgmr.msra.gmra.mrb[0].mxu0 %vm44_vm0, %v35_v26 }
  0x15   :  { %1277 = vmatmul.mubr.msk.f32.vlgmr.msra.gmra.mrb[0].mxu1 %vm44_vm0, %v127_v27 }
  0x16   :  { %1279 = vmatprep.mubr.msk.f32.mxu1 %vm44_vm0, %v128_v28 }
  0x19   :  { %1280 = vmatmul.mubr.msk.f32.gmra.mrb[2].mxu1 %vm44_vm0, %v129_v29 }
  0xe7   :  { %v1592_v36 = vpop.f32.mrb[0].mxu0 }
  0xe8   :  { %v1594_v37 = vpop.f32.mrb[0].mxu1  ;;  %v1596_v38 = vpop.f32.mrb[1].mxu0  ;;  %v425_v59 = vmul.f32 %v1592_v36, %v423_v42  ;;  %v906_v1 = vmul.f32 %v1592_v36, %v904_v56  ;;  %v255_v18 = vmul.f32 %v1592_v36, %v253_v3  ;;  %v243_v23 = vmul.f32 %v1592_v36, %v241_v9 }
  0xe9   :  { %v1598_v39 = vpop.f32.mrb[1].mxu1  ;;  %v437_v40 = vmul.f32 %v1594_v37, %v435_v34  ;;  %v1603_v41 = vpack.c.bf16 %v1592_v36, %v1596_v38  ;;  %v424_v50 = vmul.f32 %v423_v42, %v1596_v38  ;;  %v905_v60 = vmul.f32 %v904_v56, %v1596_v38 }
  0xea   :  { %v1608_v43 = vpack.c.bf16 %v1594_v37, %v1598_v39  ;;  %v436_v45 = vmul.f32 %v435_v34, %v1598_v39  ;;  %v429_v63 = vsel %vm44_vm0, %v425_v59, 0.0  ;;  %v885_v2 = vmul.f32 %v884_v61, %v1598_v39 }
  0xeb   :  { %v443_v44 = vsel %vm44_vm0, %v437_v40, 0.0  ;;  %1357 = vmatprep.subr.bf16.mxu0 %v1603_v41  ;;  %v426_v57 = vsel %vm44_vm0, %v424_v50, 0.0  ;;  %v907_v0 = vsel %vm44_vm0, %v905_v60, 0.0  ;;  %v910_v5 = vsel %vm44_vm0, %v906_v1, 0.0  ;;  %v418_v1 = vld [vmem:[%s1943_s7] sm:$0xff] }
  0xec   :  { %444 = vadd.xlane.f32.xlu0 %v443_v44  ;;  %v1614_v47 = vpop.f32.mrb[2].mxu1  ;;  %1361 = vmatprep.subr.bf16.mxu1 %v1608_v43  ;;  %v440_v53 = vsel %vm44_vm0, %v436_v45, 0.0  ;;  %v889_v6 = vsel %vm44_vm0, %v885_v2, 0.0  ;;  %v886_v7 = vmul.f32 %v1594_v37, %v884_v61  ;;  %v254_v14 = vmul.f32 %v253_v3, %v1596_v38 }
  0xed   :  { %v1617_v48 = vpop.f32.mrb[3].mxu1  ;;  %1359 = vmatpush3.bf16.msra.mxu0 %v1603_v41  ;;  %1363 = vmatpush3.bf16.msra.mxu1 %v1608_v43  ;;  %v439_v49 = vmul.f32 %v1614_v47, %v435_v34  ;;  %v888_v13 = vmul.f32 %v1614_v47, %v884_v61  ;;  %v242_v19 = vmul.f32 %v241_v9, %v1596_v38  ;;  %v259_v21 = vsel %vm44_vm0, %v255_v18, 0.0 }
  0xee   :  { %1369 = vmatprep.subr.bf16.mxu0 %v1608_v43  ;;  %v1626_v51 = vpack.c.bf16 %v1614_v47, %v1617_v48  ;;  %v438_v55 = vmul.f32 %v435_v34, %v1617_v48  ;;  %v887_v8 = vmul.f32 %v884_v61, %v1617_v48  ;;  %v892_v11 = vsel %vm44_vm0, %v886_v7, 0.0 }
  0xef   :  { %v449_v54 = vsel %vm44_vm0, %v439_v49, 0.0  ;;  %v898_v16 = vsel %vm44_vm0, %v888_v13, 0.0  ;;  %v256_v17 = vsel %vm44_vm0, %v254_v14, 0.0  ;;  %v244_v22 = vsel %vm44_vm0, %v242_v19, 0.0 }
  0xf0   :  { %441 = vadd.xlane.f32.xlu0 %v440_v53  ;;  %450 = vadd.xlane.f32.xlu1 %v449_v54  ;;  %v446_v58 = vsel %vm44_vm0, %v438_v55, 0.0  ;;  %v895_v12 = vsel %vm44_vm0, %v887_v8, 0.0  ;;  %v642_v24 = vmul.f32 %v641_v15, %v1598_v39  ;;  %v247_v26 = vsel %vm44_vm0, %v243_v23, 0.0 }
  0xf1   :  { %1365 = vmatprep.subr.bf16.mxu1 %v1626_v51  ;;  %v643_v28 = vmul.f32 %v1594_v37, %v641_v15  ;;  %v644_v29 = vmul.f32 %v641_v15, %v1617_v48  ;;  %v645_v35 = vmul.f32 %v1614_v47, %v641_v15  ;;  %v622_v36 = vmul.f32 %v621_v25, %v1598_v39 }
  0xf2   :  { %1367 = vmatpush3.bf16.msra.mxu1 %v1626_v51  ;;  %v646_v27 = vsel %vm44_vm0, %v642_v24, 0.0  ;;  %v623_v40 = vmul.f32 %v1594_v37, %v621_v25  ;;  %v624_v42 = vmul.f32 %v621_v25, %v1617_v48  ;;  %v625_v46 = vmul.f32 %v1614_v47, %v621_v25 }
  0xf3   :  { %1377 = vmatprep.subr.bf16.mxu1 %v1603_v41  ;;  %v649_v32 = vsel %vm44_vm0, %v643_v28, 0.0  ;;  %v652_v34 = vsel %vm44_vm0, %v644_v29, 0.0  ;;  %v655_v33 = vsel %vm44_vm0, %v645_v35, 0.0  ;;  %v626_v38 = vsel %vm44_vm0, %v622_v36, 0.0  ;;  %v880_v29 = vld [vmem:[%s1944_s8 + $0x18] sm:$0xff] }
  0xf4   :  { %447 = vadd.xlane.f32.xlu1 %v446_v58  ;;  %427 = vadd.xlane.f32.xlu0 %v426_v57  ;;  %v629_v44 = vsel %vm44_vm0, %v623_v40, 0.0  ;;  %v632_v45 = vsel %vm44_vm0, %v624_v42, 0.0  ;;  %v635_v39 = vsel %vm44_vm0, %v625_v46, 0.0  ;;  %v265_v49 = vand.u32 127, %v238_v30 }
  0xf5   :  { %vm488_vm5 = vcmp.gt.f32.partialorder %v418_v1, 0.0 }
  0xf6   :  { %v270_v50 = vadd.s32 4294967288, %v265_v49  ;;  %v465_v37 = vadd.s32 4294967280, %v265_v49  ;;  %v1687_v48 = vsub.s32 %v265_v49, %v1582_v31  ;;  %v472_v53 = vadd.s32 4294967272, %v265_v49 }
  0xf8   :  { %430 = vadd.xlane.f32.xlu1 %v429_v63  ;;  %908 = vadd.xlane.f32.xlu0 %v907_v0  ;;  %v1690_v54 = vsub.s32 %v270_v50, %v1582_v31  ;;  %v1693_v47 = vsub.s32 %v465_v37, %v1582_v31  ;;  %v1697_v58 = vsub.s32 %v472_v53, %v1582_v31  ;;  %v419_v31 = vld [vmem:[%s1943_s7 + $0x8] sm:$0xff] }
  0xf9   :  { %vm489_vm4 = vcmp.gt.f32.partialorder %v419_v31, 0.0  ;;  %v237_v31 = vld [vmem:[%s1945_s5 + $0x8] sm:$0xff] }
  0xfc   :  { %911 = vadd.xlane.f32.xlu1 %v910_v5  ;;  %890 = vadd.xlane.f32.xlu0 %v889_v6 }
 0x100   :  { %893 = vadd.xlane.f32.xlu1 %v892_v11  ;;  %896 = vadd.xlane.f32.xlu0 %v895_v12 }
 0x104   :  { %899 = vadd.xlane.f32.xlu1 %v898_v16  ;;  %257 = vadd.xlane.f32.xlu0 %v256_v17 }
 0x108   :  { %260 = vadd.xlane.f32.xlu1 %v259_v21  ;;  %245 = vadd.xlane.f32.xlu0 %v244_v22  ;;  %v878_v21 = vld [vmem:[%s1944_s8 + $0x8] sm:$0xff] }
 0x109   :  { %vm936_vm12 = vcmp.gt.f32.partialorder %v878_v21, 0.0  ;;  %v615_v21 = vld [vmem:[%s1946_s6 + $0x8] sm:$0xff] }
 0x10c   :  { %248 = vadd.xlane.f32.xlu1 %v247_v26  ;;  %647 = vadd.xlane.f32.xlu0 %v646_v27  ;;  %v879_v27 = vld [vmem:[%s1944_s8 + $0x10] sm:$0xff] }
 0x10d   :  { %vm937_vm15 = vcmp.gt.f32.partialorder %v879_v27, 0.0 }
 0x110   :  { %650 = vadd.xlane.f32.xlu1 %v649_v32  ;;  %653 = vadd.xlane.f32.xlu0 %v652_v34 }
 0x114   :  { %656 = vadd.xlane.f32.xlu1 %v655_v33  ;;  %627 = vadd.xlane.f32.xlu0 %v626_v38 }
 0x118   :  { %630 = vadd.xlane.f32.xlu1 %v629_v44  ;;  %633 = vadd.xlane.f32.xlu0 %v632_v45 }
 0x11c   :  { %636 = vadd.xlane.f32.xlu1 %v635_v39 }
 0x179   :  { %v445_v52 = vpop.xlane.xlu0 %444 }
 0x17a   :  { %v463_v30 = vrot.slane %v445_v52, %v1690_v54 }
 0x17d   :  { %v442_v55 = vpop.xlane.xlu0 %441  ;;  %v451_v56 = vpop.xlane.xlu1 %450 }
 0x17e   :  { %v459_v57 = vrot.slane %v442_v55, %v1687_v48  ;;  %v476_v63 = vrot.slane %v451_v56, %v1697_v58 }
 0x180   :  { %v464_v62 = vsel %vm275_vm1, %v463_v30, %v459_v57 }
 0x181   :  { %v448_v59 = vpop.xlane.xlu1 %447  ;;  %v428_v60 = vpop.xlane.xlu0 %427 }
 0x182   :  { %v469_v61 = vrot.slane %v448_v59, %v1693_v47 }
 0x184   :  { %v471_v0 = vsel %vm470_vm2, %v469_v61, %v464_v62  ;;  %v236_v61 = vld [vmem:[%s1945_s5] sm:$0xff] }
 0x185   :  { %v478_v2 = vsel %vm477_vm3, %v476_v63, %v471_v0  ;;  %v431_v3 = vpop.xlane.xlu1 %430  ;;  %v909_v4 = vpop.xlane.xlu0 %908 }
 0x186   :  { %v486_v5 = vadd.f32 %v478_v2, %v428_v60  ;;  %v487_v6 = vadd.f32 %v478_v2, %v431_v3  ;;  %v918_v11 = vrot.slane %v909_v4, %v1687_v48 }
 0x188   :  { %v492_v7 = vmul.f32 0.2, %v486_v5  ;;  %v493_v8 = vmul.f32 0.2, %v487_v6  ;;  %vm491_vm6 = vcmp.gt.f32.partialorder %v487_v6, 0.0  ;;  %vm490_vm7 = vcmp.gt.f32.partialorder %v486_v5, 0.0 }
 0x189   :  { %v912_v9 = vpop.xlane.xlu1 %911  ;;  %v891_v10 = vpop.xlane.xlu0 %890 }
 0x18a   :  { %v922_v12 = vrot.slane %v912_v9, %v1690_v54  ;;  %v495_v13 = vsel %vm491_vm6, %v487_v6, %v493_v8  ;;  %v494_v14 = vsel %vm490_vm7, %v486_v5, %v492_v7  ;;  %vm292_vm6 = vcmp.gt.f32.partialorder %v236_v61, 0.0 }
 0x18b   :  { %v1713_v15 = vsel %vm489_vm4, %v495_v13, -9e+15  ;;  %v1715_v16 = vsel %vm488_vm5, %v494_v14, -9e+15  ;;  %vm938_vm4 = vcmp.gt.f32.partialorder %v880_v29, 0.0 }
 0x18c   :  { %v923_v17 = vsel %vm275_vm1, %v922_v12, %v918_v11  ;;  %v502_v18 = vsel %vm498_vm8, %v1713_v15, -inf  ;;  %v499_v19 = vsel %vm498_vm8, %v1715_v16, -inf }
 0x18d   :  { %v931_v22 = vadd.f32 %v923_v17, %v891_v10  ;;  %v894_v23 = vpop.xlane.xlu1 %893  ;;  %503 = vmax.xlane.f32.xlu1 %v502_v18  ;;  %v897_v24 = vpop.xlane.xlu0 %896  ;;  %500 = vmax.xlane.f32.xlu0 %v499_v19 }
 0x18e   :  { %v932_v25 = vadd.f32 %v923_v17, %v894_v23  ;;  %v933_v26 = vadd.f32 %v923_v17, %v897_v24 }
 0x18f   :  { %v943_v28 = vmul.f32 0.2, %v931_v22  ;;  %vm939_vm11 = vcmp.gt.f32.partialorder %v931_v22, 0.0 }
 0x190   :  { %v944_v32 = vmul.f32 0.2, %v932_v25  ;;  %v945_v34 = vmul.f32 0.2, %v933_v26  ;;  %vm940_vm13 = vcmp.gt.f32.partialorder %v932_v25, 0.0  ;;  %vm941_vm14 = vcmp.gt.f32.partialorder %v933_v26, 0.0 }
 0x191   :  { %v900_v35 = vpop.xlane.xlu1 %899  ;;  %v258_v36 = vpop.xlane.xlu0 %257  ;;  %v947_v33 = vsel %vm939_vm11, %v931_v22, %v943_v28  ;;  %v617_v28 = vld [vmem:[%s1946_s6 + $0x18] sm:$0xff] }
 0x192   :  { %v934_v38 = vadd.f32 %v923_v17, %v900_v35  ;;  %v1734_v40 = vsel %vm935_vm10, %v947_v33, -9e+15  ;;  %v948_v42 = vsel %vm940_vm13, %v932_v25, %v944_v32  ;;  %v949_v46 = vsel %vm941_vm14, %v933_v26, %v945_v34 }
 0x193   :  { %v955_v44 = vsel %vm302_vm9, %v1734_v40, -inf  ;;  %v1738_v45 = vsel %vm936_vm12, %v948_v42, -9e+15  ;;  %v1742_v50 = vsel %vm937_vm15, %v949_v46, -9e+15  ;;  %v269_v53 = vrot.slane %v258_v36, %v1687_v48 }
 0x194   :  { %v946_v39 = vmul.f32 0.2, %v934_v38  ;;  %956 = vmax.xlane.f32.xlu0 %v955_v44  ;;  %v958_v49 = vsel %vm302_vm9, %v1738_v45, -inf  ;;  %vm942_vm5 = vcmp.gt.f32.partialorder %v934_v38, 0.0  ;;  %v961_v57 = vsel %vm302_vm9, %v1742_v50, -inf }
 0x195   :  { %v261_v52 = vpop.xlane.xlu1 %260  ;;  %959 = vmax.xlane.f32.xlu1 %v958_v49  ;;  %v246_v37 = vpop.xlane.xlu0 %245  ;;  %vm293_vm10 = vcmp.gt.f32.partialorder %v237_v31, 0.0  ;;  %vm695_vm15 = vcmp.gt.f32.partialorder %v617_v28, 0.0 }
 0x196   :  { %v274_v55 = vrot.slane %v261_v52, %v1690_v54  ;;  %v950_v56 = vsel %vm942_vm5, %v934_v38, %v946_v39 }
 0x197   :  { %v1748_v30 = vsel %vm938_vm4, %v950_v56, -9e+15 }
 0x198   :  { %v276_v59 = vsel %vm275_vm1, %v274_v55, %v269_v53  ;;  %962 = vmax.xlane.f32.xlu0 %v961_v57  ;;  %v964_v60 = vsel %vm302_vm9, %v1748_v30, -inf }
 0x199   :  { %v290_v62 = vadd.f32 %v276_v59, %v246_v37  ;;  %v249_v63 = vpop.xlane.xlu1 %248  ;;  %965 = vmax.xlane.f32.xlu1 %v964_v60  ;;  %v648_v0 = vpop.xlane.xlu0 %647 }
 0x19a   :  { %v291_v1 = vadd.f32 %v276_v59, %v249_v63  ;;  %v665_v7 = vrot.slane %v648_v0, %v1687_v48 }
 0x19b   :  { %v296_v2 = vmul.f32 0.2, %v290_v62  ;;  %vm294_vm7 = vcmp.gt.f32.partialorder %v290_v62, 0.0 }
 0x19c   :  { %v297_v3 = vmul.f32 0.2, %v291_v1  ;;  %vm295_vm11 = vcmp.gt.f32.partialorder %v291_v1, 0.0 }
 0x19d   :  { %v651_v4 = vpop.xlane.xlu1 %650  ;;  %v654_v5 = vpop.xlane.xlu0 %653  ;;  %v298_v6 = vsel %vm294_vm7, %v290_v62, %v296_v2 }
 0x19e   :  { %v669_v8 = vrot.slane %v651_v4, %v1690_v54  ;;  %v1761_v9 = vsel %vm292_vm6, %v298_v6, -9e+15  ;;  %v299_v10 = vsel %vm295_vm11, %v291_v1, %v297_v3  ;;  %v674_v11 = vrot.slane %v654_v5, %v1693_v47 }
 0x19f   :  { %v303_v12 = vsel %vm302_vm9, %v1761_v9, -inf  ;;  %v1766_v13 = vsel %vm293_vm10, %v299_v10, -9e+15 }
 0x1a0   :  { %v670_v14 = vsel %vm275_vm1, %v669_v8, %v665_v7  ;;  %304 = vmax.xlane.f32.xlu0 %v303_v12  ;;  %v306_v17 = vsel %vm302_vm9, %v1766_v13, -inf  ;;  %vm692_vm1 = vcmp.gt.f32.partialorder %v614_v20, 0.0 }
 0x1a1   :  { %v657_v18 = vpop.xlane.xlu1 %656  ;;  %307 = vmax.xlane.f32.xlu1 %v306_v17  ;;  %v628_v48 = vpop.xlane.xlu0 %627  ;;  %v675_v19 = vsel %vm470_vm2, %v674_v11, %v670_v14 }
 0x1a2   :  { %v679_v54 = vrot.slane %v657_v18, %v1697_v58  ;;  %v616_v58 = vld [vmem:[%s1946_s6 + $0x10] sm:$0xff]  ;;  %s1453_s6 = smov 64  }
 0x1a3   :  { %vm694_vm14 = vcmp.gt.f32.partialorder %v616_v58, 0.0 }
 0x1a4   :  { %v680_v47 = vsel %vm477_vm3, %v679_v54, %v675_v19  ;;  %vm693_vm3 = vcmp.gt.f32.partialorder %v615_v21, 0.0 }
 0x1a5   :  { %v688_v22 = vadd.f32 %v680_v47, %v628_v48  ;;  %v631_v23 = vpop.xlane.xlu1 %630  ;;  %v634_v24 = vpop.xlane.xlu0 %633 }
 0x1a6   :  { %v689_v25 = vadd.f32 %v680_v47, %v631_v23  ;;  %v690_v26 = vadd.f32 %v680_v47, %v634_v24 }
 0x1a7   :  { %v700_v27 = vmul.f32 0.2, %v688_v22  ;;  %vm696_vm2 = vcmp.gt.f32.partialorder %v688_v22, 0.0 }
 0x1a8   :  { %v701_v29 = vmul.f32 0.2, %v689_v25  ;;  %v702_v32 = vmul.f32 0.2, %v690_v26  ;;  %vm697_vm12 = vcmp.gt.f32.partialorder %v689_v25, 0.0  ;;  %vm698_vm13 = vcmp.gt.f32.partialorder %v690_v26, 0.0 }
 0x1a9   :  { %v637_v34 = vpop.xlane.xlu1 %636  ;;  %v704_v35 = vsel %vm696_vm2, %v688_v22, %v700_v27 }
 0x1aa   :  { %v691_v36 = vadd.f32 %v680_v47, %v637_v34  ;;  %v1786_v33 = vsel %vm692_vm1, %v704_v35, -9e+15  ;;  %v705_v38 = vsel %vm697_vm12, %v689_v25, %v701_v29  ;;  %v706_v42 = vsel %vm698_vm13, %v690_v26, %v702_v32 }
 0x1ab   :  { %v712_v44 = vsel %vm498_vm8, %v1786_v33, -inf  ;;  %v1790_v46 = vsel %vm693_vm3, %v705_v38, -9e+15  ;;  %v1794_v52 = vsel %vm694_vm14, %v706_v42, -9e+15  ;;  %vm1130_vm14 = vcmask 1048064  }
 0x1ac   :  { %v703_v39 = vmul.f32 0.2, %v691_v36  ;;  %713 = vmax.xlane.f32.xlu0 %v712_v44  ;;  %v715_v49 = vsel %vm498_vm8, %v1790_v46, -inf  ;;  %vm699_vm4 = vcmp.gt.f32.partialorder %v691_v36, 0.0  ;;  %v718_v53 = vsel %vm498_vm8, %v1794_v52, -inf }
 0x1ad   :  { %716 = vmax.xlane.f32.xlu1 %v715_v49 }
 0x1ae   :  { %v707_v37 = vsel %vm699_vm4, %v691_v36, %v703_v39 }
 0x1af   :  { %v1798_v55 = vsel %vm695_vm15, %v707_v37, -9e+15 }
 0x1b0   :  { %719 = vmax.xlane.f32.xlu0 %v718_v53  ;;  %v721_v56 = vsel %vm498_vm8, %v1798_v55, -inf }
 0x1b1   :  { %722 = vmax.xlane.f32.xlu1 %v721_v56 }
 0x21a   :  { %v504_v57 = vpop.xlane.xlu1 %503  ;;  %v501_v59 = vpop.xlane.xlu0 %500 }
 0x21b   :  { %v506_v60 = vsub.f32 %v1713_v15, %v504_v57  ;;  %v505_v61 = vsub.f32 %v1715_v16, %v501_v59 }
 0x21d   :  { %v509_v62 = vmul.f32 1.442695, %v506_v60  ;;  %v507_v63 = vmul.f32 1.442695, %v505_v61 }
 0x21f   :  { %1381 = vpow2.f32 %v509_v62 }
 0x220   :  { %1383 = vpow2.f32 %v507_v63 }
 0x221   :  { %v957_v0 = vpop.xlane.xlu0 %956 }
 0x222   :  { %v967_v31 = vsub.f32 %v1734_v40, %v957_v0  ;;  %v960_v1 = vpop.xlane.xlu1 %959 }
 0x223   :  { %v968_v2 = vsub.f32 %v1738_v45, %v960_v1 }
 0x224   :  { %v971_v3 = vmul.f32 1.442695, %v967_v31 }
 0x225   :  { %v973_v4 = vmul.f32 1.442695, %v968_v2  ;;  %v963_v5 = vpop.xlane.xlu0 %962 }
 0x226   :  { %1385 = vpow2.f32 %v971_v3  ;;  %v969_v6 = vsub.f32 %v1742_v50, %v963_v5  ;;  %v966_v7 = vpop.xlane.xlu1 %965 }
 0x227   :  { %1387 = vpow2.f32 %v973_v4  ;;  %v970_v15 = vsub.f32 %v1748_v30, %v966_v7 }
 0x228   :  { %v975_v16 = vmul.f32 1.442695, %v969_v6 }
 0x229   :  { %v1808_v8 = vpop.eup %1381  ;;  %v977_v10 = vmul.f32 1.442695, %v970_v15 }
 0x22a   :  { %v1810_v11 = vpop.eup %1383  ;;  %1389 = vpow2.f32 %v975_v16  ;;  %v514_v40 = vsel %vm498_vm8, %v1808_v8, 0.0 }
 0x22b   :  { %1391 = vpow2.f32 %v977_v10  ;;  %515 = vadd.xlane.f32.xlu1 %v514_v40  ;;  %v511_v45 = vsel %vm498_vm8, %v1810_v11, 0.0 }
 0x22c   :  { %512 = vadd.xlane.f32.xlu0 %v511_v45 }
 0x22d   :  { %v305_v50 = vpop.xlane.xlu0 %304 }
 0x22e   :  { %v309_v12 = vsub.f32 %v1761_v9, %v305_v50  ;;  %v308_v30 = vpop.xlane.xlu1 %307 }
 0x22f   :  { %v310_v14 = vsub.f32 %v1766_v13, %v308_v30 }
 0x230   :  { %v1818_v17 = vpop.eup %1385  ;;  %v311_v18 = vmul.f32 1.442695, %v309_v12 }
 0x231   :  { %v1820_v48 = vpop.eup %1387  ;;  %v313_v54 = vmul.f32 1.442695, %v310_v14  ;;  %v979_v19 = vsel %vm302_vm9, %v1818_v17, 0.0 }
 0x232   :  { %1393 = vpow2.f32 %v311_v18  ;;  %980 = vadd.xlane.f32.xlu0 %v979_v19  ;;  %v982_v47 = vsel %vm302_vm9, %v1820_v48, 0.0 }
 0x233   :  { %1395 = vpow2.f32 %v313_v54  ;;  %983 = vadd.xlane.f32.xlu1 %v982_v47 }
 0x234   :  { %v1826_v9 = vpop.eup %1389 }
 0x235   :  { %v1828_v20 = vpop.eup %1391  ;;  %v985_v13 = vsel %vm302_vm9, %v1826_v9, 0.0 }
 0x236   :  { %986 = vadd.xlane.f32.xlu0 %v985_v13  ;;  %v988_v21 = vsel %vm302_vm9, %v1828_v20, 0.0 }
 0x237   :  { %989 = vadd.xlane.f32.xlu1 %v988_v21 }
 0x239   :  { %v714_v22 = vpop.xlane.xlu0 %713 }
 0x23a   :  { %v724_v23 = vsub.f32 %v1786_v33, %v714_v22  ;;  %v717_v24 = vpop.xlane.xlu1 %716 }
 0x23b   :  { %v725_v25 = vsub.f32 %v1790_v46, %v717_v24 }
 0x23c   :  { %v1836_v26 = vpop.eup %1393  ;;  %v728_v58 = vmul.f32 1.442695, %v724_v23 }
 0x23d   :  { %v1838_v27 = vpop.eup %1395  ;;  %v730_v28 = vmul.f32 1.442695, %v725_v25  ;;  %v720_v29 = vpop.xlane.xlu0 %719  ;;  %v315_v32 = vsel %vm302_vm9, %v1836_v26, 0.0 }
 0x23e   :  { %1397 = vpow2.f32 %v728_v58  ;;  %v726_v34 = vsub.f32 %v1794_v52, %v720_v29  ;;  %v723_v35 = vpop.xlane.xlu1 %722  ;;  %316 = vadd.xlane.f32.xlu0 %v315_v32  ;;  %v318_v36 = vsel %vm302_vm9, %v1838_v27, 0.0 }
 0x23f   :  { %1399 = vpow2.f32 %v730_v28  ;;  %v727_v33 = vsub.f32 %v1798_v55, %v723_v35  ;;  %319 = vadd.xlane.f32.xlu1 %v318_v36 }
 0x240   :  { %v732_v38 = vmul.f32 1.442695, %v726_v34 }
 0x241   :  { %v734_v42 = vmul.f32 1.442695, %v727_v33 }
 0x242   :  { %1401 = vpow2.f32 %v732_v38 }
 0x243   :  { %1403 = vpow2.f32 %v734_v42 }
 0x248   :  { %v1846_v44 = vpop.eup %1397 }
 0x249   :  { %v1848_v46 = vpop.eup %1399  ;;  %v736_v39 = vsel %vm498_vm8, %v1846_v44, 0.0 }
 0x24a   :  { %737 = vadd.xlane.f32.xlu0 %v736_v39  ;;  %v739_v49 = vsel %vm498_vm8, %v1848_v46, 0.0 }
 0x24b   :  { %740 = vadd.xlane.f32.xlu1 %v739_v49 }
 0x24c   :  { %v1854_v52 = vpop.eup %1401 }
 0x24d   :  { %v1856_v37 = vpop.eup %1403  ;;  %v742_v53 = vsel %vm498_vm8, %v1854_v52, 0.0 }
 0x24e   :  { %743 = vadd.xlane.f32.xlu0 %v742_v53  ;;  %v745_v55 = vsel %vm498_vm8, %v1856_v37, 0.0 }
 0x24f   :  { %746 = vadd.xlane.f32.xlu1 %v745_v55 }
 0x2b8   :  { %v516_v56 = vpop.xlane.xlu1 %515 }
 0x2b9   :  { %1405 = vrcp.f32 %v516_v56  ;;  %v513_v57 = vpop.xlane.xlu0 %512 }
 0x2ba   :  { %1407 = vrcp.f32 %v513_v57 }
 0x2bf   :  { %v981_v59 = vpop.xlane.xlu0 %980 }
 0x2c0   :  { %1409 = vrcp.f32 %v981_v59  ;;  %v984_v60 = vpop.xlane.xlu1 %983 }
 0x2c1   :  { %1411 = vrcp.f32 %v984_v60 }
 0x2c3   :  { %v1406_v61 = vpop.eup %1405  ;;  %v987_v62 = vpop.xlane.xlu0 %986 }
 0x2c4   :  { %v1408_v63 = vpop.eup %1407  ;;  %v520_v0 = vmul.f32 %v1406_v61, %v1808_v8  ;;  %1413 = vrcp.f32 %v987_v62  ;;  %v990_v31 = vpop.xlane.xlu1 %989 }
 0x2c5   :  { %1415 = vrcp.f32 %v990_v31  ;;  %v519_v1 = vmul.f32 %v1408_v63, %v1810_v11 }
 0x2c7   :  { %1297 = vmatprep.mubr.msk.f32.mxu1 %vm498_vm8, %v519_v1 }
 0x2c8   :  { %1298 = vmatmul.mubr.msk.f32.vlgmr.msra.gmra.mrb[4].mxu1 %vm498_vm8, %v520_v0 }
 0x2c9   :  { %1379 = vmatpush3.bf16.msra.mxu1 %v1603_v41 }
 0x2ca   :  { %v1410_v2 = vpop.eup %1409 }
 0x2cb   :  { %v1412_v3 = vpop.eup %1411  ;;  %v317_v4 = vpop.xlane.xlu0 %316  ;;  %v995_v5 = vmul.f32 %v1410_v2, %v1818_v17 }
 0x2cc   :  { %v996_v6 = vmul.f32 %v1412_v3, %v1820_v48  ;;  %1417 = vrcp.f32 %v317_v4  ;;  %v320_v7 = vpop.xlane.xlu1 %319 }
 0x2cd   :  { %1419 = vrcp.f32 %v320_v7  ;;  %1318 = vmatprep.mubr.msk.f32.mxu1 %vm302_vm9, %v995_v5 }
 0x2ce   :  { %v1414_v15 = vpop.eup %1413  ;;  %1319 = vmatmul.mubr.msk.f32.vlgmr.msra.gmra.mrb[6].mxu1 %vm302_vm9, %v996_v6 }
 0x2cf   :  { %v1416_v16 = vpop.eup %1415  ;;  %v997_v8 = vmul.f32 %v1414_v15, %v1826_v9 }
 0x2d0   :  { %v998_v41 = vmul.f32 %v1416_v16, %v1828_v20 }
 0x2d1   :  { %1321 = vmatprep.mubr.msk.f32.mxu1 %vm302_vm9, %v997_v8 }
 0x2d2   :  { %1322 = vmatmul.mubr.msk.f32.gmra.mrb[8].mxu1 %vm302_vm9, %v998_v41 }
 0x2d6   :  { %v1418_v10 = vpop.eup %1417 }
 0x2d7   :  { %v1420_v11 = vpop.eup %1419  ;;  %v738_v40 = vpop.xlane.xlu0 %737  ;;  %v323_v45 = vmul.f32 %v1418_v10, %v1836_v26 }
 0x2d8   :  { %v324_v50 = vmul.f32 %v1420_v11, %v1838_v27  ;;  %1421 = vrcp.f32 %v738_v40  ;;  %v741_v12 = vpop.xlane.xlu1 %740 }
 0x2d9   :  { %1423 = vrcp.f32 %v741_v12  ;;  %1286 = vmatprep.mubr.msk.f32.mxu0 %vm302_vm9, %v323_v45 }
 0x2da   :  { %1287 = vmatmul.mubr.msk.f32.vlgmr.msra.gmra.mrb[2].mxu0 %vm302_vm9, %v324_v50 }
 0x2db   :  { %1371 = vmatpush3.bf16.msra.mxu0 %v1608_v43  ;;  %v744_v30 = vpop.xlane.xlu0 %743 }
 0x2dc   :  { %1373 = vmatprep.subr.bf16.mxu0 %v1626_v51  ;;  %1425 = vrcp.f32 %v744_v30  ;;  %v747_v14 = vpop.xlane.xlu1 %746 }
 0x2dd   :  { %1427 = vrcp.f32 %v747_v14 }
 0x2df   :  { %1375 = vmatpush3.bf16.msra.mxu0 %v1626_v51 }
 0x2e2   :  { %v1422_v17 = vpop.eup %1421 }
 0x2e3   :  { %v1424_v18 = vpop.eup %1423  ;;  %v752_v48 = vmul.f32 %v1422_v17, %v1846_v44 }
 0x2e4   :  { %v753_v54 = vmul.f32 %v1424_v18, %v1848_v46 }
 0x2e5   :  { %1308 = vmatprep.mubr.msk.f32.mxu0 %vm498_vm8, %v752_v48 }
 0x2e6   :  { %v1426_v19 = vpop.eup %1425  ;;  %1309 = vmatmul.mubr.msk.f32.vlgmr.msra.gmra.mrb[4].mxu0 %vm498_vm8, %v753_v54 }
 0x2e7   :  { %v1428_v43 = vpop.eup %1427  ;;  %v754_v47 = vmul.f32 %v1426_v19, %v1854_v52 }
 0x2e8   :  { %v755_v9 = vmul.f32 %v1428_v43, %v1856_v37 }
 0x2e9   :  { %1311 = vmatprep.mubr.msk.f32.mxu0 %vm498_vm8, %v754_v47 }
 0x2ea   :  { %1312 = vmatmul.mubr.msk.f32.gmra.mrb[6].mxu0 %vm498_vm8, %v755_v9 }
 0x39b   :  { %v1299_v51 = vpop.f32.mrb[4].mxu1 }
 0x39c   :  { %v605_v20 = vmin.f32 %v1299_v51, 0.0  ;;  %v593_v13 = vpop.f32.mrb[5].mxu1  ;;  %vm603_vm8 = vcmp.gt.f32.partialorder %v1299_v51, 0.0 }
 0x39d   :  { %v604_v21 = vmin.f32 %v593_v13, 0.0  ;;  %vm602_vm9 = vcmp.gt.f32.partialorder %v593_v13, 0.0 }
 0x39e   :  { %v608_v22 = vmul.f32 1.442695, %v605_v20 }
 0x39f   :  { %v606_v23 = vmul.f32 1.442695, %v604_v21 }
 0x3a0   :  { %1429 = vpow2.f32 %v608_v22 }
 0x3a1   :  { %1431 = vpow2.f32 %v606_v23  ;;  %v1320_v24 = vpop.f32.mrb[6].mxu1 }
 0x3a2   :  { %v1101_v25 = vmin.f32 %v1320_v24, 0.0  ;;  %v1077_v26 = vpop.f32.mrb[7].mxu1  ;;  %vm1097_vm5 = vcmp.gt.f32.partialorder %v1320_v24, 0.0 }
 0x3a3   :  { %v1100_v58 = vmin.f32 %v1077_v26, 0.0  ;;  %vm1096_vm6 = vcmp.gt.f32.partialorder %v1077_v26, 0.0 }
 0x3a4   :  { %v1106_v27 = vmul.f32 1.442695, %v1101_v25 }
 0x3a5   :  { %v1104_v28 = vmul.f32 1.442695, %v1100_v58  ;;  %v1323_v29 = vpop.f32.mrb[8].mxu1 }
 0x3a6   :  { %1433 = vpow2.f32 %v1106_v27  ;;  %v1103_v32 = vmin.f32 %v1323_v29, 0.0  ;;  %v1087_v34 = vpop.f32.mrb[9].mxu1  ;;  %vm1099_vm10 = vcmp.gt.f32.partialorder %v1323_v29, 0.0 }
 0x3a7   :  { %1435 = vpow2.f32 %v1104_v28  ;;  %v1102_v35 = vmin.f32 %v1087_v34, 0.0  ;;  %vm1098_vm7 = vcmp.gt.f32.partialorder %v1087_v34, 0.0 }
 0x3a8   :  { %v1110_v36 = vmul.f32 1.442695, %v1103_v32 }
 0x3a9   :  { %v1108_v33 = vmul.f32 1.442695, %v1102_v35 }
 0x3aa   :  { %v1430_v38 = vpop.eup %1429  ;;  %1437 = vpow2.f32 %v1110_v36 }
 0x3ab   :  { %v1432_v42 = vpop.eup %1431  ;;  %1439 = vpow2.f32 %v1108_v33  ;;  %v1178_v44 = vadd.f32 -1.0, %v1430_v38 }
 0x3ac   :  { %v1177_v46 = vadd.f32 -1.0, %v1432_v42 }
 0x3ad   :  { %v613_v39 = vsel %vm603_vm8, %v1299_v51, %v1178_v44  ;;  %v1288_v49 = vpop.f32.mrb[2].mxu0 }
 0x3ae   :  { %1126 = vrot.lane.b32.xlu1 %v613_v39, %s1453_s6  ;;  %v409_v52 = vmin.f32 %v1288_v49, 0.0  ;;  %v612_v37 = vsel %vm602_vm9, %v593_v13, %v1177_v46  ;;  %v397_v53 = vpop.f32.mrb[3].mxu0  ;;  %vm407_vm11 = vcmp.gt.f32.partialorder %v1288_v49, 0.0 }
 0x3af   :  { %1124 = vrot.lane.b32.xlu0 %v612_v37, %s1453_s6  ;;  %v408_v55 = vmin.f32 %v397_v53, 0.0  ;;  %vm406_vm1 = vcmp.gt.f32.partialorder %v397_v53, 0.0 }
 0x3b0   :  { %v1434_v56 = vpop.eup %1433  ;;  %v412_v57 = vmul.f32 1.442695, %v409_v52 }
 0x3b1   :  { %v1436_v59 = vpop.eup %1435  ;;  %v410_v60 = vmul.f32 1.442695, %v408_v55  ;;  %v1192_v61 = vadd.f32 -1.0, %v1434_v56 }
 0x3b2   :  { %1441 = vpow2.f32 %v412_v57  ;;  %v1191_v63 = vadd.f32 -1.0, %v1436_v59 }
 0x3b3   :  { %1443 = vpow2.f32 %v410_v60  ;;  %v1117_v62 = vsel %vm1097_vm5, %v1320_v24, %v1192_v61 }
 0x3b4   :  { %v1438_v0 = vpop.eup %1437  ;;  %1143 = vrot.lane.b32.xlu1 %v1117_v62, %s1453_s6  ;;  %v1116_v2 = vsel %vm1096_vm6, %v1077_v26, %v1191_v63 }
 0x3b5   :  { %v1440_v31 = vpop.eup %1439  ;;  %v1194_v3 = vadd.f32 -1.0, %v1438_v0 }
 0x3b6   :  { %v1193_v1 = vadd.f32 -1.0, %v1440_v31 }
 0x3b7   :  { %v1119_v16 = vsel %vm1099_vm10, %v1323_v29, %v1194_v3 }
 0x3b8   :  { %1141 = vrot.lane.b32.xlu1 %v1116_v2, %s1453_s6  ;;  %v1118_v4 = vsel %vm1098_vm7, %v1087_v34, %v1193_v1 }
 0x3b9   :  { %1145 = vrot.lane.b32.xlu0 %v1118_v4, %s1453_s6  ;;  %v1310_v5 = vpop.f32.mrb[4].mxu0 }
 0x3ba   :  { %v858_v6 = vmin.f32 %v1310_v5, 0.0  ;;  %v834_v7 = vpop.f32.mrb[5].mxu0  ;;  %vm854_vm2 = vcmp.gt.f32.partialorder %v1310_v5, 0.0 }
 0x3bb   :  { %v857_v15 = vmin.f32 %v834_v7, 0.0  ;;  %vm853_vm3 = vcmp.gt.f32.partialorder %v834_v7, 0.0 }
 0x3bc   :  { %v1442_v8 = vpop.eup %1441  ;;  %v863_v41 = vmul.f32 1.442695, %v858_v6  ;;  %1147 = vrot.lane.b32.xlu1 %v1119_v16, %s1453_s6 }
 0x3bd   :  { %v1444_v10 = vpop.eup %1443  ;;  %v1174_v11 = vadd.f32 -1.0, %v1442_v8  ;;  %v861_v40 = vmul.f32 1.442695, %v857_v15  ;;  %v1313_v45 = vpop.f32.mrb[6].mxu0 }
 0x3be   :  { %v1173_v50 = vadd.f32 -1.0, %v1444_v10  ;;  %1445 = vpow2.f32 %v863_v41  ;;  %v860_v12 = vmin.f32 %v1313_v45, 0.0  ;;  %v844_v30 = vpop.f32.mrb[7].mxu0  ;;  %vm856_vm12 = vcmp.gt.f32.partialorder %v1313_v45, 0.0 }
 0x3bf   :  { %v417_v14 = vsel %vm407_vm11, %v1288_v49, %v1174_v11  ;;  %1447 = vpow2.f32 %v861_v40  ;;  %v859_v17 = vmin.f32 %v844_v30, 0.0  ;;  %vm855_vm13 = vcmp.gt.f32.partialorder %v844_v30, 0.0 }
 0x3c0   :  { %1121 = vst.msk [vmem:[%s1947_s9 + $0x8] sm:$0xff] %vm44_vm0, %v417_v14  ;;  %v416_v18 = vsel %vm406_vm1, %v397_v53, %v1173_v50  ;;  %v867_v48 = vmul.f32 1.442695, %v860_v12 }
 0x3c1   :  { %1120 = vst.msk [vmem:[%s1947_s9] sm:$0xff] %vm44_vm0, %v416_v18  ;;  %v865_v54 = vmul.f32 1.442695, %v859_v17 }
 0x3c2   :  { %1449 = vpow2.f32 %v867_v48 }
 0x3c3   :  { %1451 = vpow2.f32 %v865_v54 }
 0x3c8   :  { %v1446_v19 = vpop.eup %1445 }
 0x3c9   :  { %v1448_v43 = vpop.eup %1447  ;;  %v1184_v47 = vadd.f32 -1.0, %v1446_v19 }
 0x3ca   :  { %v1183_v9 = vadd.f32 -1.0, %v1448_v43 }
 0x3cb   :  { %v874_v51 = vsel %vm854_vm2, %v1310_v5, %v1184_v47 }
 0x3cc   :  { %v1450_v20 = vpop.eup %1449  ;;  %1134 = vst.msk [vmem:[%s1948_s10 + $0x8] sm:$0xff] %vm44_vm0, %v874_v51  ;;  %v873_v13 = vsel %vm853_vm3, %v834_v7, %v1183_v9 }
 0x3cd   :  { %v1452_v21 = vpop.eup %1451  ;;  %1133 = vst.msk [vmem:[%s1948_s10] sm:$0xff] %vm44_vm0, %v873_v13  ;;  %v1186_v22 = vadd.f32 -1.0, %v1450_v20 }
 0x3ce   :  { %v1185_v23 = vadd.f32 -1.0, %v1452_v21 }
 0x3cf   :  { %v876_v24 = vsel %vm856_vm12, %v1313_v45, %v1186_v22 }
 0x3d0   :  { %1136 = vst.msk [vmem:[%s1948_s10 + $0x18] sm:$0xff] %vm44_vm0, %v876_v24  ;;  %v875_v25 = vsel %vm855_vm13, %v844_v30, %v1185_v23 }
 0x3d1   :  { %1135 = vst.msk [vmem:[%s1948_s10 + $0x10] sm:$0xff] %vm44_vm0, %v875_v25 }
 0x420   :  { %v1127_v26 = vpop.permute.xlu1 %1126 }
 0x421   :  { %1132 = vst.msk [vmem:[%s1947_s9 + $0x8] sm:$0xff] %vm1130_vm14, %v1127_v26  ;;  %v1125_v58 = vpop.permute.xlu0 %1124 }
 0x422   :  { %1131 = vst.msk [vmem:[%s1947_s9] sm:$0xff] %vm1130_vm14, %v1125_v58 }
 0x426   :  { %v1144_v27 = vpop.permute.xlu1 %1143 }
 0x427   :  { %1154 = vst.msk [vmem:[%s1948_s10 + $0x8] sm:$0xff] %vm1130_vm14, %v1144_v27 }
 0x42a   :  { %v1142_v28 = vpop.permute.xlu1 %1141 }
 0x42b   :  { %1153 = vst.msk [vmem:[%s1948_s10] sm:$0xff] %vm1130_vm14, %v1142_v28  ;;  %v1146_v29 = vpop.permute.xlu0 %1145 }
 0x42c   :  { %1155 = vst.msk [vmem:[%s1948_s10 + $0x10] sm:$0xff] %vm1130_vm14, %v1146_v29 }
 0x42e   :  { %v1148_v32 = vpop.permute.xlu1 %1147 }
 0x42f   :  { %1156 = vst.msk [vmem:[%s1948_s10 + $0x18] sm:$0xff] %vm1130_vm14, %v1148_v32 }

// kernel: gat_forward.7
= control target key start
LH: loop header
LB: loop body
LE: loop exit
PB: predicated region body
PF: predicated region fallthrough
CT: control target
= control target key end

     0   :  { %v235_v54 = vlaneseq  ;;  %vm268_vm0 = vcmask 130112   ;;  %vm295_vm3 = vcmask 130048   ;;  %vm457_vm6 = vcmask 195712   ;;  %s1920_s2 = inlined_call_operand.vmem [shape: f32[128,128], index: 2, kind: input, shape index: {}]   ;;  %s1921_s3 = inlined_call_operand.vmem [shape: f32[128,128], index: 3, kind: input, shape index: {}]   ;;  %s1922_s0 = inlined_call_operand.vmem [shape: f32[16,128], index: 0, kind: input, shape index: {}]   ;;  %s1923_s1 = inlined_call_operand.vmem [shape: f32[32,128], index: 1, kind: input, shape index: {}]   ;;  %s1924_s4 = inlined_call_operand.vmem [shape: f32[8,128], index: 4, kind: input, shape index: {}]   ;;  %s1925_s5 = inlined_call_operand.vmem [shape: f32[16,16], index: 5, kind: input, shape index: {}]   ;;  %s1926_s8 = inlined_call_operand.vmem [shape: f32[32,16], index: 8, kind: input, shape index: {}]   ;;  %s1927_s7 = inlined_call_operand.vmem [shape: f32[16,32], index: 7, kind: input, shape index: {}]   ;;  %s1928_s6 = inlined_call_operand.vmem [shape: f32[32,32], index: 6, kind: input, shape index: {}]   ;;  %s1929_s9 = inlined_call_operand.vmem [shape: f32[16,256], index: 9, kind: output, shape index: {0}]   ;;  %s1930_s10 = inlined_call_operand.vmem [shape: f32[32,256], index: 10, kind: output, shape index: {1}]  }
   0x1   :  { %v36_v0 = vld [vmem:[%s1920_s2] sm:$0xff]  ;;  %v37_v1 = vld [vmem:[%s1920_s2 + $0x8] sm:$0xff]  ;;  %v38_v5 = vld [vmem:[%s1920_s2 + $0x10] sm:$0xff]  ;;  %vm464_vm7 = vcmask 261312   ;;  %vm485_vm11 = vcmask 261120  }
   0x2   :  { %v131_v2 = vld [vmem:[%s1921_s3] sm:$0xff]  ;;  %v1314_v3 = vpack.c.bf16 %v37_v1, %v36_v0  ;;  %v132_v4 = vld [vmem:[%s1921_s3 + $0x8] sm:$0xff]  ;;  %v39_v6 = vld [vmem:[%s1920_s2 + $0x18] sm:$0xff]  ;;  %v1644_v55 = vshrl.u32 %v235_v54, 7 }
   0x3   :  { %v1346_v7 = vpack.c.bf16 %v132_v4, %v131_v2  ;;  %v1318_v8 = vpack.c.bf16 %v39_v6, %v38_v5  ;;  %v133_v9 = vld [vmem:[%s1921_s3 + $0x10] sm:$0xff]  ;;  %v134_v10 = vld [vmem:[%s1921_s3 + $0x18] sm:$0xff]  ;;  %v40_v11 = vld [vmem:[%s1920_s2 + $0x20] sm:$0xff] }
   0x4   :  { %1315 = vmatprep.subr.bf16.mxu0 %v1314_v3  ;;  %v1350_v12 = vpack.c.bf16 %v134_v10, %v133_v9  ;;  %v41_v13 = vld [vmem:[%s1920_s2 + $0x28] sm:$0xff]  ;;  %v135_v14 = vld [vmem:[%s1921_s3 + $0x20] sm:$0xff]  ;;  %v42_v18 = vld [vmem:[%s1920_s2 + $0x30] sm:$0xff]  ;;  %v247_v56 = vsub.s32 1, %v1644_v55  ;;  %v425_v58 = vsub.s32 3, %v1644_v55  ;;  %v415_v60 = vsub.s32 2, %v1644_v55 }
   0x5   :  { %v136_v15 = vld [vmem:[%s1921_s3 + $0x28] sm:$0xff]  ;;  %1347 = vmatprep.subr.bf16.mxu1 %v1346_v7  ;;  %1317 = vmatpush3.bf16.msra.mxu0 %v1314_v3  ;;  %v1322_v16 = vpack.c.bf16 %v41_v13, %v40_v11  ;;  %v43_v19 = vld [vmem:[%s1920_s2 + $0x38] sm:$0xff]  ;;  %v137_v20 = vld [vmem:[%s1921_s3 + $0x30] sm:$0xff]  ;;  %v237_v62 = vsub.s32 0, %v1644_v55 }
   0x6   :  { %1349 = vmatpush3.bf16.msra.mxu1 %v1346_v7  ;;  %1319 = vmatprep.subr.bf16.mxu0 %v1318_v8  ;;  %v1354_v17 = vpack.c.bf16 %v136_v15, %v135_v14  ;;  %v138_v21 = vld [vmem:[%s1921_s3 + $0x38] sm:$0xff]  ;;  %v1326_v22 = vpack.c.bf16 %v43_v19, %v42_v18  ;;  %v44_v24 = vld [vmem:[%s1920_s2 + $0x40] sm:$0xff]  ;;  %v45_v25 = vld [vmem:[%s1920_s2 + $0x48] sm:$0xff]  ;;  %v878_v15 = vsub.s32 7, %v1644_v55 }
   0x7   :  { %1351 = vmatprep.subr.bf16.mxu1 %v1350_v12  ;;  %v1358_v23 = vpack.c.bf16 %v138_v21, %v137_v20  ;;  %v34_v26 = vld [vmem:[%s1922_s0] sm:$0xff]  ;;  %v140_v28 = vld [vmem:[%s1921_s3 + $0x48] sm:$0xff]  ;;  %v1330_v30 = vpack.c.bf16 %v45_v25, %v44_v24  ;;  %v46_v32 = vld [vmem:[%s1920_s2 + $0x50] sm:$0xff] }
   0x8   :  { %v139_v27 = vld [vmem:[%s1921_s3 + $0x40] sm:$0xff]  ;;  %1231 = vmatprep.mubr.f32.mxu0 %v34_v26  ;;  %v47_v33 = vld [vmem:[%s1920_s2 + $0x58] sm:$0xff]  ;;  %v141_v34 = vld [vmem:[%s1921_s3 + $0x50] sm:$0xff]  ;;  %v862_v26 = vsub.s32 6, %v1644_v55 }
   0x9   :  { %1321 = vmatpush3.bf16.msra.mxu0 %v1318_v8  ;;  %v127_v29 = vld [vmem:[%s1923_s1] sm:$0xff]  ;;  %v1362_v31 = vpack.c.bf16 %v140_v28, %v139_v27  ;;  %v142_v35 = vld [vmem:[%s1921_s3 + $0x58] sm:$0xff]  ;;  %v1334_v36 = vpack.c.bf16 %v47_v33, %v46_v32  ;;  %v49_v39 = vld [vmem:[%s1920_s2 + $0x68] sm:$0xff]  ;;  %v623_v8 = vsub.s32 5, %v1644_v55 }
   0xa   :  { %1353 = vmatpush3.bf16.msra.mxu1 %v1350_v12  ;;  %1323 = vmatprep.subr.bf16.mxu0 %v1322_v16  ;;  %v1366_v37 = vpack.c.bf16 %v142_v35, %v141_v34  ;;  %v48_v38 = vld [vmem:[%s1920_s2 + $0x60] sm:$0xff]  ;;  %v144_v41 = vld [vmem:[%s1921_s3 + $0x68] sm:$0xff]  ;;  %v50_v44 = vld [vmem:[%s1920_s2 + $0x70] sm:$0xff] }
   0xb   :  { %1355 = vmatprep.subr.bf16.mxu1 %v1354_v17  ;;  %1266 = vmatprep.mubr.f32.mxu1 %v127_v29  ;;  %v143_v40 = vld [vmem:[%s1921_s3 + $0x60] sm:$0xff]  ;;  %v1338_v42 = vpack.c.bf16 %v49_v39, %v48_v38  ;;  %v51_v45 = vld [vmem:[%s1920_s2 + $0x78] sm:$0xff]  ;;  %v145_v46 = vld [vmem:[%s1921_s3 + $0x70] sm:$0xff]  ;;  %v607_v29 = vsub.s32 4, %v1644_v55 }
   0xc   :  { %v1370_v43 = vpack.c.bf16 %v144_v41, %v143_v40  ;;  %v146_v47 = vld [vmem:[%s1921_s3 + $0x78] sm:$0xff]  ;;  %v1342_v48 = vpack.c.bf16 %v51_v45, %v50_v44  ;;  %v35_v50 = vld [vmem:[%s1922_s0 + $0x8] sm:$0xff]  ;;  %v129_v52 = vld [vmem:[%s1923_s1 + $0x10] sm:$0xff] }
   0xd   :  { %1325 = vmatpush3.bf16.msra.mxu0 %v1322_v16  ;;  %v1374_v49 = vpack.c.bf16 %v146_v47, %v145_v46  ;;  %v128_v51 = vld [vmem:[%s1923_s1 + $0x8] sm:$0xff]  ;;  %v130_v53 = vld [vmem:[%s1923_s1 + $0x18] sm:$0xff]  ;;  %v232_v57 = vld [vmem:[%s1924_s4] sm:$0xff] }
   0xe   :  { %1357 = vmatpush3.bf16.msra.mxu1 %v1354_v17  ;;  %1327 = vmatprep.subr.bf16.mxu0 %v1326_v22  ;;  %v248_v59 = vrot.slane %v232_v57, %v247_v56  ;;  %v426_v61 = vrot.slane %v232_v57, %v425_v58  ;;  %v416_v3 = vrot.slane %v232_v57, %v415_v60  ;;  %v234_v56 = vld [vmem:[%s1925_s5 + $0x8] sm:$0xff] }
   0xf   :  { %1359 = vmatprep.subr.bf16.mxu1 %v1358_v23  ;;  %v238_v7 = vrot.slane %v232_v57, %v237_v62  ;;  %v624_v14 = vrot.slane %v232_v57, %v623_v8  ;;  %v879_v19 = vrot.slane %v232_v57, %v878_v15  ;;  %v608_v32 = vrot.slane %v232_v57, %v607_v29 }
  0x10   :  { %vm286_vm1 = vcmp.gt.f32.partialorder %v234_v56, 0.0 }
  0x11   :  { %1329 = vmatpush3.bf16.msra.mxu0 %v1326_v22 }
  0x12   :  { %1361 = vmatpush3.bf16.msra.mxu1 %v1358_v23  ;;  %1331 = vmatprep.subr.bf16.mxu0 %v1330_v30 }
  0x13   :  { %1363 = vmatprep.subr.bf16.mxu1 %v1362_v31 }
  0x15   :  { %1333 = vmatpush3.bf16.msra.mxu0 %v1330_v30  ;;  %v863_v30 = vrot.slane %v232_v57, %v862_v26 }
  0x16   :  { %1365 = vmatpush3.bf16.msra.mxu1 %v1362_v31  ;;  %1335 = vmatprep.subr.bf16.mxu0 %v1334_v36 }
  0x17   :  { %1367 = vmatprep.subr.bf16.mxu1 %v1366_v37 }
  0x19   :  { %1337 = vmatpush3.bf16.msra.mxu0 %v1334_v36 }
  0x1a   :  { %1369 = vmatpush3.bf16.msra.mxu1 %v1366_v37  ;;  %1339 = vmatprep.subr.bf16.mxu0 %v1338_v42 }
  0x1b   :  { %1371 = vmatprep.subr.bf16.mxu1 %v1370_v43 }
  0x1d   :  { %1341 = vmatpush3.bf16.msra.mxu0 %v1338_v42  ;;  %v258_v42 = vand.u32 127, %v235_v54 }
  0x1e   :  { %1373 = vmatpush3.bf16.msra.mxu1 %v1370_v43  ;;  %1343 = vmatprep.subr.bf16.mxu0 %v1342_v48 }
  0x1f   :  { %1375 = vmatprep.subr.bf16.mxu1 %v1374_v49  ;;  %v263_v44 = vadd.s32 4294967288, %v258_v42  ;;  %v459_v8 = vadd.s32 4294967272, %v258_v42 }
  0x21   :  { %1345 = vmatpush3.bf16.msra.mxu0 %v1342_v48  ;;  %v1682_v47 = vsub.s32 %v263_v44, %v1644_v55 }
  0x22   :  { %1377 = vmatpush3.bf16.msra.mxu1 %v1374_v49  ;;  %v1685_v49 = vsub.s32 %v258_v42, %v1644_v55 }
  0x24   :  { %1232 = vmatmul.mubr.f32.vlgmr.msra.gmra.mrb[0].mxu0 %v35_v50 }
  0x25   :  { %1267 = vmatmul.mubr.f32.vlgmr.msra.gmra.mrb[0].mxu1 %v128_v51 }
  0x26   :  { %1269 = vmatprep.mubr.f32.mxu1 %v129_v52 }
  0x29   :  { %1270 = vmatmul.mubr.f32.gmra.mrb[2].mxu1 %v130_v53 }
  0xf7   :  { %v1233_v63 = vpop.f32.mrb[0].mxu0 }
  0xf8   :  { %v1653_v0 = vpop.f32.mrb[0].mxu1  ;;  %v118_v1 = vpop.f32.mrb[1].mxu0  ;;  %v250_v2 = vmul.f32 %v1233_v63, %v248_v59  ;;  %v418_v11 = vmul.f32 %v1233_v63, %v416_v3  ;;  %v240_v13 = vmul.f32 %v1233_v63, %v238_v7  ;;  %v881_v21 = vmul.f32 %v1233_v63, %v879_v19 }
  0xf9   :  { %v213_v4 = vpop.f32.mrb[1].mxu1  ;;  %v428_v5 = vmul.f32 %v1653_v0, %v426_v61  ;;  %v1656_v6 = vpack.c.bf16 %v1233_v63, %v118_v1  ;;  %v249_v17 = vmul.f32 %v248_v59, %v118_v1  ;;  %v626_v18 = vmul.f32 %v1653_v0, %v624_v14 }
  0xfa   :  { %253 = vadd.xlane.f32.xlu0 %v250_v2  ;;  %v1660_v9 = vpack.c.bf16 %v1653_v0, %v213_v4  ;;  %v625_v20 = vmul.f32 %v624_v14, %v213_v4  ;;  %v417_v22 = vmul.f32 %v416_v3, %v118_v1  ;;  %v427_v23 = vmul.f32 %v426_v61, %v213_v4 }
  0xfb   :  { %433 = vadd.xlane.f32.xlu1 %v428_v5  ;;  %1379 = vmatprep.subr.bf16.mxu0 %v1656_v6  ;;  %v880_v24 = vmul.f32 %v879_v19, %v118_v1  ;;  %v239_v25 = vmul.f32 %v238_v7, %v118_v1  ;;  %v864_v33 = vmul.f32 %v863_v30, %v213_v4  ;;  %v233_v5 = vld [vmem:[%s1925_s5] sm:$0xff] }
  0xfc   :  { %v1271_v10 = vpop.f32.mrb[2].mxu1  ;;  %1383 = vmatprep.subr.bf16.mxu1 %v1660_v9  ;;  %1381 = vmatpush3.bf16.msra.mxu0 %v1656_v6  ;;  %v609_v34 = vmul.f32 %v608_v32, %v213_v4  ;;  %v610_v36 = vmul.f32 %v1653_v0, %v608_v32  ;;  %v865_v37 = vmul.f32 %v1653_v0, %v863_v30  ;;  %v452_v4 = vadd.s32 4294967280, %v258_v42 }
  0xfd   :  { %v223_v12 = vpop.f32.mrb[3].mxu1  ;;  %1385 = vmatpush3.bf16.msra.mxu1 %v1660_v9  ;;  %1391 = vmatprep.subr.bf16.mxu0 %v1660_v9  ;;  %v430_v27 = vmul.f32 %v1271_v10, %v426_v61  ;;  %v628_v28 = vmul.f32 %v1271_v10, %v624_v14  ;;  %v612_v40 = vmul.f32 %v1271_v10, %v608_v32  ;;  %vm285_vm4 = vcmp.gt.f32.partialorder %v233_v5, 0.0 }
  0xfe   :  { %421 = vadd.xlane.f32.xlu0 %v418_v11  ;;  %v1668_v16 = vpack.c.bf16 %v1271_v10, %v223_v12  ;;  %v429_v31 = vmul.f32 %v426_v61, %v223_v12  ;;  %v627_v35 = vmul.f32 %v624_v14, %v223_v12  ;;  %v611_v38 = vmul.f32 %v608_v32, %v223_v12 }
  0xff   :  { %243 = vadd.xlane.f32.xlu1 %v240_v13  ;;  %v866_v39 = vmul.f32 %v863_v30, %v223_v12  ;;  %v867_v41 = vmul.f32 %v1271_v10, %v863_v30  ;;  %v455_v14 = vsub.s32 %v452_v4, %v1644_v55 }
 0x100   :  { %1387 = vmatprep.subr.bf16.mxu1 %v1668_v16 }
 0x101   :  { %1389 = vmatpush3.bf16.msra.mxu1 %v1668_v16 }
 0x102   :  { %1399 = vmatprep.subr.bf16.mxu1 %v1656_v6  ;;  %251 = vadd.xlane.f32.xlu0 %v249_v17  ;;  %v462_v17 = vsub.s32 %v459_v8, %v1644_v55 }
 0x103   :  { %631 = vadd.xlane.f32.xlu1 %v626_v18 }
 0x106   :  { %629 = vadd.xlane.f32.xlu0 %v625_v20 }
 0x107   :  { %884 = vadd.xlane.f32.xlu1 %v881_v21 }
 0x10a   :  { %419 = vadd.xlane.f32.xlu0 %v417_v22 }
 0x10b   :  { %431 = vadd.xlane.f32.xlu1 %v427_v23 }
 0x10e   :  { %882 = vadd.xlane.f32.xlu0 %v880_v24  ;;  %v856_v24 = vld [vmem:[%s1926_s8] sm:$0xff] }
 0x10f   :  { %241 = vadd.xlane.f32.xlu1 %v239_v25  ;;  %vm908_vm8 = vcmp.gt.f32.partialorder %v856_v24, 0.0 }
 0x112   :  { %437 = vadd.xlane.f32.xlu0 %v430_v27 }
 0x113   :  { %635 = vadd.xlane.f32.xlu1 %v628_v28 }
 0x116   :  { %435 = vadd.xlane.f32.xlu0 %v429_v31  ;;  %v411_v31 = vld [vmem:[%s1927_s7] sm:$0xff] }
 0x117   :  { %868 = vadd.xlane.f32.xlu1 %v864_v33  ;;  %vm475_vm10 = vcmp.gt.f32.partialorder %v411_v31, 0.0 }
 0x11a   :  { %613 = vadd.xlane.f32.xlu0 %v609_v34 }
 0x11b   :  { %633 = vadd.xlane.f32.xlu1 %v627_v35 }
 0x11e   :  { %615 = vadd.xlane.f32.xlu0 %v610_v36 }
 0x11f   :  { %870 = vadd.xlane.f32.xlu1 %v865_v37 }
 0x122   :  { %617 = vadd.xlane.f32.xlu0 %v611_v38 }
 0x123   :  { %872 = vadd.xlane.f32.xlu1 %v866_v39 }
 0x126   :  { %619 = vadd.xlane.f32.xlu0 %v612_v40 }
 0x127   :  { %874 = vadd.xlane.f32.xlu1 %v867_v41 }
 0x187   :  { %v254_v43 = vpop.xlane.xlu0 %253 }
 0x188   :  { %v434_v45 = vpop.xlane.xlu1 %433  ;;  %v267_v51 = vrot.slane %v254_v43, %v1682_v47 }
 0x189   :  { %v450_v21 = vrot.slane %v434_v45, %v1682_v47 }
 0x18b   :  { %v1679_v46 = vpop.xlane.xlu0 %421 }
 0x18c   :  { %v244_v48 = vpop.xlane.xlu1 %243 }
 0x18f   :  { %v252_v50 = vpop.xlane.xlu0 %251 }
 0x190   :  { %v1688_v52 = vpop.xlane.xlu1 %631  ;;  %v262_v53 = vrot.slane %v252_v50, %v1685_v49  ;;  %v412_v50 = vld [vmem:[%s1927_s7 + $0x8] sm:$0xff] }
 0x191   :  { %v648_v33 = vrot.slane %v1688_v52, %v1682_v47  ;;  %vm476_vm15 = vcmp.gt.f32.partialorder %v412_v50, 0.0 }
 0x192   :  { %v269_v54 = vsel %vm268_vm0, %v267_v51, %v262_v53 }
 0x193   :  { %v284_v57 = vadd.f32 %v269_v54, %v244_v48  ;;  %v630_v58 = vpop.xlane.xlu0 %629 }
 0x194   :  { %v885_v59 = vpop.xlane.xlu1 %884  ;;  %v644_v27 = vrot.slane %v630_v58, %v1685_v49 }
 0x195   :  { %vm288_vm2 = vcmp.gt.f32.partialorder %v284_v57, 0.0  ;;  %v290_v60 = vmul.f32 0.2, %v284_v57  ;;  %v895_v19 = vrot.slane %v885_v59, %v1682_v47  ;;  %v601_v59 = vld [vmem:[%s1928_s6] sm:$0xff] }
 0x196   :  { %v649_v40 = vsel %vm268_vm0, %v648_v33, %v644_v27 }
 0x197   :  { %v420_v61 = vpop.xlane.xlu0 %419  ;;  %v292_v62 = vsel %vm288_vm2, %v284_v57, %v290_v60  ;;  %vm671_vm2 = vcmp.gt.f32.partialorder %v601_v59, 0.0 }
 0x198   :  { %v432_v63 = vpop.xlane.xlu1 %431  ;;  %v1695_v0 = vsel %vm286_vm1, %v292_v62, -9e+15  ;;  %v602_v62 = vld [vmem:[%s1928_s6 + $0x8] sm:$0xff] }
 0x199   :  { %v299_v1 = vsel %vm295_vm3, %v1695_v0, -inf  ;;  %v446_v15 = vrot.slane %v432_v63, %v1685_v49 }
 0x19a   :  { %300 = vmax.xlane.f32.xlu1 %v299_v1 }
 0x19b   :  { %v883_v2 = vpop.xlane.xlu0 %882  ;;  %v451_v28 = vsel %vm268_vm0, %v450_v21, %v446_v15 }
 0x19c   :  { %v242_v3 = vpop.xlane.xlu1 %241  ;;  %v891_v12 = vrot.slane %v883_v2, %v1685_v49 }
 0x19d   :  { %v283_v7 = vadd.f32 %v269_v54, %v242_v3 }
 0x19e   :  { %v1716_v55 = vsel %vm268_vm0, %v895_v19, %v891_v12 }
 0x19f   :  { %v289_v10 = vmul.f32 0.2, %v283_v7  ;;  %v438_v11 = vpop.xlane.xlu0 %437  ;;  %vm287_vm5 = vcmp.gt.f32.partialorder %v283_v7, 0.0 }
 0x1a0   :  { %v636_v13 = vpop.xlane.xlu1 %635  ;;  %v463_v29 = vrot.slane %v438_v11, %v462_v17 }
 0x1a1   :  { %v291_v18 = vsel %vm287_vm5, %v283_v7, %v289_v10  ;;  %v658_v43 = vrot.slane %v636_v13, %v462_v17  ;;  %vm672_vm5 = vcmp.gt.f32.partialorder %v602_v62, 0.0  ;;  %v858_v17 = vld [vmem:[%s1926_s8 + $0x10] sm:$0xff] }
 0x1a2   :  { %v1707_v20 = vsel %vm285_vm4, %v291_v18, -9e+15 }
 0x1a3   :  { %v436_v22 = vpop.xlane.xlu0 %435  ;;  %v296_v23 = vsel %vm295_vm3, %v1707_v20, -inf }
 0x1a4   :  { %v456_v25 = vrot.slane %v436_v22, %v455_v14  ;;  %297 = vmax.xlane.f32.xlu0 %v296_v23  ;;  %v869_v26 = vpop.xlane.xlu1 %868  ;;  %v603_v23 = vld [vmem:[%s1928_s6 + $0x10] sm:$0xff] }
 0x1a5   :  { %v904_v30 = vadd.f32 %v1716_v55, %v869_v26 }
 0x1a6   :  { %v458_v32 = vsel %vm457_vm6, %v456_v25, %v451_v28 }
 0x1a7   :  { %v916_v34 = vmul.f32 0.2, %v904_v30  ;;  %v614_v35 = vpop.xlane.xlu0 %613  ;;  %vm912_vm9 = vcmp.gt.f32.partialorder %v904_v30, 0.0  ;;  %v465_v36 = vsel %vm464_vm7, %v463_v29, %v458_v32  ;;  %v859_v32 = vld [vmem:[%s1926_s8 + $0x18] sm:$0xff] }
 0x1a8   :  { %v634_v37 = vpop.xlane.xlu1 %633  ;;  %v473_v38 = vadd.f32 %v465_v36, %v420_v61  ;;  %v474_v39 = vadd.f32 %v465_v36, %v1679_v46  ;;  %v857_v46 = vld [vmem:[%s1926_s8 + $0x8] sm:$0xff] }
 0x1a9   :  { %v653_v41 = vrot.slane %v634_v37, %v455_v14  ;;  %v920_v42 = vsel %vm912_vm9, %v904_v30, %v916_v34  ;;  %vm909_vm14 = vcmp.gt.f32.partialorder %v857_v46, 0.0  ;;  %vm673_vm9 = vcmp.gt.f32.partialorder %v603_v23, 0.0 }
 0x1aa   :  { %v1730_v44 = vsel %vm908_vm8, %v920_v42, -9e+15  ;;  %vm477_vm12 = vcmp.gt.f32.partialorder %v473_v38, 0.0  ;;  %v479_v45 = vmul.f32 0.2, %v473_v38  ;;  %vm478_vm13 = vcmp.gt.f32.partialorder %v474_v39, 0.0 }
 0x1ab   :  { %v654_v47 = vsel %vm457_vm6, %v653_v41, %v649_v40  ;;  %v616_v48 = vpop.xlane.xlu0 %615  ;;  %v928_v49 = vsel %vm295_vm3, %v1730_v44, -inf  ;;  %v480_v51 = vmul.f32 0.2, %v474_v39  ;;  %vm910_vm8 = vcmp.gt.f32.partialorder %v858_v17, 0.0 }
 0x1ac   :  { %v659_v52 = vsel %vm464_vm7, %v658_v43, %v654_v47  ;;  %929 = vmax.xlane.f32.xlu1 %v928_v49  ;;  %v871_v53 = vpop.xlane.xlu1 %870  ;;  %v481_v54 = vsel %vm477_vm12, %v473_v38, %v479_v45 }
 0x1ad   :  { %v668_v56 = vadd.f32 %v659_v52, %v616_v48  ;;  %v905_v57 = vadd.f32 %v1716_v55, %v871_v53  ;;  %v1744_v58 = vsel %vm475_vm10, %v481_v54, -9e+15  ;;  %v667_v60 = vadd.f32 %v659_v52, %v614_v35 }
 0x1ae   :  { %v486_v61 = vsel %vm485_vm11, %v1744_v58, -inf  ;;  %v482_v63 = vsel %vm478_vm13, %v474_v39, %v480_v51  ;;  %vm911_vm13 = vcmp.gt.f32.partialorder %v859_v32, 0.0 }
 0x1af   :  { %v680_v1 = vmul.f32 0.2, %v668_v56  ;;  %v917_v2 = vmul.f32 0.2, %v905_v57  ;;  %v618_v3 = vpop.xlane.xlu0 %617  ;;  %487 = vmax.xlane.f32.xlu0 %v486_v61  ;;  %vm675_vm0 = vcmp.gt.f32.partialorder %v667_v60, 0.0  ;;  %vm913_vm1 = vcmp.gt.f32.partialorder %v905_v57, 0.0 }
 0x1b0   :  { %v669_v4 = vadd.f32 %v659_v52, %v618_v3  ;;  %v873_v5 = vpop.xlane.xlu1 %872  ;;  %v679_v7 = vmul.f32 0.2, %v667_v60  ;;  %vm676_vm4 = vcmp.gt.f32.partialorder %v668_v56, 0.0  ;;  %v1756_v11 = vsel %vm476_vm15, %v482_v63, -9e+15 }
 0x1b1   :  { %v906_v8 = vadd.f32 %v1716_v55, %v873_v5  ;;  %v921_v10 = vsel %vm913_vm1, %v905_v57, %v917_v2  ;;  %v684_v15 = vsel %vm676_vm4, %v668_v56, %v680_v1  ;;  %v489_v34 = vsel %vm485_vm11, %v1756_v11, -inf }
 0x1b2   :  { %v681_v12 = vmul.f32 0.2, %v669_v4  ;;  %v683_v13 = vsel %vm675_vm0, %v667_v60, %v679_v7  ;;  %v1759_v14 = vsel %vm909_vm14, %v921_v10, -9e+15  ;;  %vm677_vm6 = vcmp.gt.f32.partialorder %v669_v4, 0.0 }
 0x1b3   :  { %v918_v18 = vmul.f32 0.2, %v906_v8  ;;  %v620_v19 = vpop.xlane.xlu0 %619  ;;  %v1764_v21 = vsel %vm671_vm2, %v683_v13, -9e+15  ;;  %v931_v22 = vsel %vm295_vm3, %v1759_v14, -inf  ;;  %vm914_vm7 = vcmp.gt.f32.partialorder %v906_v8, 0.0 }
 0x1b4   :  { %v670_v24 = vadd.f32 %v659_v52, %v620_v19  ;;  %v691_v25 = vsel %vm485_vm11, %v1764_v21, -inf  ;;  %932 = vmax.xlane.f32.xlu1 %v931_v22  ;;  %v875_v26 = vpop.xlane.xlu1 %874  ;;  %v1775_v28 = vsel %vm672_vm5, %v684_v15, -9e+15  ;;  %v685_v31 = vsel %vm677_vm6, %v669_v4, %v681_v12 }
 0x1b5   :  { %692 = vmax.xlane.f32.xlu0 %v691_v25  ;;  %v907_v27 = vadd.f32 %v1716_v55, %v875_v26  ;;  %v922_v29 = vsel %vm914_vm7, %v906_v8, %v918_v18  ;;  %v604_v55 = vld [vmem:[%s1928_s6 + $0x18] sm:$0xff]  ;;  %v694_v35 = vsel %vm485_vm11, %v1775_v28, -inf  ;;  %v1789_v37 = vsel %vm673_vm9, %v685_v31, -9e+15 }
 0x1b6   :  { %v682_v30 = vmul.f32 0.2, %v670_v24  ;;  %vm678_vm10 = vcmp.gt.f32.partialorder %v670_v24, 0.0  ;;  %v1787_v36 = vsel %vm910_vm8, %v922_v29, -9e+15  ;;  %vm674_vm14 = vcmp.gt.f32.partialorder %v604_v55, 0.0 }
 0x1b7   :  { %v919_v33 = vmul.f32 0.2, %v907_v27  ;;  %vm915_vm12 = vcmp.gt.f32.partialorder %v907_v27, 0.0  ;;  %v934_v40 = vsel %vm295_vm3, %v1787_v36, -inf  ;;  %v697_v41 = vsel %vm485_vm11, %v1789_v37, -inf }
 0x1b8   :  { %490 = vmax.xlane.f32.xlu1 %v489_v34  ;;  %v686_v39 = vsel %vm678_vm10, %v670_v24, %v682_v30 }
 0x1b9   :  { %695 = vmax.xlane.f32.xlu0 %v694_v35  ;;  %v923_v38 = vsel %vm915_vm12, %v907_v27, %v919_v33  ;;  %v1797_v43 = vsel %vm674_vm14, %v686_v39, -9e+15 }
 0x1ba   :  { %v1795_v42 = vsel %vm911_vm13, %v923_v38, -9e+15  ;;  %v700_v47 = vsel %vm485_vm11, %v1797_v43, -inf }
 0x1bb   :  { %v937_v45 = vsel %vm295_vm3, %v1795_v42, -inf }
 0x1bc   :  { %935 = vmax.xlane.f32.xlu1 %v934_v40 }
 0x1bd   :  { %698 = vmax.xlane.f32.xlu0 %v697_v41 }
 0x1c0   :  { %938 = vmax.xlane.f32.xlu1 %v937_v45 }
 0x1c1   :  { %701 = vmax.xlane.f32.xlu0 %v700_v47 }
 0x227   :  { %v301_v48 = vpop.xlane.xlu1 %300 }
 0x228   :  { %v303_v49 = vsub.f32 %v1695_v0, %v301_v48 }
 0x22a   :  { %v306_v46 = vmul.f32 1.442695, %v303_v49 }
 0x22c   :  { %1402 = vpow2.f32 %v306_v46 }
 0x231   :  { %v298_v50 = vpop.xlane.xlu0 %297 }
 0x232   :  { %v302_v51 = vsub.f32 %v1707_v20, %v298_v50 }
 0x234   :  { %v304_v52 = vmul.f32 1.442695, %v302_v51 }
 0x236   :  { %v1805_v53 = vpop.eup %1402  ;;  %1404 = vpow2.f32 %v304_v52 }
 0x237   :  { %v311_v54 = vsel %vm295_vm3, %v1805_v53, 0.0 }
 0x238   :  { %312 = vadd.xlane.f32.xlu1 %v311_v54 }
 0x239   :  { %v930_v56 = vpop.xlane.xlu1 %929 }
 0x23a   :  { %v940_v57 = vsub.f32 %v1730_v44, %v930_v56 }
 0x23c   :  { %v944_v59 = vmul.f32 1.442695, %v940_v57  ;;  %v488_v60 = vpop.xlane.xlu0 %487 }
 0x23d   :  { %v492_v0 = vsub.f32 %v1744_v58, %v488_v60 }
 0x23e   :  { %1406 = vpow2.f32 %v944_v59 }
 0x23f   :  { %v494_v61 = vmul.f32 1.442695, %v492_v0 }
 0x240   :  { %v1811_v62 = vpop.eup %1404 }
 0x241   :  { %1408 = vpow2.f32 %v494_v61  ;;  %v933_v20 = vpop.xlane.xlu1 %932  ;;  %v308_v63 = vsel %vm295_vm3, %v1811_v62, 0.0 }
 0x242   :  { %v693_v1 = vpop.xlane.xlu0 %692  ;;  %v941_v2 = vsub.f32 %v1759_v14, %v933_v20  ;;  %309 = vadd.xlane.f32.xlu0 %v308_v63 }
 0x243   :  { %v703_v3 = vsub.f32 %v1764_v21, %v693_v1 }
 0x244   :  { %v946_v44 = vmul.f32 1.442695, %v941_v2 }
 0x245   :  { %v707_v4 = vmul.f32 1.442695, %v703_v3  ;;  %v491_v5 = vpop.xlane.xlu1 %490 }
 0x246   :  { %1410 = vpow2.f32 %v946_v44  ;;  %v696_v58 = vpop.xlane.xlu0 %695  ;;  %v493_v7 = vsub.f32 %v1756_v11, %v491_v5 }
 0x247   :  { %1412 = vpow2.f32 %v707_v4  ;;  %v704_v8 = vsub.f32 %v1775_v28, %v696_v58 }
 0x248   :  { %v1819_v10 = vpop.eup %1406  ;;  %v496_v12 = vmul.f32 1.442695, %v493_v7 }
 0x249   :  { %v709_v13 = vmul.f32 1.442695, %v704_v8  ;;  %v936_v15 = vpop.xlane.xlu1 %935  ;;  %v952_v14 = vsel %vm295_vm3, %v1819_v10, 0.0 }
 0x24a   :  { %1414 = vpow2.f32 %v496_v12  ;;  %v699_v17 = vpop.xlane.xlu0 %698  ;;  %v942_v18 = vsub.f32 %v1787_v36, %v936_v15  ;;  %953 = vadd.xlane.f32.xlu1 %v952_v14 }
 0x24b   :  { %v1824_v19 = vpop.eup %1408  ;;  %1416 = vpow2.f32 %v709_v13  ;;  %v705_v11 = vsub.f32 %v1789_v37, %v699_v17 }
 0x24c   :  { %v948_v21 = vmul.f32 1.442695, %v942_v18  ;;  %v498_v22 = vsel %vm485_vm11, %v1824_v19, 0.0 }
 0x24d   :  { %v711_v23 = vmul.f32 1.442695, %v705_v11  ;;  %v939_v24 = vpop.xlane.xlu1 %938  ;;  %499 = vadd.xlane.f32.xlu0 %v498_v22 }
 0x24e   :  { %1418 = vpow2.f32 %v948_v21  ;;  %v702_v25 = vpop.xlane.xlu0 %701  ;;  %v943_v26 = vsub.f32 %v1795_v42, %v939_v24 }
 0x24f   :  { %1420 = vpow2.f32 %v711_v23  ;;  %v706_v27 = vsub.f32 %v1797_v43, %v702_v25 }
 0x250   :  { %v1831_v28 = vpop.eup %1410  ;;  %v950_v29 = vmul.f32 1.442695, %v943_v26 }
 0x251   :  { %v1413_v30 = vpop.eup %1412  ;;  %v713_v31 = vmul.f32 1.442695, %v706_v27  ;;  %v955_v32 = vsel %vm295_vm3, %v1831_v28, 0.0 }
 0x252   :  { %1422 = vpow2.f32 %v950_v29  ;;  %v715_v33 = vsel %vm485_vm11, %v1413_v30, 0.0  ;;  %956 = vadd.xlane.f32.xlu1 %v955_v32 }
 0x253   :  { %1424 = vpow2.f32 %v713_v31  ;;  %716 = vadd.xlane.f32.xlu0 %v715_v33 }
 0x254   :  { %v1415_v34 = vpop.eup %1414 }
 0x255   :  { %v1417_v55 = vpop.eup %1416  ;;  %v501_v35 = vsel %vm485_vm11, %v1415_v34, 0.0 }
 0x256   :  { %v718_v36 = vsel %vm485_vm11, %v1417_v55, 0.0  ;;  %502 = vadd.xlane.f32.xlu1 %v501_v35 }
 0x257   :  { %719 = vadd.xlane.f32.xlu0 %v718_v36 }
 0x258   :  { %v1838_v37 = vpop.eup %1418 }
 0x259   :  { %v1840_v38 = vpop.eup %1420  ;;  %v958_v39 = vsel %vm295_vm3, %v1838_v37, 0.0 }
 0x25a   :  { %v721_v40 = vsel %vm485_vm11, %v1840_v38, 0.0  ;;  %959 = vadd.xlane.f32.xlu1 %v958_v39 }
 0x25b   :  { %722 = vadd.xlane.f32.xlu0 %v721_v40 }
 0x25c   :  { %v1846_v41 = vpop.eup %1422 }
 0x25d   :  { %v1848_v42 = vpop.eup %1424  ;;  %v961_v43 = vsel %vm295_vm3, %v1846_v41, 0.0 }
 0x25e   :  { %v724_v45 = vsel %vm485_vm11, %v1848_v42, 0.0  ;;  %962 = vadd.xlane.f32.xlu1 %v961_v43 }
 0x25f   :  { %725 = vadd.xlane.f32.xlu0 %v724_v45 }
 0x2c5   :  { %v313_v47 = vpop.xlane.xlu1 %312 }
 0x2c6   :  { %1426 = vrcp.f32 %v313_v47 }
 0x2cf   :  { %v310_v48 = vpop.xlane.xlu0 %309 }
 0x2d0   :  { %1428 = vrcp.f32 %v310_v48  ;;  %v1427_v49 = vpop.eup %1426 }
 0x2d1   :  { %v317_v54 = vmul.f32 %v1427_v49, %v1805_v53 }
 0x2d7   :  { %v954_v51 = vpop.xlane.xlu1 %953 }
 0x2da   :  { %v1429_v46 = vpop.eup %1428  ;;  %v500_v50 = vpop.xlane.xlu0 %499 }
 0x2db   :  { %1430 = vrcp.f32 %v500_v50  ;;  %v316_v52 = vmul.f32 %v1429_v46, %v1811_v62 }
 0x2dd   :  { %1276 = vmatprep.mubr.msk.f32.mxu0 %vm295_vm3, %v316_v52 }
 0x2de   :  { %1277 = vmatmul.mubr.msk.f32.vlgmr.msra.gmra.mrb[2].mxu0 %vm295_vm3, %v317_v54 }
 0x2df   :  { %1393 = vmatpush3.bf16.msra.mxu0 %v1660_v9  ;;  %v957_v56 = vpop.xlane.xlu1 %956 }
 0x2e0   :  { %v717_v57 = vpop.xlane.xlu0 %716  ;;  %1395 = vmatprep.subr.bf16.mxu0 %v1668_v16 }
 0x2e1   :  { %1432 = vrcp.f32 %v717_v57 }
 0x2e2   :  { %1434 = vrcp.f32 %v954_v51 }
 0x2e3   :  { %1397 = vmatpush3.bf16.msra.mxu0 %v1668_v16  ;;  %v503_v59 = vpop.xlane.xlu1 %502 }
 0x2e4   :  { %v720_v60 = vpop.xlane.xlu0 %719  ;;  %1436 = vrcp.f32 %v503_v59 }
 0x2e5   :  { %v1431_v0 = vpop.eup %1430  ;;  %1438 = vrcp.f32 %v720_v60 }
 0x2e6   :  { %1440 = vrcp.f32 %v957_v56  ;;  %v506_v53 = vmul.f32 %v1431_v0, %v1824_v19 }
 0x2e7   :  { %v960_v61 = vpop.xlane.xlu1 %959 }
 0x2e8   :  { %v723_v62 = vpop.xlane.xlu0 %722  ;;  %1442 = vrcp.f32 %v960_v61  ;;  %1287 = vmatprep.mubr.msk.f32.mxu1 %vm485_vm11, %v506_v53 }
 0x2e9   :  { %1444 = vrcp.f32 %v723_v62 }
 0x2eb   :  { %v1433_v9 = vpop.eup %1432  ;;  %v963_v20 = vpop.xlane.xlu1 %962 }
 0x2ec   :  { %v726_v63 = vpop.xlane.xlu0 %725  ;;  %1446 = vrcp.f32 %v963_v20  ;;  %v731_v1 = vmul.f32 %v1433_v9, %v1413_v30  ;;  %v1435_v16 = vpop.eup %1434 }
 0x2ed   :  { %1448 = vrcp.f32 %v726_v63  ;;  %v968_v58 = vmul.f32 %v1435_v16, %v1819_v10 }
 0x2ee   :  { %v1437_v2 = vpop.eup %1436  ;;  %1298 = vmatprep.mubr.msk.f32.mxu0 %vm485_vm11, %v731_v1 }
 0x2ef   :  { %v1439_v3 = vpop.eup %1438  ;;  %v507_v44 = vmul.f32 %v1437_v2, %v1415_v34 }
 0x2f0   :  { %v1441_v4 = vpop.eup %1440  ;;  %v732_v5 = vmul.f32 %v1439_v3, %v1417_v55 }
 0x2f1   :  { %1288 = vmatmul.mubr.msk.f32.vlgmr.msra.gmra.mrb[4].mxu1 %vm485_vm11, %v507_v44  ;;  %v969_v12 = vmul.f32 %v1441_v4, %v1831_v28 }
 0x2f2   :  { %v1443_v7 = vpop.eup %1442  ;;  %1299 = vmatmul.mubr.msk.f32.vlgmr.msra.gmra.mrb[4].mxu0 %vm485_vm11, %v732_v5  ;;  %1401 = vmatpush3.bf16.msra.mxu1 %v1656_v6 }
 0x2f3   :  { %v1445_v8 = vpop.eup %1444  ;;  %1308 = vmatprep.mubr.msk.f32.mxu1 %vm295_vm3, %v968_v58  ;;  %v970_v13 = vmul.f32 %v1443_v7, %v1838_v37 }
 0x2f4   :  { %v733_v15 = vmul.f32 %v1445_v8, %v1840_v38 }
 0x2f5   :  { %1309 = vmatmul.mubr.msk.f32.vlgmr.msra.gmra.mrb[6].mxu1 %vm295_vm3, %v969_v12 }
 0x2f6   :  { %v1447_v14 = vpop.eup %1446  ;;  %1301 = vmatprep.mubr.msk.f32.mxu0 %vm485_vm11, %v733_v15  ;;  %1311 = vmatprep.mubr.msk.f32.mxu1 %vm295_vm3, %v970_v13 }
 0x2f7   :  { %v1449_v10 = vpop.eup %1448  ;;  %v971_v17 = vmul.f32 %v1447_v14, %v1846_v41 }
 0x2f8   :  { %v734_v6 = vmul.f32 %v1449_v10, %v1848_v42 }
 0x2f9   :  { %1312 = vmatmul.mubr.msk.f32.gmra.mrb[8].mxu1 %vm295_vm3, %v971_v17 }
 0x2fa   :  { %1302 = vmatmul.mubr.msk.f32.gmra.mrb[6].mxu0 %vm485_vm11, %v734_v6 }
 0x3b1   :  { %v1278_v18 = vpop.f32.mrb[2].mxu0 }
 0x3b2   :  { %v402_v19 = vmin.f32 %v1278_v18, 0.0  ;;  %v390_v11 = vpop.f32.mrb[3].mxu0  ;;  %vm400_vm15 = vcmp.gt.f32.partialorder %v1278_v18, 0.0 }
 0x3b3   :  { %v401_v21 = vmin.f32 %v390_v11, 0.0  ;;  %vm399_vm0 = vcmp.gt.f32.partialorder %v390_v11, 0.0 }
 0x3b4   :  { %v405_v22 = vmul.f32 1.442695, %v402_v19 }
 0x3b5   :  { %v403_v23 = vmul.f32 1.442695, %v401_v21 }
 0x3b6   :  { %1450 = vpow2.f32 %v405_v22 }
 0x3b7   :  { %1452 = vpow2.f32 %v403_v23 }
 0x3c0   :  { %v1451_v24 = vpop.eup %1450 }
 0x3c1   :  { %v1453_v25 = vpop.eup %1452  ;;  %v1116_v26 = vadd.f32 -1.0, %v1451_v24 }
 0x3c2   :  { %v1115_v27 = vadd.f32 -1.0, %v1453_v25 }
 0x3c3   :  { %v410_v28 = vsel %vm400_vm15, %v1278_v18, %v1116_v26 }
 0x3c4   :  { %1094 = vst [vmem:[%s1929_s9 + $0x10] sm:$0xff] %v410_v28  ;;  %v409_v29 = vsel %vm399_vm0, %v390_v11, %v1115_v27  ;;  %v1289_v30 = vpop.f32.mrb[4].mxu1 }
 0x3c5   :  { %1093 = vst [vmem:[%s1929_s9] sm:$0xff] %v409_v29  ;;  %v592_v31 = vmin.f32 %v1289_v30, 0.0  ;;  %v1300_v32 = vpop.f32.mrb[4].mxu0  ;;  %v580_v33 = vpop.f32.mrb[5].mxu1  ;;  %vm590_vm3 = vcmp.gt.f32.partialorder %v1289_v30, 0.0 }
 0x3c6   :  { %v837_v34 = vmin.f32 %v1300_v32, 0.0  ;;  %v591_v55 = vmin.f32 %v580_v33, 0.0  ;;  %v813_v35 = vpop.f32.mrb[5].mxu0  ;;  %vm833_vm11 = vcmp.gt.f32.partialorder %v1300_v32, 0.0  ;;  %vm589_vm1 = vcmp.gt.f32.partialorder %v580_v33, 0.0 }
 0x3c7   :  { %v595_v36 = vmul.f32 1.442695, %v592_v31  ;;  %v836_v37 = vmin.f32 %v813_v35, 0.0  ;;  %vm832_vm2 = vcmp.gt.f32.partialorder %v813_v35, 0.0 }
 0x3c8   :  { %v842_v38 = vmul.f32 1.442695, %v837_v34  ;;  %v593_v39 = vmul.f32 1.442695, %v591_v55  ;;  %v1310_v40 = vpop.f32.mrb[6].mxu1 }
 0x3c9   :  { %1454 = vpow2.f32 %v595_v36  ;;  %v840_v41 = vmul.f32 1.442695, %v836_v37  ;;  %v1074_v42 = vmin.f32 %v1310_v40, 0.0  ;;  %v1050_v43 = vpop.f32.mrb[7].mxu1  ;;  %vm1070_vm4 = vcmp.gt.f32.partialorder %v1310_v40, 0.0 }
 0x3ca   :  { %1456 = vpow2.f32 %v842_v38  ;;  %v1073_v45 = vmin.f32 %v1050_v43, 0.0  ;;  %vm1069_vm5 = vcmp.gt.f32.partialorder %v1050_v43, 0.0 }
 0x3cb   :  { %1458 = vpow2.f32 %v593_v39  ;;  %v1079_v47 = vmul.f32 1.442695, %v1074_v42 }
 0x3cc   :  { %1460 = vpow2.f32 %v840_v41  ;;  %v1077_v48 = vmul.f32 1.442695, %v1073_v45  ;;  %v1313_v49 = vpop.f32.mrb[8].mxu1 }
 0x3cd   :  { %1462 = vpow2.f32 %v1079_v47  ;;  %v1303_v46 = vpop.f32.mrb[6].mxu0  ;;  %v1076_v50 = vmin.f32 %v1313_v49, 0.0  ;;  %v1885_v51 = vpop.f32.mrb[9].mxu1  ;;  %vm1072_vm6 = vcmp.gt.f32.partialorder %v1313_v49, 0.0 }
 0x3ce   :  { %1464 = vpow2.f32 %v1077_v48  ;;  %v839_v52 = vmin.f32 %v1303_v46, 0.0  ;;  %v823_v54 = vpop.f32.mrb[7].mxu0  ;;  %v1075_v59 = vmin.f32 %v1885_v51, 0.0  ;;  %vm835_vm7 = vcmp.gt.f32.partialorder %v1303_v46, 0.0 }
 0x3cf   :  { %v1083_v56 = vmul.f32 1.442695, %v1076_v50  ;;  %v838_v57 = vmin.f32 %v823_v54, 0.0  ;;  %vm834_vm8 = vcmp.gt.f32.partialorder %v823_v54, 0.0  ;;  %vm1071_vm9 = vcmp.gt.f32.partialorder %v1885_v51, 0.0 }
 0x3d0   :  { %v846_v60 = vmul.f32 1.442695, %v839_v52  ;;  %v1081_v53 = vmul.f32 1.442695, %v1075_v59 }
 0x3d1   :  { %1466 = vpow2.f32 %v1083_v56  ;;  %v844_v0 = vmul.f32 1.442695, %v838_v57 }
 0x3d2   :  { %1468 = vpow2.f32 %v846_v60 }
 0x3d3   :  { %v1455_v61 = vpop.eup %1454  ;;  %1470 = vpow2.f32 %v844_v0 }
 0x3d4   :  { %v1457_v62 = vpop.eup %1456  ;;  %v1120_v9 = vadd.f32 -1.0, %v1455_v61  ;;  %1472 = vpow2.f32 %v1081_v53 }
 0x3d5   :  { %v1459_v20 = vpop.eup %1458  ;;  %v1126_v63 = vadd.f32 -1.0, %v1457_v62 }
 0x3d6   :  { %v1461_v1 = vpop.eup %1460  ;;  %v600_v16 = vsel %vm590_vm3, %v1289_v30, %v1120_v9  ;;  %v1119_v2 = vadd.f32 -1.0, %v1459_v20 }
 0x3d7   :  { %v1463_v3 = vpop.eup %1462  ;;  %1096 = vst [vmem:[%s1929_s9 + $0x18] sm:$0xff] %v600_v16  ;;  %v853_v44 = vsel %vm833_vm11, %v1300_v32, %v1126_v63  ;;  %v1125_v4 = vadd.f32 -1.0, %v1461_v1 }
 0x3d8   :  { %v1465_v5 = vpop.eup %1464  ;;  %1098 = vst [vmem:[%s1930_s10 + $0x10] sm:$0xff] %v853_v44  ;;  %v599_v58 = vsel %vm589_vm1, %v580_v33, %v1119_v2  ;;  %v1134_v7 = vadd.f32 -1.0, %v1463_v3 }
 0x3d9   :  { %1095 = vst [vmem:[%s1929_s9 + $0x8] sm:$0xff] %v599_v58  ;;  %v852_v8 = vsel %vm832_vm2, %v813_v35, %v1125_v4  ;;  %v1133_v12 = vadd.f32 -1.0, %v1465_v5 }
 0x3da   :  { %1097 = vst [vmem:[%s1930_s10] sm:$0xff] %v852_v8  ;;  %v1090_v13 = vsel %vm1070_vm4, %v1310_v40, %v1134_v7 }
 0x3db   :  { %v1467_v15 = vpop.eup %1466  ;;  %1102 = vst [vmem:[%s1930_s10 + $0x18] sm:$0xff] %v1090_v13  ;;  %v1089_v14 = vsel %vm1069_vm5, %v1050_v43, %v1133_v12 }
 0x3dc   :  { %v1469_v10 = vpop.eup %1468  ;;  %1101 = vst [vmem:[%s1930_s10 + $0x8] sm:$0xff] %v1089_v14  ;;  %v1136_v17 = vadd.f32 -1.0, %v1467_v15 }
 0x3dd   :  { %v1471_v6 = vpop.eup %1470  ;;  %v1128_v18 = vadd.f32 -1.0, %v1469_v10 }
 0x3de   :  { %v1473_v19 = vpop.eup %1472  ;;  %v1092_v11 = vsel %vm1072_vm6, %v1313_v49, %v1136_v17  ;;  %v1127_v21 = vadd.f32 -1.0, %v1471_v6 }
 0x3df   :  { %v855_v22 = vsel %vm835_vm7, %v1303_v46, %v1128_v18  ;;  %1104 = vst [vmem:[%s1930_s10 + $0x38] sm:$0xff] %v1092_v11  ;;  %v1135_v23 = vadd.f32 -1.0, %v1473_v19 }
 0x3e0   :  { %1100 = vst [vmem:[%s1930_s10 + $0x30] sm:$0xff] %v855_v22  ;;  %v854_v24 = vsel %vm834_vm8, %v823_v54, %v1127_v21 }
 0x3e1   :  { %1099 = vst [vmem:[%s1930_s10 + $0x20] sm:$0xff] %v854_v24  ;;  %v1091_v25 = vsel %vm1071_vm9, %v1885_v51, %v1135_v23 }
 0x3e2   :  { %1103 = vst [vmem:[%s1930_s10 + $0x28] sm:$0xff] %v1091_v25 }

// kernel: gat_forward.8
= control target key start
LH: loop header
LB: loop body
LE: loop exit
PB: predicated region body
PF: predicated region fallthrough
CT: control target
= control target key end

     0   :  { %v1839_v3 = vmov 0.0   ;;  %vm129_vm0 = vcmask 130048   ;;  %vm306_vm1 = vcmask 523264   ;;  %vm687_vm2 = vcmask 261120   ;;  %s2448_s0 = inlined_call_operand.vmem [shape: f32[16,256], index: 0, kind: input, shape index: {}]   ;;  %s2449_s4 = inlined_call_operand.vmem [shape: f32[256,64], index: 4, kind: input, shape index: {}]   ;;  %s2450_s2 = inlined_call_operand.vmem [shape: f32[16,16], index: 2, kind: input, shape index: {}]   ;;  %s2451_s7 = inlined_call_operand.vmem [shape: f32[64,64], index: 7, kind: input, shape index: {}]   ;;  %s2452_s5 = inlined_call_operand.vmem [shape: f32[1,64], index: 5, kind: input, shape index: {}]   ;;  %s2453_s6 = inlined_call_operand.vmem [shape: f32[1,64], index: 6, kind: input, shape index: {}]   ;;  %s2454_s8 = inlined_call_operand.vmem [shape: f32[1,64], index: 8, kind: input, shape index: {}]   ;;  %s2455_s9 = inlined_call_operand.vmem [shape: f32[1,64], index: 9, kind: input, shape index: {}]   ;;  %s2456_s10 = inlined_call_operand.vmem [shape: f32[64,64], index: 10, kind: input, shape index: {}]   ;;  %s2457_s1 = inlined_call_operand.vmem [shape: f32[32,256], index: 1, kind: input, shape index: {}]   ;;  %s2458_s13 = inlined_call_operand.vmem [shape: f32[64,64], index: 13, kind: input, shape index: {}]   ;;  %s2459_s3 = inlined_call_operand.vmem [shape: f32[32,32], index: 3, kind: input, shape index: {}]   ;;  %s2460_s11 = inlined_call_operand.vmem [shape: f32[1,64], index: 11, kind: input, shape index: {}]   ;;  %s2461_s12 = inlined_call_operand.vmem [shape: f32[1,64], index: 12, kind: input, shape index: {}]   ;;  %s2462_s14 = inlined_call_operand.vmem [shape: f32[1,64], index: 14, kind: input, shape index: {}]   ;;  %s2463_s15 = inlined_call_operand.vmem [shape: f32[1,64], index: 15, kind: input, shape index: {}]   ;;  %s2464_s16 = inlined_call_operand.vmem [shape: f32[16,64], index: 16, kind: output, shape index: {0}]   ;;  %s2465_s17 = inlined_call_operand.vmem [shape: f32[32,64], index: 17, kind: output, shape index: {1}]  }
   0x1   :  { %2468 = sst [smem:[#allocation2_spill]] %s2448_s0  ;;  %200 = vmatprep.mubr.f32.mxu1 %v1839_v3  ;;  %v1966_v14 = vld [vmem:[%s2450_s2] sm:$0xff]  ;;  %v1991_v21 = vld [vmem:[%s2450_s2 + $0x8] sm:$0xff] }
   0x2   :  { %2469 = sst [smem:[#allocation3_spill]] %s2449_s4  ;;  %s2470_s26 = sld [smem:[#allocation2_spill]]  ;;  %v89_v57 = vld [vmem:[%s2451_s7] sm:$0xff]  ;;  %v90_v58 = vld [vmem:[%s2451_s7 + $0x8] sm:$0xff] }
   0x3   :  { %s2471_s20 = sld [smem:[#allocation3_spill]]  ;;  %v2108_v59 = vpack.c.bf16 %v90_v58, %v89_v57  ;;  %v103_v58 = vld [vmem:[%s2456_s10 + $0x20] sm:$0xff] }
   0x5   :  { %1691 = vmatprep.subr.bf16.mxu0 %v2108_v59 }
   0x6   :  { %1693 = vmatpush3.bf16.msra.mxu0 %v2108_v59 }
   0x8   :  { %v126_v0 = vld [vmem:[%s2470_s26 + $0x8] sm:$0xff]  ;;  %v128_v1 = vld [vmem:[%s2470_s26 + $0x18] sm:$0xff]  ;;  %v125_v2 = vld [vmem:[%s2470_s26] sm:$0xff] }
   0x9   :  { %v1654_v4 = vpack.c.bf16 %v128_v1, %v126_v0  ;;  %v127_v5 = vld [vmem:[%s2470_s26 + $0x10] sm:$0xff]  ;;  %v71_v7 = vld [vmem:[%s2471_s20 + $0x80] sm:$0xff]  ;;  %v72_v8 = vld [vmem:[%s2471_s20 + $0x88] sm:$0xff] }
   0xa   :  { %v1656_v6 = vpack.c.bf16 %v127_v5, %v125_v2  ;;  %v55_v9 = vld [vmem:[%s2471_s20] sm:$0xff]  ;;  %v1952_v10 = vpack.c.bf16 %v72_v8, %v71_v7  ;;  %v56_v11 = vld [vmem:[%s2471_s20 + $0x8] sm:$0xff]  ;;  %v73_v12 = vld [vmem:[%s2471_s20 + $0x90] sm:$0xff] }
   0xb   :  { %1655 = vmatprep.subr.bf16.mxu1 %v1654_v4  ;;  %v74_v13 = vld [vmem:[%s2471_s20 + $0x98] sm:$0xff]  ;;  %v1968_v15 = vpack.c.bf16 %v56_v11, %v55_v9  ;;  %v57_v17 = vld [vmem:[%s2471_s20 + $0x10] sm:$0xff]  ;;  %v75_v19 = vld [vmem:[%s2471_s20 + $0xa0] sm:$0xff] }
   0xc   :  { %1657 = vmatpush1.bf16.msra.mxu1 %v1656_v6  ;;  %v1971_v16 = vpack.c.bf16 %v74_v13, %v73_v12  ;;  %v58_v18 = vld [vmem:[%s2471_s20 + $0x18] sm:$0xff]  ;;  %v76_v20 = vld [vmem:[%s2471_s20 + $0xa8] sm:$0xff]  ;;  %v59_v24 = vld [vmem:[%s2471_s20 + $0x20] sm:$0xff] }
   0xd   :  { %1659 = vmatprep.subr.bf16.mxu1 %v1952_v10  ;;  %v1994_v22 = vpack.c.bf16 %v58_v18, %v57_v17  ;;  %v1997_v23 = vpack.c.bf16 %v76_v20, %v75_v19  ;;  %v60_v25 = vld [vmem:[%s2471_s20 + $0x28] sm:$0xff]  ;;  %v77_v26 = vld [vmem:[%s2471_s20 + $0xb0] sm:$0xff]  ;;  %v78_v27 = vld [vmem:[%s2471_s20 + $0xb8] sm:$0xff] }
   0xe   :  { %v2014_v28 = vpack.c.bf16 %v60_v25, %v59_v24  ;;  %v2017_v29 = vpack.c.bf16 %v78_v27, %v77_v26  ;;  %v61_v30 = vld [vmem:[%s2471_s20 + $0x30] sm:$0xff]  ;;  %v62_v31 = vld [vmem:[%s2471_s20 + $0x38] sm:$0xff]  ;;  %v79_v32 = vld [vmem:[%s2471_s20 + $0xc0] sm:$0xff] }
   0xf   :  { %1312 = vmatmul.mubr.msk.f32.vlgmr.msra.gmra.mrb[0].mxu1 %vm129_vm0, %v1966_v14  ;;  %v80_v33 = vld [vmem:[%s2471_s20 + $0xc8] sm:$0xff]  ;;  %v2032_v34 = vpack.c.bf16 %v62_v31, %v61_v30  ;;  %v63_v36 = vld [vmem:[%s2471_s20 + $0x40] sm:$0xff]  ;;  %v81_v38 = vld [vmem:[%s2471_s20 + $0xd0] sm:$0xff] }
  0x10   :  { %206 = vmatprep.mubr.f32.mxu1 %v1839_v3  ;;  %1661 = vmatpush3.bf16.msra.mxu1 %v1968_v15  ;;  %v2035_v35 = vpack.c.bf16 %v80_v33, %v79_v32  ;;  %v64_v37 = vld [vmem:[%s2471_s20 + $0x48] sm:$0xff]  ;;  %v82_v39 = vld [vmem:[%s2471_s20 + $0xd8] sm:$0xff]  ;;  %v65_v42 = vld [vmem:[%s2471_s20 + $0x50] sm:$0xff] }
  0x11   :  { %1663 = vmatprep.subr.bf16.mxu1 %v1971_v16  ;;  %v2050_v40 = vpack.c.bf16 %v64_v37, %v63_v36  ;;  %v2053_v41 = vpack.c.bf16 %v82_v39, %v81_v38  ;;  %v66_v43 = vld [vmem:[%s2471_s20 + $0x58] sm:$0xff]  ;;  %v83_v44 = vld [vmem:[%s2471_s20 + $0xe0] sm:$0xff]  ;;  %v84_v45 = vld [vmem:[%s2471_s20 + $0xe8] sm:$0xff] }
  0x12   :  { %v2068_v46 = vpack.c.bf16 %v66_v43, %v65_v42  ;;  %v2071_v47 = vpack.c.bf16 %v84_v45, %v83_v44  ;;  %v67_v48 = vld [vmem:[%s2471_s20 + $0x60] sm:$0xff]  ;;  %v68_v49 = vld [vmem:[%s2471_s20 + $0x68] sm:$0xff]  ;;  %v85_v50 = vld [vmem:[%s2471_s20 + $0xf0] sm:$0xff] }
  0x13   :  { %1313 = vmatmul.mubr.msk.f32.gmra.mrb[2].mxu1 %vm129_vm0, %v1991_v21  ;;  %v86_v51 = vld [vmem:[%s2471_s20 + $0xf8] sm:$0xff]  ;;  %v2086_v52 = vpack.c.bf16 %v68_v49, %v67_v48  ;;  %v69_v54 = vld [vmem:[%s2471_s20 + $0x70] sm:$0xff]  ;;  %v93_v4 = vld [vmem:[%s2451_s7 + $0x20] sm:$0xff] }
  0x14   :  { %1665 = vmatpush3.bf16.msra.mxu1 %v1994_v22  ;;  %v2089_v53 = vpack.c.bf16 %v86_v51, %v85_v50  ;;  %v70_v55 = vld [vmem:[%s2471_s20 + $0x78] sm:$0xff]  ;;  %v91_v0 = vld [vmem:[%s2451_s7 + $0x10] sm:$0xff]  ;;  %v94_v5 = vld [vmem:[%s2451_s7 + $0x28] sm:$0xff] }
  0x15   :  { %1667 = vmatprep.subr.bf16.mxu1 %v1997_v23  ;;  %v2099_v56 = vpack.c.bf16 %v70_v55, %v69_v54  ;;  %v92_v1 = vld [vmem:[%s2451_s7 + $0x18] sm:$0xff]  ;;  %v2128_v6 = vpack.c.bf16 %v94_v5, %v93_v4  ;;  %v95_v7 = vld [vmem:[%s2451_s7 + $0x30] sm:$0xff]  ;;  %v2145_v12 = vld [vmem:[%s2452_s5] ss:$0 sm:$0xff] }
  0x16   :  { %v2118_v2 = vpack.c.bf16 %v92_v1, %v91_v0  ;;  %v96_v8 = vld [vmem:[%s2451_s7 + $0x38] sm:$0xff]  ;;  %v2150_v18 = vld [vmem:[%s2453_s6] ss:$0 sm:$0xff]  ;;  %v100_v48 = vld [vmem:[%s2456_s10 + $0x8] sm:$0xff] }
  0x17   :  { %v2138_v9 = vpack.c.bf16 %v96_v8, %v95_v7  ;;  %v2163_v33 = vld [vmem:[%s2454_s8] ss:$0 sm:$0xff]  ;;  %v101_v54 = vld [vmem:[%s2456_s10 + $0x10] sm:$0xff]  ;;  %v102_v55 = vld [vmem:[%s2456_s10 + $0x18] sm:$0xff] }
  0x18   :  { %1669 = vmatpush3.bf16.msra.mxu1 %v2014_v28  ;;  %1695 = vmatprep.subr.bf16.mxu0 %v2118_v2  ;;  %v2168_v36 = vld [vmem:[%s2455_s9] ss:$0 sm:$0xff]  ;;  %v2189_v57 = vpack.c.bf16 %v102_v55, %v101_v54  ;;  %v682_v1 = vld [vmem:[%s2457_s1 + $0x18] sm:$0xff]  ;;  %v110_v7 = vld [vmem:[%s2458_s13 + $0x8] sm:$0xff] }
  0x19   :  { %1671 = vmatprep.subr.bf16.mxu1 %v2017_v29  ;;  %1697 = vmatpush3.bf16.msra.mxu0 %v2118_v2  ;;  %v99_v45 = vld [vmem:[%s2456_s10] sm:$0xff] }
  0x1a   :  { %1699 = vmatprep.subr.bf16.mxu0 %v2128_v6  ;;  %v2180_v51 = vpack.c.bf16 %v100_v48, %v99_v45  ;;  %v109_v5 = vld [vmem:[%s2458_s13] sm:$0xff] }
  0x1b   :  { %v2228_v8 = vpack.c.bf16 %v110_v7, %v109_v5 }
  0x1c   :  { %1673 = vmatpush3.bf16.msra.mxu1 %v2032_v34 }
  0x1d   :  { %1675 = vmatprep.subr.bf16.mxu1 %v2035_v35  ;;  %1701 = vmatpush3.bf16.msra.mxu0 %v2128_v6 }
  0x1e   :  { %1703 = vmatprep.subr.bf16.mxu0 %v2138_v9 }
  0x20   :  { %1677 = vmatpush3.bf16.msra.mxu1 %v2050_v40 }
  0x21   :  { %1679 = vmatprep.subr.bf16.mxu1 %v2053_v41  ;;  %1705 = vmatpush3.bf16.msra.mxu0 %v2138_v9 }
  0x24   :  { %1681 = vmatpush3.bf16.msra.mxu1 %v2068_v46 }
  0x25   :  { %1683 = vmatprep.subr.bf16.mxu1 %v2071_v47 }
  0x28   :  { %1685 = vmatpush3.bf16.msra.mxu1 %v2086_v52 }
  0x29   :  { %1687 = vmatprep.subr.bf16.mxu1 %v2089_v53 }
  0x2c   :  { %1689 = vmatpush3.bf16.msra.mxu1 %v2099_v56 }
  0x2d   :  { %1727 = vmatprep.subr.bf16.mxu1 %v2228_v8 }
  0xe2   :  { %v202_v60 = vpop.f32.mrb[0].mxu1 }
  0xe3   :  { %v204_v61 = vpop.f32.mrb[1].mxu1 }
  0xe4   :  { %277 = vmatprep.mubr.f32.mxu1 %v204_v61 }
  0xe5   :  { %278 = vmatmul.mubr.f32.vlgmr.msra.gmra.mrb[4].mxu1 %v202_v60  ;;  %v104_v60 = vld [vmem:[%s2456_s10 + $0x28] sm:$0xff] }
  0xe6   :  { %v208_v62 = vpop.f32.mrb[2].mxu1  ;;  %v2201_v61 = vpack.c.bf16 %v104_v60, %v103_v58  ;;  %1729 = vmatpush3.bf16.msra.mxu1 %v2228_v8 }
  0xe7   :  { %v210_v63 = vpop.f32.mrb[3].mxu1 }
  0xe8   :  { %282 = vmatprep.mubr.f32.mxu1 %v210_v63  ;;  %v106_v63 = vld [vmem:[%s2456_s10 + $0x38] sm:$0xff] }
  0xe9   :  { %283 = vmatmul.mubr.f32.gmra.mrb[6].mxu1 %v208_v62  ;;  %v105_v62 = vld [vmem:[%s2456_s10 + $0x30] sm:$0xff] }
  0xea   :  { %v2211_v0 = vpack.c.bf16 %v106_v63, %v105_v62 }
 0x1b8   :  { %v1382_v11 = vpop.f32.mrb[4].mxu1 }
 0x1b9   :  { %v1383_v13 = vpop.f32.mrb[5].mxu1 }
 0x1ba   :  { %v1384_v17 = vadd.f32 %v1383_v13, %v1382_v11  ;;  %v111_v11 = vld [vmem:[%s2458_s13 + $0x10] sm:$0xff]  ;;  %v112_v13 = vld [vmem:[%s2458_s13 + $0x18] sm:$0xff] }
 0x1bc   :  { %v294_v19 = vmul.f32 %v1384_v17, %v2145_v12  ;;  %v1385_v20 = vpop.f32.mrb[6].mxu1  ;;  %v2238_v17 = vpack.c.bf16 %v112_v13, %v111_v11 }
 0x1bd   :  { %v1386_v24 = vpop.f32.mrb[7].mxu1 }
 0x1be   :  { %v1387_v25 = vadd.f32 %v1386_v24, %v1385_v20  ;;  %v302_v26 = vadd.f32 %v2150_v18, %v294_v19  ;;  %1731 = vmatprep.subr.bf16.mxu1 %v2238_v17  ;;  %v679_v19 = vld [vmem:[%s2457_s1] sm:$0xff]  ;;  %v681_v20 = vld [vmem:[%s2457_s1 + $0x10] sm:$0xff]  ;;  %v684_v24 = vld [vmem:[%s2457_s1 + $0x28] sm:$0xff] }
 0x1bf   :  { %1733 = vmatpush3.bf16.msra.mxu1 %v2238_v17 }
 0x1c0   :  { %v295_v27 = vmul.f32 %v1387_v25, %v2145_v12  ;;  %v304_v30 = vmax.f32 %v302_v26, 0.0  ;;  %v686_v25 = vld [vmem:[%s2457_s1 + $0x38] sm:$0xff] }
 0x1c2   :  { %v303_v31 = vadd.f32 %v2150_v18, %v295_v27  ;;  %1526 = vmatprep.mubr.msk.f32.mxu0 %vm306_vm1, %v304_v30  ;;  %v1744_v27 = vpack.c.bf16 %v681_v20, %v679_v19 }
 0x1c4   :  { %v305_v32 = vmax.f32 %v303_v31, 0.0  ;;  %v1746_v31 = vpack.c.bf16 %v686_v25, %v684_v24 }
 0x1c6   :  { %1527 = vmatmul.mubr.msk.f32.vlgmr.msra.gmra.mrb[0].mxu0 %vm306_vm1, %v305_v32  ;;  %v683_v32 = vld [vmem:[%s2457_s1 + $0x20] sm:$0xff] }
 0x1c7   :  { %1533 = vmatprep.mubr.msk.f32.mxu0 %vm129_vm0, %v1966_v14 }
 0x299   :  { %v1528_v37 = vpop.f32.mrb[0].mxu0 }
 0x29a   :  { %v395_v38 = vmul.f32 %v1528_v37, %v2163_v33  ;;  %v379_v39 = vpop.f32.mrb[1].mxu0  ;;  %v685_v37 = vld [vmem:[%s2457_s1 + $0x30] sm:$0xff] }
 0x29b   :  { %v394_v42 = vmul.f32 %v2163_v33, %v379_v39  ;;  %v2266_v39 = vld [vmem:[%s2459_s3] sm:$0xff] }
 0x29c   :  { %v403_v43 = vadd.f32 %v2168_v36, %v395_v38  ;;  %v1748_v38 = vpack.c.bf16 %v685_v37, %v683_v32 }
 0x29d   :  { %v402_v14 = vadd.f32 %v2168_v36, %v394_v42  ;;  %v2275_v42 = vld [vmem:[%s2459_s3 + $0x8] sm:$0xff] }
 0x29e   :  { %v405_v44 = vmax.f32 %v403_v43, 0.0 }
 0x29f   :  { %v404_v49 = vmax.f32 %v402_v14, 0.0 }
 0x2a1   :  { %v1706_v50 = vpack.c.bf16 %v405_v44, %v404_v49 }
 0x2a3   :  { %1707 = vmatprep.subr.bf16.mxu0 %v1706_v50 }
 0x2a4   :  { %1709 = vmatpush3.bf16.msra.mxu0 %v1706_v50 }
 0x2a5   :  { %1711 = vmatprep.subr.bf16.mxu0 %v2180_v51 }
 0x2a7   :  { %1534 = vmatmul.mubr.msk.f32.vlgmr.msra.gmra.mrb[2].mxu0 %vm129_vm0, %v1991_v21  ;;  %v680_v21 = vld [vmem:[%s2457_s1 + $0x8] sm:$0xff] }
 0x2a8   :  { %1713 = vmatpush3.bf16.msra.mxu0 %v2180_v51  ;;  %v1742_v4 = vpack.c.bf16 %v682_v1, %v680_v21 }
 0x2a9   :  { %1715 = vmatprep.subr.bf16.mxu0 %v2189_v57 }
 0x2ac   :  { %1717 = vmatpush3.bf16.msra.mxu0 %v2189_v57 }
 0x2ad   :  { %1719 = vmatprep.subr.bf16.mxu0 %v2201_v61 }
 0x2b0   :  { %1721 = vmatpush3.bf16.msra.mxu0 %v2201_v61 }
 0x2b1   :  { %1723 = vmatprep.subr.bf16.mxu0 %v2211_v0 }
 0x2b4   :  { %1725 = vmatpush3.bf16.msra.mxu0 %v2211_v0 }
 0x2b5   :  { %1743 = vmatprep.subr.bf16.mxu0 %v1742_v4 }
 0x37a   :  { %v1535_v26 = vpop.f32.mrb[2].mxu0 }
 0x37b   :  { %v472_v30 = vpop.f32.mrb[3].mxu0 }
 0x37c   :  { %1552 = vmatprep.mubr.msk.f32.mxu0 %vm306_vm1, %v472_v30 }
 0x37d   :  { %1553 = vmatmul.mubr.msk.f32.vlgmr.msra.gmra.mrb[4].mxu0 %vm306_vm1, %v1535_v26 }
 0x37e   :  { %1745 = vmatpush1.bf16.msra.mxu0 %v1744_v27  ;;  %764 = vmatprep.mubr.f32.mxu0 %v1839_v3 }
 0x37f   :  { %1747 = vmatprep.subr.bf16.mxu0 %v1746_v31 }
 0x382   :  { %1749 = vmatpush1.bf16.msra.mxu0 %v1748_v38 }
 0x383   :  { %1751 = vmatprep.subr.bf16.mxu0 %v1952_v10  ;;  %v2285_v10 = vld [vmem:[%s2459_s3 + $0x10] sm:$0xff] }
 0x385   :  { %1330 = vmatmul.mubr.msk.f32.vlgmr.msra.gmra.mrb[6].mxu0 %vm687_vm2, %v2266_v39 }
 0x386   :  { %770 = vmatprep.mubr.f32.mxu0 %v1839_v3  ;;  %1753 = vmatpush3.bf16.msra.mxu0 %v1968_v15  ;;  %v2295_v15 = vld [vmem:[%s2459_s3 + $0x18] sm:$0xff] }
 0x387   :  { %1755 = vmatprep.subr.bf16.mxu0 %v1971_v16  ;;  %v114_v16 = vld [vmem:[%s2458_s13 + $0x28] sm:$0xff] }
 0x389   :  { %1331 = vmatmul.mubr.msk.f32.gmra.mrb[8].mxu0 %vm687_vm2, %v2275_v42 }
 0x38a   :  { %776 = vmatprep.mubr.f32.mxu0 %v1839_v3  ;;  %1757 = vmatpush3.bf16.msra.mxu0 %v1994_v22 }
 0x38b   :  { %1759 = vmatprep.subr.bf16.mxu0 %v1997_v23  ;;  %v115_v23 = vld [vmem:[%s2458_s13 + $0x30] sm:$0xff] }
 0x38d   :  { %1332 = vmatmul.mubr.msk.f32.gmra.mrb[10].mxu0 %vm687_vm2, %v2285_v10 }
 0x38e   :  { %782 = vmatprep.mubr.f32.mxu0 %v1839_v3  ;;  %1761 = vmatpush3.bf16.msra.mxu0 %v2014_v28  ;;  %v113_v3 = vld [vmem:[%s2458_s13 + $0x20] sm:$0xff]  ;;  %v116_v28 = vld [vmem:[%s2458_s13 + $0x38] sm:$0xff] }
 0x38f   :  { %1763 = vmatprep.subr.bf16.mxu0 %v2017_v29  ;;  %v1734_v22 = vpack.c.bf16 %v114_v16, %v113_v3  ;;  %v1738_v29 = vpack.c.bf16 %v116_v28, %v115_v23 }
 0x391   :  { %1333 = vmatmul.mubr.msk.f32.gmra.mrb[12].mxu0 %vm687_vm2, %v2295_v15  ;;  %1735 = vmatprep.subr.bf16.mxu1 %v1734_v22 }
 0x392   :  { %1765 = vmatpush3.bf16.msra.mxu0 %v2032_v34  ;;  %1737 = vmatpush3.bf16.msra.mxu1 %v1734_v22  ;;  %v2327_v34 = vld [vmem:[%s2460_s11] ss:$0 sm:$0xff] }
 0x393   :  { %1767 = vmatprep.subr.bf16.mxu0 %v2035_v35  ;;  %1739 = vmatprep.subr.bf16.mxu1 %v1738_v29  ;;  %v2332_v35 = vld [vmem:[%s2461_s12] ss:$0 sm:$0xff] }
 0x396   :  { %1769 = vmatpush3.bf16.msra.mxu0 %v2050_v40  ;;  %1741 = vmatpush3.bf16.msra.mxu1 %v1738_v29 }
 0x397   :  { %1771 = vmatprep.subr.bf16.mxu0 %v2053_v41  ;;  %1783 = vmatprep.subr.bf16.mxu1 %v2108_v59 }
 0x39a   :  { %1773 = vmatpush3.bf16.msra.mxu0 %v2068_v46 }
 0x39b   :  { %1775 = vmatprep.subr.bf16.mxu0 %v2071_v47 }
 0x39e   :  { %1777 = vmatpush3.bf16.msra.mxu0 %v2086_v52 }
 0x39f   :  { %1779 = vmatprep.subr.bf16.mxu0 %v2089_v53 }
 0x3a2   :  { %1781 = vmatpush3.bf16.msra.mxu0 %v2099_v56 }
 0x3a3   :  { %1823 = vmatprep.subr.bf16.mxu0 %v2228_v8 }
 0x450   :  { %v1554_v40 = vpop.f32.mrb[4].mxu0 }
 0x451   :  { %v569_v41 = vmul.f32 %v1554_v40, %v2327_v34  ;;  %v553_v46 = vpop.f32.mrb[5].mxu0 }
 0x452   :  { %v568_v47 = vmul.f32 %v2327_v34, %v553_v46 }
 0x453   :  { %v577_v52 = vadd.f32 %v2332_v35, %v569_v41 }
 0x454   :  { %v576_v53 = vadd.f32 %v2332_v35, %v568_v47 }
 0x455   :  { %v579_v43 = vmax.f32 %v577_v52, 0.0 }
 0x456   :  { %v578_v56 = vmax.f32 %v576_v53, 0.0 }
 0x458   :  { %v766_v14 = vpop.f32.mrb[6].mxu0  ;;  %1571 = vmatprep.mubr.msk.f32.mxu1 %vm306_vm1, %v578_v56 }
 0x459   :  { %v768_v44 = vpop.f32.mrb[7].mxu0  ;;  %1572 = vmatmul.mubr.msk.f32.vlgmr.msra.gmra.mrb[8].mxu1 %vm306_vm1, %v579_v43 }
 0x45a   :  { %853 = vmatprep.mubr.f32.mxu0 %v768_v44  ;;  %1785 = vmatpush3.bf16.msra.mxu1 %v2108_v59 }
 0x45b   :  { %854 = vmatmul.mubr.f32.vlgmr.msra.gmra.mrb[14].mxu0 %v766_v14  ;;  %1787 = vmatprep.subr.bf16.mxu1 %v2118_v2 }
 0x45c   :  { %v772_v45 = vpop.f32.mrb[8].mxu0  ;;  %1825 = vmatpush3.bf16.msra.mxu0 %v2228_v8 }
 0x45d   :  { %v774_v48 = vpop.f32.mrb[9].mxu0  ;;  %1827 = vmatprep.subr.bf16.mxu0 %v2238_v17 }
 0x45e   :  { %858 = vmatprep.mubr.f32.mxu0 %v774_v48  ;;  %1789 = vmatpush3.bf16.msra.mxu1 %v2118_v2  ;;  %v2353_v2 = vld [vmem:[%s2462_s14] ss:$0 sm:$0xff] }
 0x45f   :  { %859 = vmatmul.mubr.f32.gmra.mrb[16].mxu0 %v772_v45  ;;  %1791 = vmatprep.subr.bf16.mxu1 %v2128_v6 }
 0x460   :  { %v778_v49 = vpop.f32.mrb[10].mxu0  ;;  %1829 = vmatpush3.bf16.msra.mxu0 %v2238_v17 }
 0x461   :  { %v780_v50 = vpop.f32.mrb[11].mxu0  ;;  %1831 = vmatprep.subr.bf16.mxu0 %v1734_v22 }
 0x462   :  { %863 = vmatprep.mubr.f32.mxu0 %v780_v50  ;;  %1793 = vmatpush3.bf16.msra.mxu1 %v2128_v6  ;;  %v2358_v6 = vld [vmem:[%s2463_s15] ss:$0 sm:$0xff] }
 0x463   :  { %864 = vmatmul.mubr.f32.gmra.mrb[18].mxu0 %v778_v49  ;;  %1795 = vmatprep.subr.bf16.mxu1 %v2138_v9 }
 0x464   :  { %v784_v59 = vpop.f32.mrb[12].mxu0  ;;  %1833 = vmatpush3.bf16.msra.mxu0 %v1734_v22 }
 0x465   :  { %v786_v54 = vpop.f32.mrb[13].mxu0  ;;  %1835 = vmatprep.subr.bf16.mxu0 %v1738_v29 }
 0x466   :  { %868 = vmatprep.mubr.f32.mxu0 %v786_v54  ;;  %1797 = vmatpush3.bf16.msra.mxu1 %v2138_v9 }
 0x467   :  { %869 = vmatmul.mubr.f32.gmra.mrb[20].mxu0 %v784_v59 }
 0x468   :  { %1837 = vmatpush3.bf16.msra.mxu0 %v1738_v29 }
 0x52c   :  { %v1573_v55 = vpop.f32.mrb[8].mxu1 }
 0x52d   :  { %v668_v58 = vmul.f32 %v1573_v55, %v2353_v2  ;;  %v652_v60 = vpop.f32.mrb[9].mxu1 }
 0x52e   :  { %v667_v62 = vmul.f32 %v2353_v2, %v652_v60  ;;  %v1454_v63 = vpop.f32.mrb[14].mxu0 }
 0x52f   :  { %v676_v9 = vadd.f32 %v2358_v6, %v668_v58  ;;  %v1455_v21 = vpop.f32.mrb[15].mxu0 }
 0x530   :  { %v675_v1 = vadd.f32 %v2358_v6, %v667_v62  ;;  %v1456_v4 = vadd.f32 %v1455_v21, %v1454_v63 }
 0x531   :  { %v678_v5 = vmax.f32 %v676_v9, 0.0 }
 0x532   :  { %v677_v7 = vmax.f32 %v675_v1, 0.0  ;;  %v874_v8 = vmul.f32 %v1456_v4, %v2145_v12  ;;  %v1457_v11 = vpop.f32.mrb[16].mxu0 }
 0x533   :  { %1299 = vst.msk [vmem:[%s2464_s16 + $0x8] sm:$0xff] %vm306_vm1, %v678_v5  ;;  %v1458_v13 = vpop.f32.mrb[17].mxu0 }
 0x534   :  { %1298 = vst.msk [vmem:[%s2464_s16] sm:$0xff] %vm306_vm1, %v677_v7  ;;  %v878_v17 = vadd.f32 %v2150_v18, %v874_v8  ;;  %v1459_v19 = vadd.f32 %v1458_v13, %v1457_v11 }
 0x536   :  { %v882_v20 = vmax.f32 %v878_v17, 0.0  ;;  %v875_v24 = vmul.f32 %v1459_v19, %v2145_v12  ;;  %v1460_v25 = vpop.f32.mrb[18].mxu0 }
 0x537   :  { %v1461_v26 = vpop.f32.mrb[19].mxu0 }
 0x538   :  { %v879_v27 = vadd.f32 %v2150_v18, %v875_v24  ;;  %v1462_v30 = vadd.f32 %v1461_v26, %v1460_v25  ;;  %1590 = vmatprep.mubr.msk.f32.mxu1 %vm306_vm1, %v882_v20 }
 0x53a   :  { %v883_v31 = vmax.f32 %v879_v27, 0.0  ;;  %v876_v32 = vmul.f32 %v1462_v30, %v2145_v12  ;;  %v1463_v37 = vpop.f32.mrb[20].mxu0 }
 0x53b   :  { %v1464_v38 = vpop.f32.mrb[21].mxu0 }
 0x53c   :  { %v880_v3 = vadd.f32 %v2150_v18, %v876_v32  ;;  %v1465_v16 = vadd.f32 %v1464_v38, %v1463_v37  ;;  %1591 = vmatmul.mubr.msk.f32.vlgmr.msra.gmra.mrb[10].mxu1 %vm306_vm1, %v883_v31 }
 0x53e   :  { %v884_v22 = vmax.f32 %v880_v3, 0.0  ;;  %v877_v23 = vmul.f32 %v1465_v16, %v2145_v12 }
 0x540   :  { %v881_v28 = vadd.f32 %v2150_v18, %v877_v23  ;;  %1593 = vmatprep.mubr.msk.f32.mxu1 %vm306_vm1, %v884_v22 }
 0x542   :  { %v885_v29 = vmax.f32 %v881_v28, 0.0 }
 0x544   :  { %1594 = vmatmul.mubr.msk.f32.gmra.mrb[12].mxu1 %vm306_vm1, %v885_v29 }
 0x545   :  { %1604 = vmatprep.mubr.msk.f32.mxu1 %vm687_vm2, %v2266_v39 }
 0x60f   :  { %v1592_v40 = vpop.f32.mrb[10].mxu1 }
 0x610   :  { %v984_v41 = vmul.f32 %v1592_v40, %v2163_v33  ;;  %v964_v46 = vpop.f32.mrb[11].mxu1 }
 0x611   :  { %v983_v47 = vmul.f32 %v2163_v33, %v964_v46 }
 0x612   :  { %v988_v52 = vadd.f32 %v2168_v36, %v984_v41 }
 0x613   :  { %v987_v12 = vadd.f32 %v2168_v36, %v983_v47 }
 0x614   :  { %v992_v53 = vmax.f32 %v988_v52, 0.0 }
 0x615   :  { %v991_v18 = vmax.f32 %v987_v12, 0.0 }
 0x617   :  { %v1595_v56 = vpop.f32.mrb[12].mxu1  ;;  %v1798_v43 = vpack.c.bf16 %v992_v53, %v991_v18 }
 0x618   :  { %v986_v14 = vmul.f32 %v1595_v56, %v2163_v33  ;;  %v974_v44 = vpop.f32.mrb[13].mxu1 }
 0x619   :  { %v985_v45 = vmul.f32 %v2163_v33, %v974_v44  ;;  %1799 = vmatprep.subr.bf16.mxu1 %v1798_v43 }
 0x61a   :  { %v990_v39 = vadd.f32 %v2168_v36, %v986_v14  ;;  %1801 = vmatpush3.bf16.msra.mxu1 %v1798_v43 }
 0x61b   :  { %v989_v48 = vadd.f32 %v2168_v36, %v985_v45 }
 0x61c   :  { %v994_v49 = vmax.f32 %v990_v39, 0.0 }
 0x61d   :  { %v993_v50 = vmax.f32 %v989_v48, 0.0 }
 0x61f   :  { %v1802_v59 = vpack.c.bf16 %v994_v49, %v993_v50 }
 0x621   :  { %1803 = vmatprep.subr.bf16.mxu1 %v1802_v59 }
 0x622   :  { %1805 = vmatpush3.bf16.msra.mxu1 %v1802_v59 }
 0x623   :  { %1807 = vmatprep.subr.bf16.mxu1 %v2180_v51 }
 0x625   :  { %1605 = vmatmul.mubr.msk.f32.vlgmr.msra.gmra.mrb[14].mxu1 %vm687_vm2, %v2275_v42 }
 0x626   :  { %1607 = vmatprep.mubr.msk.f32.mxu1 %vm687_vm2, %v2285_v10  ;;  %1809 = vmatpush3.bf16.msra.mxu1 %v2180_v51 }
 0x627   :  { %1811 = vmatprep.subr.bf16.mxu1 %v2189_v57 }
 0x629   :  { %1608 = vmatmul.mubr.msk.f32.gmra.mrb[16].mxu1 %vm687_vm2, %v2295_v15 }
 0x62a   :  { %1813 = vmatpush3.bf16.msra.mxu1 %v2189_v57 }
 0x62b   :  { %1815 = vmatprep.subr.bf16.mxu1 %v2201_v61 }
 0x62e   :  { %1817 = vmatpush3.bf16.msra.mxu1 %v2201_v61 }
 0x62f   :  { %1819 = vmatprep.subr.bf16.mxu1 %v2211_v0 }
 0x632   :  { %1821 = vmatpush3.bf16.msra.mxu1 %v2211_v0 }
 0x6f8   :  { %v1606_v33 = vpop.f32.mrb[14].mxu1 }
 0x6f9   :  { %v1061_v36 = vpop.f32.mrb[15].mxu1 }
 0x6fa   :  { %1626 = vmatprep.mubr.msk.f32.mxu1 %vm306_vm1, %v1061_v36 }
 0x6fb   :  { %1627 = vmatmul.mubr.msk.f32.vlgmr.msra.gmra.mrb[18].mxu1 %vm306_vm1, %v1606_v33 }
 0x6fc   :  { %v1609_v51 = vpop.f32.mrb[16].mxu1 }
 0x6fd   :  { %v1071_v42 = vpop.f32.mrb[17].mxu1 }
 0x6fe   :  { %1629 = vmatprep.mubr.msk.f32.mxu1 %vm306_vm1, %v1071_v42 }
 0x6ff   :  { %1630 = vmatmul.mubr.msk.f32.gmra.mrb[20].mxu1 %vm306_vm1, %v1609_v51 }
 0x7ce   :  { %v1628_v57 = vpop.f32.mrb[18].mxu1 }
 0x7cf   :  { %v1178_v10 = vmul.f32 %v1628_v57, %v2327_v34  ;;  %v1158_v61 = vpop.f32.mrb[19].mxu1 }
 0x7d0   :  { %v1177_v15 = vmul.f32 %v2327_v34, %v1158_v61 }
 0x7d1   :  { %v1182_v0 = vadd.f32 %v2332_v35, %v1178_v10 }
 0x7d2   :  { %v1181_v54 = vadd.f32 %v2332_v35, %v1177_v15  ;;  %v1631_v55 = vpop.f32.mrb[20].mxu1 }
 0x7d3   :  { %v1180_v58 = vmul.f32 %v1631_v55, %v2327_v34  ;;  %v1168_v60 = vpop.f32.mrb[21].mxu1  ;;  %v1186_v9 = vmax.f32 %v1182_v0, 0.0 }
 0x7d4   :  { %v1185_v62 = vmax.f32 %v1181_v54, 0.0  ;;  %v1179_v63 = vmul.f32 %v2327_v34, %v1168_v60 }
 0x7d5   :  { %v1184_v21 = vadd.f32 %v2332_v35, %v1180_v58 }
 0x7d6   :  { %v1183_v1 = vadd.f32 %v2332_v35, %v1179_v63  ;;  %1648 = vmatprep.mubr.msk.f32.mxu0 %vm306_vm1, %v1185_v62 }
 0x7d7   :  { %1649 = vmatmul.mubr.msk.f32.vlgmr.msra.gmra.mrb[22].mxu0 %vm306_vm1, %v1186_v9  ;;  %v1188_v5 = vmax.f32 %v1184_v21, 0.0 }
 0x7d8   :  { %v1187_v4 = vmax.f32 %v1183_v1, 0.0 }
 0x7da   :  { %1651 = vmatprep.mubr.msk.f32.mxu0 %vm306_vm1, %v1187_v4 }
 0x7db   :  { %1652 = vmatmul.mubr.msk.f32.gmra.mrb[24].mxu0 %vm306_vm1, %v1188_v5 }
 0x8aa   :  { %v1650_v7 = vpop.f32.mrb[22].mxu0 }
 0x8ab   :  { %v1287_v8 = vmul.f32 %v1650_v7, %v2353_v2  ;;  %v1267_v11 = vpop.f32.mrb[23].mxu0 }
 0x8ac   :  { %v1286_v34 = vmul.f32 %v2353_v2, %v1267_v11 }
 0x8ad   :  { %v1291_v13 = vadd.f32 %v2358_v6, %v1287_v8 }
 0x8ae   :  { %v1290_v35 = vadd.f32 %v2358_v6, %v1286_v34  ;;  %v1653_v17 = vpop.f32.mrb[24].mxu0 }
 0x8af   :  { %v1295_v19 = vmax.f32 %v1291_v13, 0.0  ;;  %v1289_v20 = vmul.f32 %v1653_v17, %v2353_v2  ;;  %v1277_v24 = vpop.f32.mrb[25].mxu0 }
 0x8b0   :  { %v1294_v25 = vmax.f32 %v1290_v35, 0.0  ;;  %v1288_v26 = vmul.f32 %v2353_v2, %v1277_v24 }
 0x8b1   :  { %1301 = vst.msk [vmem:[%s2465_s17 + $0x8] sm:$0xff] %vm306_vm1, %v1295_v19  ;;  %v1293_v27 = vadd.f32 %v2358_v6, %v1289_v20 }
 0x8b2   :  { %1300 = vst.msk [vmem:[%s2465_s17] sm:$0xff] %vm306_vm1, %v1294_v25  ;;  %v1292_v30 = vadd.f32 %v2358_v6, %v1288_v26 }
 0x8b3   :  { %v1297_v31 = vmax.f32 %v1293_v27, 0.0 }
 0x8b4   :  { %v1296_v32 = vmax.f32 %v1292_v30, 0.0 }
 0x8b5   :  { %1303 = vst.msk [vmem:[%s2465_s17 + $0x18] sm:$0xff] %vm306_vm1, %v1297_v31 }
 0x8b6   :  { %1302 = vst.msk [vmem:[%s2465_s17 + $0x10] sm:$0xff] %vm306_vm1, %v1296_v32 }

// kernel: gat_forward.9
= control target key start
LH: loop header
LB: loop body
LE: loop exit
PB: predicated region body
PF: predicated region fallthrough
CT: control target
= control target key end

     0   :  { %vm44_vm0 = vcmask 523264   ;;  %v238_v30 = vlaneseq  ;;  %vm244_vm1 = vcmask 31744   ;;  %vm276_vm2 = vcmask 130112   ;;  %s1965_s2 = inlined_call_operand.vmem [shape: f32[64,4], index: 2, kind: input, shape index: {}]   ;;  %s1966_s3 = inlined_call_operand.vmem [shape: f32[64,4], index: 3, kind: input, shape index: {}]   ;;  %s1967_s0 = inlined_call_operand.vmem [shape: f32[16,64], index: 0, kind: input, shape index: {}]   ;;  %s1968_s1 = inlined_call_operand.vmem [shape: f32[32,64], index: 1, kind: input, shape index: {}]   ;;  %s1969_s4 = inlined_call_operand.vmem [shape: f32[8,4], index: 4, kind: input, shape index: {}]   ;;  %s1970_s8 = inlined_call_operand.vmem [shape: f32[32,16], index: 8, kind: input, shape index: {}]   ;;  %s1971_s7 = inlined_call_operand.vmem [shape: f32[16,32], index: 7, kind: input, shape index: {}]   ;;  %s1972_s6 = inlined_call_operand.vmem [shape: f32[32,32], index: 6, kind: input, shape index: {}]   ;;  %s1973_s5 = inlined_call_operand.vmem [shape: f32[16,16], index: 5, kind: input, shape index: {}]   ;;  %s1974_s10 = inlined_call_operand.vmem [shape: f32[32,4], index: 10, kind: output, shape index: {1}]   ;;  %s1975_s9 = inlined_call_operand.vmem [shape: f32[16,4], index: 9, kind: output, shape index: {0}]  }
   0x1   :  { %v36_v0 = vld [vmem:[%s1965_s2] sm:$0xff]  ;;  %v37_v1 = vld [vmem:[%s1965_s2 + $0x8] sm:$0xff]  ;;  %v38_v5 = vld [vmem:[%s1965_s2 + $0x10] sm:$0xff]  ;;  %vm303_vm5 = vcmask 130048   ;;  %vm378_vm8 = vcmask 195712   ;;  %vm385_vm9 = vcmask 261312  }
   0x2   :  { %v130_v2 = vld [vmem:[%s1966_s3] sm:$0xff]  ;;  %v1330_v3 = vpack.c.bf16 %v37_v1, %v36_v0  ;;  %v131_v4 = vld [vmem:[%s1966_s3 + $0x8] sm:$0xff]  ;;  %v39_v6 = vld [vmem:[%s1965_s2 + $0x18] sm:$0xff]  ;;  %v1604_v31 = vshrl.u32 %v238_v30, 7  ;;  %vm406_vm13 = vcmask 261120  }
   0x3   :  { %v1346_v7 = vpack.c.bf16 %v131_v4, %v130_v2  ;;  %v1334_v8 = vpack.c.bf16 %v39_v6, %v38_v5  ;;  %v132_v9 = vld [vmem:[%s1966_s3 + $0x10] sm:$0xff]  ;;  %v133_v10 = vld [vmem:[%s1966_s3 + $0x18] sm:$0xff]  ;;  %v40_v11 = vld [vmem:[%s1965_s2 + $0x20] sm:$0xff] }
   0x4   :  { %1331 = vmatprep.subr.bf16.mxu0 %v1330_v3  ;;  %v1350_v12 = vpack.c.bf16 %v133_v10, %v132_v9  ;;  %v41_v13 = vld [vmem:[%s1965_s2 + $0x28] sm:$0xff]  ;;  %v134_v14 = vld [vmem:[%s1966_s3 + $0x20] sm:$0xff]  ;;  %v42_v19 = vld [vmem:[%s1965_s2 + $0x30] sm:$0xff]  ;;  %v678_v32 = vsub.s32 7, %v1604_v31  ;;  %v342_v34 = vsub.s32 3, %v1604_v31  ;;  %v658_v35 = vsub.s32 6, %v1604_v31 }
   0x5   :  { %v135_v15 = vld [vmem:[%s1966_s3 + $0x28] sm:$0xff]  ;;  %1347 = vmatprep.subr.bf16.mxu1 %v1346_v7  ;;  %1333 = vmatpush3.bf16.msra.mxu0 %v1330_v3  ;;  %v1338_v16 = vpack.c.bf16 %v41_v13, %v40_v11  ;;  %v34_v17 = vld [vmem:[%s1967_s0] sm:$0xff]  ;;  %v43_v20 = vld [vmem:[%s1965_s2 + $0x38] sm:$0xff]  ;;  %v536_v39 = vsub.s32 5, %v1604_v31  ;;  %v330_v48 = vsub.s32 2, %v1604_v31  ;;  %v516_v61 = vsub.s32 4, %v1604_v31 }
   0x6   :  { %1349 = vmatpush3.bf16.msra.mxu1 %v1346_v7  ;;  %1335 = vmatprep.subr.bf16.mxu0 %v1334_v8  ;;  %v1354_v18 = vpack.c.bf16 %v135_v15, %v134_v14  ;;  %v126_v21 = vld [vmem:[%s1968_s1] sm:$0xff]  ;;  %v136_v22 = vld [vmem:[%s1966_s3 + $0x30] sm:$0xff]  ;;  %v137_v23 = vld [vmem:[%s1966_s3 + $0x38] sm:$0xff]  ;;  %v1342_v24 = vpack.c.bf16 %v43_v20, %v42_v19 }
   0x7   :  { %1351 = vmatprep.subr.bf16.mxu1 %v1350_v12  ;;  %1263 = vmatprep.mubr.msk.f32.mxu0 %vm44_vm0, %v34_v17  ;;  %v1358_v25 = vpack.c.bf16 %v137_v23, %v136_v22  ;;  %v35_v26 = vld [vmem:[%s1967_s0 + $0x8] sm:$0xff]  ;;  %v128_v28 = vld [vmem:[%s1968_s1 + $0x10] sm:$0xff]  ;;  %v129_v29 = vld [vmem:[%s1968_s1 + $0x18] sm:$0xff] }
   0x8   :  { %1282 = vmatprep.mubr.msk.f32.mxu1 %vm44_vm0, %v126_v21  ;;  %v127_v27 = vld [vmem:[%s1968_s1 + $0x8] sm:$0xff]  ;;  %v1610_v33 = vld [vmem:[%s1969_s4] sm:$0xff] }
   0x9   :  { %1337 = vmatpush3.bf16.msra.mxu0 %v1334_v8  ;;  %v679_v36 = vrot.slane %v1610_v33, %v678_v32  ;;  %v1616_v37 = vrot.slane %v1610_v33, %v342_v34  ;;  %v1619_v38 = vrot.slane %v1610_v33, %v658_v35  ;;  %v537_v52 = vrot.slane %v1610_v33, %v536_v39 }
   0xa   :  { %1353 = vmatpush3.bf16.msra.mxu1 %v1350_v12  ;;  %1339 = vmatprep.subr.bf16.mxu0 %v1338_v16  ;;  %v331_v57 = vrot.slane %v1610_v33, %v330_v48  ;;  %v517_v1 = vrot.slane %v1610_v33, %v516_v61  ;;  %v253_v8 = vsub.s32 1, %v1604_v31 }
   0xb   :  { %1355 = vmatprep.subr.bf16.mxu1 %v1354_v18 }
   0xc   :  { %v254_v13 = vrot.slane %v1610_v33, %v253_v8  ;;  %v652_v8 = vld [vmem:[%s1970_s8] sm:$0xff] }
   0xd   :  { %1341 = vmatpush3.bf16.msra.mxu0 %v1338_v16  ;;  %vm710_vm6 = vcmp.gt.f32.partialorder %v652_v8, 0.0  ;;  %v510_v8 = vld [vmem:[%s1972_s6] sm:$0xff] }
   0xe   :  { %1357 = vmatpush3.bf16.msra.mxu1 %v1354_v18  ;;  %1343 = vmatprep.subr.bf16.mxu0 %v1342_v24 }
   0xf   :  { %1359 = vmatprep.subr.bf16.mxu1 %v1358_v25 }
  0x11   :  { %1345 = vmatpush3.bf16.msra.mxu0 %v1342_v24  ;;  %v240_v24 = vsub.s32 0, %v1604_v31 }
  0x12   :  { %1361 = vmatpush3.bf16.msra.mxu1 %v1358_v25 }
  0x14   :  { %1264 = vmatmul.mubr.msk.f32.vlgmr.msra.gmra.mrb[0].mxu0 %vm44_vm0, %v35_v26 }
  0x15   :  { %1283 = vmatmul.mubr.msk.f32.vlgmr.msra.gmra.mrb[0].mxu1 %vm44_vm0, %v127_v27 }
  0x16   :  { %1285 = vmatprep.mubr.msk.f32.mxu1 %vm44_vm0, %v128_v28 }
  0x19   :  { %1286 = vmatmul.mubr.msk.f32.gmra.mrb[2].mxu1 %vm44_vm0, %v129_v29  ;;  %v241_v29 = vrot.slane %v1610_v33, %v240_v24 }
  0xe7   :  { %v1622_v40 = vpop.f32.mrb[0].mxu0 }
  0xe8   :  { %v1624_v41 = vpop.f32.mrb[0].mxu1  ;;  %v1626_v42 = vpop.f32.mrb[1].mxu0  ;;  %v681_v43 = vmul.f32 %v1622_v40, %v679_v36  ;;  %v333_v3 = vmul.f32 %v1622_v40, %v331_v57  ;;  %v256_v28 = vmul.f32 %v1622_v40, %v254_v13  ;;  %v243_v33 = vmul.f32 %v1622_v40, %v241_v29 }
  0xe9   :  { %v216_v44 = vpop.f32.mrb[1].mxu1  ;;  %v345_v45 = vmul.f32 %v1624_v41, %v1616_v37  ;;  %v1633_v46 = vpack.c.bf16 %v1622_v40, %v1626_v42  ;;  %v661_v47 = vmul.f32 %v1624_v41, %v1619_v38  ;;  %v680_v51 = vmul.f32 %v679_v36, %v1626_v42 }
  0xea   :  { %v1639_v49 = vpack.c.bf16 %v1624_v41, %v216_v44  ;;  %v685_v50 = vsel %vm244_vm1, %v681_v43, 0.0  ;;  %v538_v60 = vmul.f32 %v537_v52, %v216_v44  ;;  %v539_v62 = vmul.f32 %v1624_v41, %v537_v52 }
  0xeb   :  { %v351_v53 = vsel %vm244_vm1, %v345_v45, 0.0  ;;  %686 = vadd.xlane.f32.xlu0 %v685_v50  ;;  %1371 = vmatprep.subr.bf16.mxu1 %v1633_v46  ;;  %v667_v56 = vsel %vm244_vm1, %v661_v47, 0.0  ;;  %v682_v59 = vsel %vm244_vm1, %v680_v51, 0.0  ;;  %v332_v0 = vmul.f32 %v331_v57, %v1626_v42 }
  0xec   :  { %352 = vadd.xlane.f32.xlu1 %v351_v53  ;;  %v1646_v54 = vpop.f32.mrb[2].mxu1  ;;  %1363 = vmatprep.subr.bf16.mxu0 %v1639_v49  ;;  %v542_v63 = vsel %vm244_vm1, %v538_v60, 0.0  ;;  %v545_v2 = vsel %vm244_vm1, %v539_v62, 0.0  ;;  %v518_v5 = vmul.f32 %v517_v1, %v216_v44  ;;  %v337_v6 = vsel %vm244_vm1, %v333_v3, 0.0 }
  0xed   :  { %v1649_v55 = vpop.f32.mrb[3].mxu1  ;;  %1365 = vmatpush3.bf16.msra.mxu0 %v1639_v49  ;;  %1373 = vmatpush3.bf16.msra.mxu1 %v1633_v46  ;;  %v334_v4 = vsel %vm244_vm1, %v332_v0, 0.0  ;;  %v344_v7 = vmul.f32 %v1616_v37, %v216_v44  ;;  %v347_v9 = vmul.f32 %v1646_v54, %v1616_v37  ;;  %v660_v12 = vmul.f32 %v1619_v38, %v216_v44 }
  0xee   :  { %1379 = vmatprep.subr.bf16.mxu1 %v1639_v49  ;;  %v1658_v58 = vpack.c.bf16 %v1646_v54, %v1649_v55  ;;  %v522_v10 = vsel %vm244_vm1, %v518_v5, 0.0  ;;  %v541_v15 = vmul.f32 %v1646_v54, %v537_v52  ;;  %v255_v17 = vmul.f32 %v254_v13, %v1626_v42 }
  0xef   :  { %683 = vadd.xlane.f32.xlu0 %v682_v59  ;;  %v348_v11 = vsel %vm244_vm1, %v344_v7, 0.0  ;;  %v357_v14 = vsel %vm244_vm1, %v347_v9, 0.0  ;;  %v664_v16 = vsel %vm244_vm1, %v660_v12, 0.0  ;;  %v346_v19 = vmul.f32 %v1616_v37, %v1649_v55 }
  0xf0   :  { %668 = vadd.xlane.f32.xlu1 %v667_v56  ;;  %1367 = vmatprep.subr.bf16.mxu0 %v1658_v58  ;;  %v551_v18 = vsel %vm244_vm1, %v541_v15, 0.0  ;;  %v257_v20 = vsel %vm244_vm1, %v255_v17, 0.0  ;;  %v663_v21 = vmul.f32 %v1646_v54, %v1619_v38  ;;  %v662_v23 = vmul.f32 %v1619_v38, %v1649_v55 }
  0xf1   :  { %1369 = vmatpush3.bf16.msra.mxu0 %v1658_v58  ;;  %v354_v22 = vsel %vm244_vm1, %v346_v19, 0.0  ;;  %v540_v26 = vmul.f32 %v537_v52, %v1649_v55  ;;  %v519_v34 = vmul.f32 %v1624_v41, %v517_v1  ;;  %v260_v35 = vsel %vm244_vm1, %v256_v28, 0.0  ;;  %v655_v19 = vld [vmem:[%s1970_s8 + $0x18] sm:$0xff]  ;;  %v327_v28 = vld [vmem:[%s1971_s7 + $0x8] sm:$0xff] }
  0xf2   :  { %1375 = vmatprep.subr.bf16.mxu0 %v1633_v46  ;;  %v673_v25 = vsel %vm244_vm1, %v663_v21, 0.0  ;;  %v670_v27 = vsel %vm244_vm1, %v662_v23, 0.0  ;;  %v242_v36 = vmul.f32 %v241_v29, %v1626_v42  ;;  %v520_v38 = vmul.f32 %v517_v1, %v1649_v55  ;;  %v654_v23 = vld [vmem:[%s1970_s8 + $0x10] sm:$0xff] }
  0xf3   :  { %543 = vadd.xlane.f32.xlu0 %v542_v63  ;;  %v548_v32 = vsel %vm244_vm1, %v540_v26, 0.0  ;;  %v525_v37 = vsel %vm244_vm1, %v519_v34, 0.0  ;;  %v521_v41 = vmul.f32 %v1646_v54, %v517_v1  ;;  %v248_v44 = vsel %vm244_vm1, %v243_v33, 0.0 }
  0xf4   :  { %546 = vadd.xlane.f32.xlu1 %v545_v2  ;;  %v245_v39 = vsel %vm244_vm1, %v242_v36, 0.0  ;;  %v528_v43 = vsel %vm244_vm1, %v520_v38, 0.0  ;;  %v266_v45 = vand.u32 127, %v238_v30  ;;  %v653_v30 = vld [vmem:[%s1970_s8 + $0x8] sm:$0xff]  ;;  %vm713_vm10 = vcmp.gt.f32.partialorder %v655_v19, 0.0 }
  0xf5   :  { %v531_v42 = vsel %vm244_vm1, %v521_v41, 0.0  ;;  %vm711_vm3 = vcmp.gt.f32.partialorder %v653_v30, 0.0  ;;  %vm712_vm11 = vcmp.gt.f32.partialorder %v654_v23, 0.0  ;;  %vm397_vm15 = vcmp.gt.f32.partialorder %v327_v28, 0.0 }
  0xf6   :  { %v271_v47 = vadd.s32 4294967288, %v266_v45  ;;  %v1717_v51 = vsub.s32 %v266_v45, %v1604_v31  ;;  %v373_v7 = vadd.s32 4294967280, %v266_v45 }
  0xf7   :  { %335 = vadd.xlane.f32.xlu0 %v334_v4 }
  0xf8   :  { %338 = vadd.xlane.f32.xlu1 %v337_v6  ;;  %v1714_v50 = vsub.s32 %v271_v47, %v1604_v31 }
  0xfb   :  { %523 = vadd.xlane.f32.xlu0 %v522_v10  ;;  %v380_v10 = vadd.s32 4294967272, %v266_v45 }
  0xfc   :  { %349 = vadd.xlane.f32.xlu1 %v348_v11 }
  0xff   :  { %358 = vadd.xlane.f32.xlu0 %v357_v14  ;;  %v376_v14 = vsub.s32 %v373_v7, %v1604_v31  ;;  %v512_v7 = vld [vmem:[%s1972_s6 + $0x10] sm:$0xff] }
 0x100   :  { %665 = vadd.xlane.f32.xlu1 %v664_v16  ;;  %v383_v16 = vsub.s32 %v380_v10, %v1604_v31  ;;  %v326_v31 = vld [vmem:[%s1971_s7] sm:$0xff] }
 0x101   :  { %vm396_vm12 = vcmp.gt.f32.partialorder %v326_v31, 0.0 }
 0x103   :  { %552 = vadd.xlane.f32.xlu0 %v551_v18 }
 0x104   :  { %258 = vadd.xlane.f32.xlu1 %v257_v20 }
 0x107   :  { %355 = vadd.xlane.f32.xlu0 %v354_v22 }
 0x108   :  { %674 = vadd.xlane.f32.xlu1 %v673_v25 }
 0x10b   :  { %671 = vadd.xlane.f32.xlu0 %v670_v27 }
 0x10c   :  { %549 = vadd.xlane.f32.xlu1 %v548_v32 }
 0x10f   :  { %261 = vadd.xlane.f32.xlu0 %v260_v35 }
 0x110   :  { %526 = vadd.xlane.f32.xlu1 %v525_v37 }
 0x113   :  { %246 = vadd.xlane.f32.xlu0 %v245_v39 }
 0x114   :  { %529 = vadd.xlane.f32.xlu1 %v528_v43 }
 0x117   :  { %249 = vadd.xlane.f32.xlu0 %v248_v44 }
 0x118   :  { %532 = vadd.xlane.f32.xlu1 %v531_v42 }
 0x178   :  { %v687_v48 = vpop.xlane.xlu0 %686 }
 0x179   :  { %v353_v40 = vpop.xlane.xlu1 %352  ;;  %v697_v53 = vrot.slane %v687_v48, %v1714_v50 }
 0x17a   :  { %v371_v20 = vrot.slane %v353_v40, %v1714_v50 }
 0x17c   :  { %v684_v52 = vpop.xlane.xlu0 %683 }
 0x17d   :  { %v669_v54 = vpop.xlane.xlu1 %668  ;;  %v693_v55 = vrot.slane %v684_v52, %v1717_v51 }
 0x17f   :  { %v1722_v56 = vsel %vm276_vm2, %v697_v53, %v693_v55 }
 0x180   :  { %v544_v57 = vpop.xlane.xlu0 %543  ;;  %v707_v59 = vadd.f32 %v1722_v56, %v669_v54 }
 0x181   :  { %v547_v60 = vpop.xlane.xlu1 %546  ;;  %v561_v25 = vrot.slane %v544_v57, %v1717_v51 }
 0x182   :  { %vm715_vm4 = vcmp.gt.f32.partialorder %v707_v59, 0.0  ;;  %v719_v61 = vmul.f32 0.2, %v707_v59  ;;  %v565_v24 = vrot.slane %v547_v60, %v1714_v50  ;;  %v511_v60 = vld [vmem:[%s1972_s6 + $0x8] sm:$0xff] }
 0x184   :  { %v336_v62 = vpop.xlane.xlu0 %335  ;;  %v723_v63 = vsel %vm715_vm4, %v707_v59, %v719_v61  ;;  %v566_v39 = vsel %vm276_vm2, %v565_v24, %v561_v25 }
 0x185   :  { %v339_v0 = vpop.xlane.xlu1 %338  ;;  %v1728_v1 = vsel %vm711_vm3, %v723_v63, -9e+15 }
 0x186   :  { %v733_v2 = vsel %vm303_vm5, %v1728_v1, -inf }
 0x187   :  { %734 = vmax.xlane.f32.xlu1 %v733_v2 }
 0x188   :  { %v1732_v3 = vpop.xlane.xlu0 %523 }
 0x189   :  { %v350_v4 = vpop.xlane.xlu1 %349 }
 0x18a   :  { %v367_v15 = vrot.slane %v350_v4, %v1717_v51 }
 0x18c   :  { %v359_v5 = vpop.xlane.xlu0 %358  ;;  %v372_v29 = vsel %vm276_vm2, %v371_v20, %v367_v15 }
 0x18d   :  { %v666_v6 = vpop.xlane.xlu1 %665  ;;  %v384_v32 = vrot.slane %v359_v5, %v383_v16 }
 0x18e   :  { %v706_v9 = vadd.f32 %v1722_v56, %v666_v6 }
 0x190   :  { %v718_v11 = vmul.f32 0.2, %v706_v9  ;;  %v553_v12 = vpop.xlane.xlu0 %552  ;;  %vm714_vm7 = vcmp.gt.f32.partialorder %v706_v9, 0.0 }
 0x191   :  { %v1738_v13 = vpop.xlane.xlu1 %258  ;;  %v575_v42 = vrot.slane %v553_v12, %v383_v16 }
 0x192   :  { %v722_v17 = vsel %vm714_vm7, %v706_v9, %v718_v11  ;;  %v270_v45 = vrot.slane %v1738_v13, %v1717_v51 }
 0x193   :  { %v1743_v18 = vsel %vm710_vm6, %v722_v17, -9e+15  ;;  %vm589_vm6 = vcmp.gt.f32.partialorder %v511_v60, 0.0  ;;  %v513_v17 = vld [vmem:[%s1972_s6 + $0x18] sm:$0xff] }
 0x194   :  { %v356_v21 = vpop.xlane.xlu0 %355  ;;  %v730_v22 = vsel %vm303_vm5, %v1743_v18, -inf }
 0x195   :  { %v377_v26 = vrot.slane %v356_v21, %v376_v14  ;;  %v675_v27 = vpop.xlane.xlu1 %674  ;;  %731 = vmax.xlane.f32.xlu0 %v730_v22  ;;  %v236_v22 = vld [vmem:[%s1973_s5] sm:$0xff] }
 0x196   :  { %v709_v34 = vadd.f32 %v1722_v56, %v675_v27 }
 0x197   :  { %v379_v35 = vsel %vm378_vm8, %v377_v26, %v372_v29 }
 0x198   :  { %v721_v36 = vmul.f32 0.2, %v709_v34  ;;  %v672_v37 = vpop.xlane.xlu0 %671  ;;  %vm717_vm14 = vcmp.gt.f32.partialorder %v709_v34, 0.0  ;;  %v386_v38 = vsel %vm385_vm9, %v384_v32, %v379_v35 }
 0x199   :  { %v708_v33 = vadd.f32 %v1722_v56, %v672_v37  ;;  %v550_v43 = vpop.xlane.xlu1 %549  ;;  %v394_v41 = vadd.f32 %v386_v38, %v336_v62  ;;  %v395_v44 = vadd.f32 %v386_v38, %v339_v0  ;;  %v237_v37 = vld [vmem:[%s1973_s5 + $0x8] sm:$0xff] }
 0x19a   :  { %v570_v47 = vrot.slane %v550_v43, %v376_v14  ;;  %v725_v48 = vsel %vm717_vm14, %v709_v34, %v721_v36  ;;  %vm293_vm14 = vcmp.gt.f32.partialorder %v236_v22, 0.0 }
 0x19b   :  { %v720_v40 = vmul.f32 0.2, %v708_v33  ;;  %v1771_v52 = vsel %vm713_vm10, %v725_v48, -9e+15  ;;  %vm716_vm0 = vcmp.gt.f32.partialorder %v708_v33, 0.0  ;;  %vm398_vm3 = vcmp.gt.f32.partialorder %v394_v41, 0.0 }
 0x19c   :  { %v571_v53 = vsel %vm378_vm8, %v570_v47, %v566_v39  ;;  %v262_v54 = vpop.xlane.xlu0 %261  ;;  %v739_v55 = vsel %vm303_vm5, %v1771_v52, -inf  ;;  %v400_v56 = vmul.f32 0.2, %v394_v41  ;;  %vm399_vm4 = vcmp.gt.f32.partialorder %v395_v44, 0.0 }
 0x19d   :  { %v275_v30 = vrot.slane %v262_v54, %v1714_v50  ;;  %740 = vmax.xlane.f32.xlu1 %v739_v55  ;;  %v576_v51 = vsel %vm385_vm9, %v575_v42, %v571_v53  ;;  %v527_v57 = vpop.xlane.xlu1 %526  ;;  %v724_v59 = vsel %vm716_vm0, %v708_v33, %v720_v40  ;;  %v401_v61 = vmul.f32 0.2, %v395_v44 }
 0x19e   :  { %v585_v62 = vadd.f32 %v576_v51, %v527_v57  ;;  %v1782_v63 = vsel %vm712_vm11, %v724_v59, -9e+15  ;;  %v402_v0 = vsel %vm398_vm3, %v394_v41, %v400_v56  ;;  %v584_v2 = vadd.f32 %v576_v51, %v1732_v3 }
 0x19f   :  { %v736_v50 = vsel %vm303_vm5, %v1782_v63, -inf  ;;  %v1788_v4 = vsel %vm396_vm12, %v402_v0, -9e+15  ;;  %v277_v5 = vsel %vm276_vm2, %v275_v30, %v270_v45  ;;  %v403_v6 = vsel %vm399_vm4, %v395_v44, %v401_v61 }
 0x1a0   :  { %v597_v9 = vmul.f32 0.2, %v585_v62  ;;  %v407_v3 = vsel %vm406_vm13, %v1788_v4, -inf  ;;  %v247_v10 = vpop.xlane.xlu0 %246  ;;  %vm593_vm7 = vcmp.gt.f32.partialorder %v585_v62, 0.0  ;;  %v1800_v13 = vsel %vm397_vm15, %v403_v6, -9e+15 }
 0x1a1   :  { %737 = vmax.xlane.f32.xlu1 %v736_v50  ;;  %v530_v11 = vpop.xlane.xlu1 %529  ;;  %408 = vmax.xlane.f32.xlu0 %v407_v3  ;;  %v291_v12 = vadd.f32 %v277_v5, %v247_v10  ;;  %vm592_vm2 = vcmp.gt.f32.partialorder %v584_v2, 0.0  ;;  %v596_v14 = vmul.f32 0.2, %v584_v2  ;;  %vm590_vm8 = vcmp.gt.f32.partialorder %v512_v7, 0.0 }
 0x1a2   :  { %v586_v15 = vadd.f32 %v576_v51, %v530_v11  ;;  %v601_v16 = vsel %vm593_vm7, %v585_v62, %v597_v9  ;;  %vm588_vm9 = vcmp.gt.f32.partialorder %v510_v8, 0.0  ;;  %v410_v24 = vsel %vm406_vm13, %v1800_v13, -inf }
 0x1a3   :  { %v297_v19 = vmul.f32 0.2, %v291_v12  ;;  %v1806_v20 = vsel %vm589_vm6, %v601_v16, -9e+15  ;;  %v600_v21 = vsel %vm592_vm2, %v584_v2, %v596_v14  ;;  %vm295_vm10 = vcmp.gt.f32.partialorder %v291_v12, 0.0 }
 0x1a4   :  { %v598_v23 = vmul.f32 0.2, %v586_v15  ;;  %v611_v31 = vsel %vm406_vm13, %v1806_v20, -inf  ;;  %v250_v25 = vpop.xlane.xlu0 %249  ;;  %vm594_vm11 = vcmp.gt.f32.partialorder %v586_v15, 0.0  ;;  %v1816_v28 = vsel %vm588_vm9, %v600_v21, -9e+15 }
 0x1a5   :  { %612 = vmax.xlane.f32.xlu1 %v611_v31  ;;  %v533_v26 = vpop.xlane.xlu1 %532  ;;  %411 = vmax.xlane.f32.xlu0 %v410_v24  ;;  %v292_v27 = vadd.f32 %v277_v5, %v250_v25  ;;  %vm591_vm12 = vcmp.gt.f32.partialorder %v513_v17, 0.0  ;;  %v299_v34 = vsel %vm295_vm10, %v291_v12, %v297_v19  ;;  %v608_v33 = vsel %vm406_vm13, %v1816_v28, -inf }
 0x1a6   :  { %v587_v29 = vadd.f32 %v576_v51, %v533_v26  ;;  %v602_v32 = vsel %vm594_vm11, %v586_v15, %v598_v23  ;;  %v1825_v43 = vsel %vm293_vm14, %v299_v34, -9e+15  ;;  %vm294_vm3 = vcmp.gt.f32.partialorder %v237_v37, 0.0 }
 0x1a7   :  { %v298_v35 = vmul.f32 0.2, %v292_v27  ;;  %v606_v36 = vsel %vm590_vm8, %v602_v32, -9e+15  ;;  %vm296_vm15 = vcmp.gt.f32.partialorder %v292_v27, 0.0  ;;  %v304_v47 = vsel %vm303_vm5, %v1825_v43, -inf }
 0x1a8   :  { %v599_v38 = vmul.f32 0.2, %v587_v29  ;;  %v614_v39 = vsel %vm406_vm13, %v606_v36, -inf  ;;  %vm595_vm0 = vcmp.gt.f32.partialorder %v587_v29, 0.0 }
 0x1a9   :  { %615 = vmax.xlane.f32.xlu1 %v614_v39  ;;  %609 = vmax.xlane.f32.xlu0 %v608_v33  ;;  %v300_v44 = vsel %vm296_vm15, %v292_v27, %v298_v35 }
 0x1aa   :  { %v603_v41 = vsel %vm595_vm0, %v587_v29, %v599_v38  ;;  %v1831_v48 = vsel %vm294_vm3, %v300_v44, -9e+15 }
 0x1ab   :  { %v607_v42 = vsel %vm591_vm12, %v603_v41, -9e+15  ;;  %v307_v40 = vsel %vm303_vm5, %v1831_v48, -inf }
 0x1ac   :  { %v617_v45 = vsel %vm406_vm13, %v607_v42, -inf }
 0x1ad   :  { %618 = vmax.xlane.f32.xlu1 %v617_v45  ;;  %305 = vmax.xlane.f32.xlu0 %v304_v47 }
 0x1b1   :  { %308 = vmax.xlane.f32.xlu0 %v307_v40 }
 0x214   :  { %v735_v53 = vpop.xlane.xlu1 %734 }
 0x215   :  { %v743_v54 = vsub.f32 %v1728_v1, %v735_v53 }
 0x217   :  { %v748_v55 = vmul.f32 1.442695, %v743_v54 }
 0x219   :  { %1392 = vpow2.f32 %v748_v55 }
 0x222   :  { %v732_v56 = vpop.xlane.xlu0 %731 }
 0x223   :  { %v1836_v30 = vpop.eup %1392  ;;  %v742_v51 = vsub.f32 %v1743_v18, %v732_v56 }
 0x224   :  { %v757_v57 = vsel %vm303_vm5, %v1836_v30, 0.0 }
 0x225   :  { %v746_v59 = vmul.f32 1.442695, %v742_v51  ;;  %758 = vadd.xlane.f32.xlu1 %v757_v57 }
 0x227   :  { %1394 = vpow2.f32 %v746_v59 }
 0x22a   :  { %v741_v60 = vpop.xlane.xlu1 %740 }
 0x22b   :  { %v745_v61 = vsub.f32 %v1771_v52, %v741_v60 }
 0x22d   :  { %v752_v62 = vmul.f32 1.442695, %v745_v61 }
 0x22e   :  { %v738_v0 = vpop.xlane.xlu1 %737  ;;  %v409_v2 = vpop.xlane.xlu0 %408 }
 0x22f   :  { %1396 = vpow2.f32 %v752_v62  ;;  %v744_v1 = vsub.f32 %v1782_v63, %v738_v0  ;;  %v413_v50 = vsub.f32 %v1788_v4, %v409_v2 }
 0x231   :  { %v1844_v5 = vpop.eup %1394  ;;  %v750_v18 = vmul.f32 1.442695, %v744_v1  ;;  %v415_v6 = vmul.f32 1.442695, %v413_v50 }
 0x232   :  { %v613_v7 = vpop.xlane.xlu1 %612  ;;  %v412_v8 = vpop.xlane.xlu0 %411  ;;  %v754_v9 = vsel %vm303_vm5, %v1844_v5, 0.0 }
 0x233   :  { %1398 = vpow2.f32 %v750_v18  ;;  %v621_v52 = vsub.f32 %v1806_v20, %v613_v7  ;;  %v414_v3 = vsub.f32 %v1800_v13, %v412_v8  ;;  %755 = vadd.xlane.f32.xlu0 %v754_v9 }
 0x234   :  { %1400 = vpow2.f32 %v415_v6 }
 0x235   :  { %v626_v10 = vmul.f32 1.442695, %v621_v52  ;;  %v417_v63 = vmul.f32 1.442695, %v414_v3 }
 0x236   :  { %v616_v11 = vpop.xlane.xlu1 %615  ;;  %v610_v4 = vpop.xlane.xlu0 %609 }
 0x237   :  { %1402 = vpow2.f32 %v626_v10  ;;  %v622_v12 = vsub.f32 %v606_v36, %v616_v11  ;;  %v620_v14 = vsub.f32 %v1816_v28, %v610_v4 }
 0x238   :  { %1404 = vpow2.f32 %v417_v63 }
 0x239   :  { %v1851_v15 = vpop.eup %1396  ;;  %v628_v16 = vmul.f32 1.442695, %v622_v12  ;;  %v624_v17 = vmul.f32 1.442695, %v620_v14 }
 0x23a   :  { %v619_v19 = vpop.xlane.xlu1 %618  ;;  %v306_v21 = vpop.xlane.xlu0 %305  ;;  %v763_v13 = vsel %vm303_vm5, %v1851_v15, 0.0 }
 0x23b   :  { %1406 = vpow2.f32 %v628_v16  ;;  %v623_v20 = vsub.f32 %v607_v42, %v619_v19  ;;  %v310_v22 = vsub.f32 %v1825_v43, %v306_v21  ;;  %764 = vadd.xlane.f32.xlu1 %v763_v13 }
 0x23c   :  { %1408 = vpow2.f32 %v624_v17 }
 0x23d   :  { %v1856_v23 = vpop.eup %1398  ;;  %v630_v31 = vmul.f32 1.442695, %v623_v20  ;;  %v312_v24 = vmul.f32 1.442695, %v310_v22 }
 0x23e   :  { %v1858_v25 = vpop.eup %1400  ;;  %v309_v26 = vpop.xlane.xlu0 %308  ;;  %v760_v27 = vsel %vm303_vm5, %v1856_v23, 0.0 }
 0x23f   :  { %1410 = vpow2.f32 %v630_v31  ;;  %v311_v28 = vsub.f32 %v1831_v48, %v309_v26  ;;  %761 = vadd.xlane.f32.xlu1 %v760_v27  ;;  %v419_v29 = vsel %vm406_vm13, %v1858_v25, 0.0 }
 0x240   :  { %1412 = vpow2.f32 %v312_v24  ;;  %420 = vadd.xlane.f32.xlu0 %v419_v29 }
 0x241   :  { %v1865_v32 = vpop.eup %1402  ;;  %v314_v34 = vmul.f32 1.442695, %v311_v28 }
 0x242   :  { %v1405_v35 = vpop.eup %1404  ;;  %v635_v36 = vsel %vm406_vm13, %v1865_v32, 0.0 }
 0x243   :  { %1414 = vpow2.f32 %v314_v34  ;;  %636 = vadd.xlane.f32.xlu1 %v635_v36  ;;  %v422_v37 = vsel %vm406_vm13, %v1405_v35, 0.0 }
 0x244   :  { %423 = vadd.xlane.f32.xlu0 %v422_v37 }
 0x245   :  { %v1870_v38 = vpop.eup %1406 }
 0x246   :  { %v1872_v39 = vpop.eup %1408  ;;  %v638_v33 = vsel %vm406_vm13, %v1870_v38, 0.0 }
 0x247   :  { %639 = vadd.xlane.f32.xlu1 %v638_v33  ;;  %v632_v43 = vsel %vm406_vm13, %v1872_v39, 0.0 }
 0x248   :  { %633 = vadd.xlane.f32.xlu0 %v632_v43 }
 0x249   :  { %v1878_v41 = vpop.eup %1410 }
 0x24a   :  { %v1880_v44 = vpop.eup %1412  ;;  %v641_v42 = vsel %vm406_vm13, %v1878_v41, 0.0 }
 0x24b   :  { %642 = vadd.xlane.f32.xlu1 %v641_v42  ;;  %v316_v45 = vsel %vm303_vm5, %v1880_v44, 0.0 }
 0x24c   :  { %317 = vadd.xlane.f32.xlu0 %v316_v45 }
 0x24d   :  { %v1886_v47 = vpop.eup %1414 }
 0x24e   :  { %v319_v48 = vsel %vm303_vm5, %v1886_v47, 0.0 }
 0x250   :  { %320 = vadd.xlane.f32.xlu0 %v319_v48 }
 0x2b2   :  { %v759_v40 = vpop.xlane.xlu1 %758 }
 0x2b3   :  { %1416 = vrcp.f32 %v759_v40 }
 0x2bd   :  { %v1417_v55 = vpop.eup %1416 }
 0x2be   :  { %v771_v59 = vmul.f32 %v1417_v55, %v1836_v30 }
 0x2c0   :  { %v756_v53 = vpop.xlane.xlu0 %755 }
 0x2c1   :  { %1418 = vrcp.f32 %v756_v53 }
 0x2c8   :  { %v765_v54 = vpop.xlane.xlu1 %764 }
 0x2c9   :  { %1420 = vrcp.f32 %v765_v54 }
 0x2cb   :  { %v1419_v56 = vpop.eup %1418 }
 0x2cc   :  { %v762_v51 = vpop.xlane.xlu1 %761  ;;  %v770_v57 = vmul.f32 %v1419_v56, %v1844_v5 }
 0x2cd   :  { %1422 = vrcp.f32 %v762_v51  ;;  %v421_v60 = vpop.xlane.xlu0 %420 }
 0x2ce   :  { %1424 = vrcp.f32 %v421_v60  ;;  %1303 = vmatprep.mubr.msk.f32.mxu1 %vm303_vm5, %v770_v57 }
 0x2cf   :  { %1304 = vmatmul.mubr.msk.f32.vlgmr.msra.gmra.mrb[4].mxu1 %vm303_vm5, %v771_v59 }
 0x2d0   :  { %1381 = vmatpush3.bf16.msra.mxu1 %v1639_v49  ;;  %v637_v61 = vpop.xlane.xlu1 %636 }
 0x2d1   :  { %1383 = vmatprep.subr.bf16.mxu1 %v1658_v58  ;;  %v424_v62 = vpop.xlane.xlu0 %423 }
 0x2d2   :  { %1426 = vrcp.f32 %v424_v62 }
 0x2d3   :  { %1428 = vrcp.f32 %v637_v61  ;;  %v1421_v2 = vpop.eup %1420 }
 0x2d4   :  { %1385 = vmatpush3.bf16.msra.mxu1 %v1658_v58  ;;  %v640_v0 = vpop.xlane.xlu1 %639  ;;  %v773_v7 = vmul.f32 %v1421_v2, %v1851_v15 }
 0x2d5   :  { %1430 = vrcp.f32 %v640_v0  ;;  %v634_v30 = vpop.xlane.xlu0 %633 }
 0x2d6   :  { %1432 = vrcp.f32 %v634_v30 }
 0x2d7   :  { %v1423_v1 = vpop.eup %1422 }
 0x2d8   :  { %v1425_v50 = vpop.eup %1424  ;;  %v643_v5 = vpop.xlane.xlu1 %642  ;;  %v772_v18 = vmul.f32 %v1423_v1, %v1856_v23 }
 0x2d9   :  { %1434 = vrcp.f32 %v643_v5  ;;  %v318_v49 = vpop.xlane.xlu0 %317  ;;  %v427_v6 = vmul.f32 %v1425_v50, %v1858_v25 }
 0x2da   :  { %1436 = vrcp.f32 %v318_v49  ;;  %1306 = vmatprep.mubr.msk.f32.mxu1 %vm303_vm5, %v772_v18 }
 0x2db   :  { %1296 = vmatprep.mubr.msk.f32.mxu0 %vm406_vm13, %v427_v6  ;;  %1307 = vmatmul.mubr.msk.f32.gmra.mrb[6].mxu1 %vm303_vm5, %v773_v7 }
 0x2dc   :  { %v1427_v58 = vpop.eup %1426 }
 0x2dd   :  { %v428_v8 = vmul.f32 %v1427_v58, %v1405_v35  ;;  %v321_v9 = vpop.xlane.xlu0 %320  ;;  %v1429_v52 = vpop.eup %1428 }
 0x2de   :  { %1438 = vrcp.f32 %v321_v9  ;;  %v649_v11 = vmul.f32 %v1429_v52, %v1865_v32 }
 0x2df   :  { %v1431_v3 = vpop.eup %1430  ;;  %1297 = vmatmul.mubr.msk.f32.vlgmr.msra.gmra.mrb[2].mxu0 %vm406_vm13, %v428_v8 }
 0x2e0   :  { %v1433_v10 = vpop.eup %1432  ;;  %1377 = vmatpush3.bf16.msra.mxu0 %v1633_v46  ;;  %v650_v12 = vmul.f32 %v1431_v3, %v1870_v38 }
 0x2e1   :  { %v648_v63 = vmul.f32 %v1433_v10, %v1872_v39 }
 0x2e3   :  { %v1435_v4 = vpop.eup %1434  ;;  %1324 = vmatprep.mubr.msk.f32.mxu1 %vm406_vm13, %v648_v63 }
 0x2e4   :  { %v1437_v14 = vpop.eup %1436  ;;  %1325 = vmatmul.mubr.msk.f32.vlgmr.msra.gmra.mrb[4].mxu1 %vm406_vm13, %v649_v11  ;;  %v651_v15 = vmul.f32 %v1435_v4, %v1878_v41 }
 0x2e5   :  { %1327 = vmatprep.mubr.msk.f32.mxu1 %vm406_vm13, %v650_v12  ;;  %v324_v16 = vmul.f32 %v1437_v14, %v1880_v44 }
 0x2e7   :  { %1313 = vmatprep.mubr.msk.f32.mxu0 %vm303_vm5, %v324_v16 }
 0x2e8   :  { %v1439_v46 = vpop.eup %1438  ;;  %1328 = vmatmul.mubr.msk.f32.gmra.mrb[6].mxu1 %vm406_vm13, %v651_v15 }
 0x2e9   :  { %v325_v17 = vmul.f32 %v1439_v46, %v1886_v47 }
 0x2eb   :  { %1314 = vmatmul.mubr.msk.f32.vlgmr.msra.gmra.mrb[2].mxu0 %vm303_vm5, %v325_v17 }
 0x3b7   :  { %v1326_v19 = vpop.f32.mrb[4].mxu1 }
 0x3b8   :  { %v1052_v21 = vmul.f32 0.5, %v1326_v19  ;;  %v1032_v13 = vpop.f32.mrb[5].mxu1 }
 0x3b9   :  { %v1051_v20 = vmul.f32 0.5, %v1032_v13 }
 0x3ba   :  { %v1096_v22 = vmin.f32 %v1052_v21, 0.0  ;;  %vm1092_vm5 = vcmp.gt.f32.partialorder %v1052_v21, 0.0 }
 0x3bb   :  { %v1095_v23 = vmin.f32 %v1051_v20, 0.0  ;;  %v1329_v31 = vpop.f32.mrb[6].mxu1  ;;  %vm1091_vm13 = vcmp.gt.f32.partialorder %v1051_v20, 0.0 }
 0x3bc   :  { %v1101_v24 = vmul.f32 1.442695, %v1096_v22  ;;  %v1054_v25 = vmul.f32 0.5, %v1329_v31  ;;  %v1042_v26 = vpop.f32.mrb[7].mxu1 }
 0x3bd   :  { %v1099_v27 = vmul.f32 1.442695, %v1095_v23  ;;  %v1053_v28 = vmul.f32 0.5, %v1042_v26 }
 0x3be   :  { %1440 = vpow2.f32 %v1101_v24  ;;  %v1098_v29 = vmin.f32 %v1054_v25, 0.0  ;;  %v1315_v32 = vpop.f32.mrb[2].mxu0  ;;  %vm1094_vm7 = vcmp.gt.f32.partialorder %v1054_v25, 0.0 }
 0x3bf   :  { %1442 = vpow2.f32 %v1099_v27  ;;  %v1097_v34 = vmin.f32 %v1053_v28, 0.0  ;;  %v953_v35 = vmul.f32 0.5, %v1315_v32  ;;  %v943_v36 = vpop.f32.mrb[3].mxu0  ;;  %vm1093_vm2 = vcmp.gt.f32.partialorder %v1053_v28, 0.0 }
 0x3c0   :  { %v1105_v37 = vmul.f32 1.442695, %v1098_v29  ;;  %v952_v38 = vmul.f32 0.5, %v943_v36 }
 0x3c1   :  { %v1103_v39 = vmul.f32 1.442695, %v1097_v34  ;;  %v1058_v33 = vmin.f32 %v953_v35, 0.0  ;;  %vm1056_vm4 = vcmp.gt.f32.partialorder %v953_v35, 0.0 }
 0x3c2   :  { %v1057_v43 = vmin.f32 %v952_v38, 0.0  ;;  %1444 = vpow2.f32 %v1105_v37  ;;  %vm1055_vm6 = vcmp.gt.f32.partialorder %v952_v38, 0.0 }
 0x3c3   :  { %v1061_v41 = vmul.f32 1.442695, %v1058_v33  ;;  %1446 = vpow2.f32 %v1103_v39 }
 0x3c4   :  { %v1059_v44 = vmul.f32 1.442695, %v1057_v43 }
 0x3c5   :  { %1448 = vpow2.f32 %v1061_v41 }
 0x3c6   :  { %1450 = vpow2.f32 %v1059_v44 }
 0x3c8   :  { %v1441_v42 = vpop.eup %1440 }
 0x3c9   :  { %v1443_v45 = vpop.eup %1442  ;;  %v1198_v47 = vadd.f32 -1.0, %v1441_v42 }
 0x3ca   :  { %v1197_v48 = vadd.f32 -1.0, %v1443_v45 }
 0x3cb   :  { %v1112_v40 = vsel %vm1092_vm5, %v1052_v21, %v1198_v47 }
 0x3cc   :  { %v1118_v53 = vsel %vm244_vm1, %v1112_v40, -inf  ;;  %v1111_v54 = vsel %vm1091_vm13, %v1051_v20, %v1197_v48  ;;  %v1445_v55 = vpop.eup %1444 }
 0x3cd   :  { %1119 = vmax.xlane.f32.xlu1 %v1118_v53  ;;  %v1115_v56 = vsel %vm244_vm1, %v1111_v54, -inf  ;;  %v1447_v51 = vpop.eup %1446  ;;  %v1200_v61 = vadd.f32 -1.0, %v1445_v55 }
 0x3ce   :  { %1116 = vmax.xlane.f32.xlu0 %v1115_v56  ;;  %v1199_v0 = vadd.f32 -1.0, %v1447_v51 }
 0x3cf   :  { %v1449_v57 = vpop.eup %1448  ;;  %v1114_v5 = vsel %vm1094_vm7, %v1054_v25, %v1200_v61 }
 0x3d0   :  { %v1451_v59 = vpop.eup %1450  ;;  %v1196_v60 = vadd.f32 -1.0, %v1449_v57  ;;  %v1113_v18 = vsel %vm1093_vm2, %v1053_v28, %v1199_v0  ;;  %v1124_v49 = vsel %vm244_vm1, %v1114_v5, -inf }
 0x3d1   :  { %v1195_v62 = vadd.f32 -1.0, %v1451_v59  ;;  %v1121_v6 = vsel %vm244_vm1, %v1113_v18, -inf }
 0x3d2   :  { %v1066_v30 = vsel %vm1056_vm4, %v953_v35, %v1196_v60 }
 0x3d3   :  { %v1070_v2 = vsel %vm244_vm1, %v1066_v30, -inf  ;;  %v1065_v1 = vsel %vm1055_vm6, %v952_v38, %v1195_v62 }
 0x3d4   :  { %1071 = vmax.xlane.f32.xlu1 %v1070_v2  ;;  %v1067_v50 = vsel %vm244_vm1, %v1065_v1, -inf }
 0x3d5   :  { %1068 = vmax.xlane.f32.xlu0 %v1067_v50 }
 0x3d8   :  { %1125 = vmax.xlane.f32.xlu1 %v1124_v49 }
 0x3d9   :  { %1122 = vmax.xlane.f32.xlu0 %v1121_v6 }
 0x45a   :  { %v1120_v7 = vpop.xlane.xlu1 %1119 }
 0x45b   :  { %v1128_v58 = vsub.f32 %v1112_v40, %v1120_v7  ;;  %v1117_v8 = vpop.xlane.xlu0 %1116 }
 0x45c   :  { %v1127_v9 = vsub.f32 %v1111_v54, %v1117_v8 }
 0x45d   :  { %v1133_v52 = vmul.f32 1.442695, %v1128_v58 }
 0x45e   :  { %v1131_v3 = vmul.f32 1.442695, %v1127_v9 }
 0x45f   :  { %1452 = vpow2.f32 %v1133_v52 }
 0x460   :  { %1454 = vpow2.f32 %v1131_v3 }
 0x461   :  { %v1072_v10 = vpop.xlane.xlu1 %1071 }
 0x462   :  { %v1923_v63 = vsub.f32 %v1066_v30, %v1072_v10  ;;  %v1069_v11 = vpop.xlane.xlu0 %1068 }
 0x463   :  { %v1925_v4 = vsub.f32 %v1065_v1, %v1069_v11 }
 0x464   :  { %v1077_v12 = vmul.f32 1.442695, %v1923_v63 }
 0x465   :  { %v1075_v14 = vmul.f32 1.442695, %v1925_v4  ;;  %v1126_v15 = vpop.xlane.xlu1 %1125 }
 0x466   :  { %1456 = vpow2.f32 %v1077_v12  ;;  %v1929_v16 = vsub.f32 %v1114_v5, %v1126_v15  ;;  %v1123_v46 = vpop.xlane.xlu0 %1122 }
 0x467   :  { %1458 = vpow2.f32 %v1075_v14  ;;  %v1129_v17 = vsub.f32 %v1113_v18, %v1123_v46 }
 0x468   :  { %v1137_v19 = vmul.f32 1.442695, %v1929_v16 }
 0x469   :  { %v1453_v21 = vpop.eup %1452  ;;  %v1135_v13 = vmul.f32 1.442695, %v1129_v17 }
 0x46a   :  { %v1455_v20 = vpop.eup %1454  ;;  %1460 = vpow2.f32 %v1137_v19  ;;  %v1142_v22 = vsel %vm244_vm1, %v1453_v21, 0.0 }
 0x46b   :  { %1462 = vpow2.f32 %v1135_v13  ;;  %1143 = vadd.xlane.f32.xlu1 %v1142_v22  ;;  %v1139_v23 = vsel %vm244_vm1, %v1455_v20, 0.0 }
 0x46c   :  { %1140 = vadd.xlane.f32.xlu0 %v1139_v23 }
 0x470   :  { %v1457_v31 = vpop.eup %1456 }
 0x471   :  { %v1459_v24 = vpop.eup %1458  ;;  %v1082_v25 = vsel %vm244_vm1, %v1457_v31, 0.0 }
 0x472   :  { %1083 = vadd.xlane.f32.xlu1 %v1082_v25  ;;  %v1079_v26 = vsel %vm244_vm1, %v1459_v24, 0.0 }
 0x473   :  { %1080 = vadd.xlane.f32.xlu0 %v1079_v26 }
 0x474   :  { %v1461_v27 = vpop.eup %1460 }
 0x475   :  { %v1463_v28 = vpop.eup %1462  ;;  %v1148_v29 = vsel %vm244_vm1, %v1461_v27, 0.0 }
 0x476   :  { %1149 = vadd.xlane.f32.xlu1 %v1148_v29  ;;  %v1145_v32 = vsel %vm244_vm1, %v1463_v28, 0.0 }
 0x477   :  { %1146 = vadd.xlane.f32.xlu0 %v1145_v32 }
 0x4f8   :  { %v1144_v34 = vpop.xlane.xlu1 %1143 }
 0x4f9   :  { %1464 = vlog2.f32 %v1144_v34  ;;  %v1141_v35 = vpop.xlane.xlu0 %1140 }
 0x4fa   :  { %1466 = vlog2.f32 %v1141_v35 }
 0x4ff   :  { %v1084_v36 = vpop.xlane.xlu1 %1083 }
 0x500   :  { %1468 = vlog2.f32 %v1084_v36  ;;  %v1081_v37 = vpop.xlane.xlu0 %1080 }
 0x501   :  { %1470 = vlog2.f32 %v1081_v37 }
 0x503   :  { %v1465_v38 = vpop.eup %1464  ;;  %v1150_v39 = vpop.xlane.xlu1 %1149 }
 0x504   :  { %v1467_v33 = vpop.eup %1466  ;;  %v1154_v43 = vmul.f32 0.6931472, %v1465_v38  ;;  %1472 = vlog2.f32 %v1150_v39  ;;  %v1147_v41 = vpop.xlane.xlu0 %1146 }
 0x505   :  { %v1152_v44 = vmul.f32 0.6931472, %v1467_v33  ;;  %1474 = vlog2.f32 %v1147_v41 }
 0x506   :  { %v1160_v42 = vsub.f32 %v1128_v58, %v1154_v43 }
 0x507   :  { %v1159_v45 = vsub.f32 %v1127_v9, %v1152_v44 }
 0x508   :  { %1166 = vst.msk [vmem:[%s1974_s10 + $0x8] sm:$0xff] %vm244_vm1, %v1160_v42 }
 0x509   :  { %1165 = vst.msk [vmem:[%s1974_s10] sm:$0xff] %vm244_vm1, %v1159_v45 }
 0x50a   :  { %v1469_v47 = vpop.eup %1468 }
 0x50b   :  { %v1471_v48 = vpop.eup %1470  ;;  %v1088_v40 = vmul.f32 0.6931472, %v1469_v47 }
 0x50c   :  { %v1086_v53 = vmul.f32 0.6931472, %v1471_v48 }
 0x50d   :  { %v1090_v54 = vsub.f32 %v1923_v63, %v1088_v40 }
 0x50e   :  { %v1473_v55 = vpop.eup %1472  ;;  %v1089_v56 = vsub.f32 %v1925_v4, %v1086_v53 }
 0x50f   :  { %v1475_v51 = vpop.eup %1474  ;;  %1164 = vst.msk [vmem:[%s1975_s9 + $0x8] sm:$0xff] %vm244_vm1, %v1090_v54  ;;  %v1158_v57 = vmul.f32 0.6931472, %v1473_v55 }
 0x510   :  { %1163 = vst.msk [vmem:[%s1975_s9] sm:$0xff] %vm244_vm1, %v1089_v56  ;;  %v1156_v59 = vmul.f32 0.6931472, %v1475_v51 }
 0x511   :  { %v1162_v60 = vsub.f32 %v1929_v16, %v1158_v57 }
 0x512   :  { %v1161_v61 = vsub.f32 %v1129_v17, %v1156_v59 }
 0x513   :  { %1168 = vst.msk [vmem:[%s1974_s10 + $0x18] sm:$0xff] %vm244_vm1, %v1162_v60 }
 0x514   :  { %1167 = vst.msk [vmem:[%s1974_s10 + $0x10] sm:$0xff] %vm244_vm1, %v1161_v61 }

</bundles_post_ra>
